<compile_context>
chip_gen: v5e
topology: v5e:2x2
jax: 0.10.0
libtpu: 0.0.40
codegen_flags: <defaults>
</compile_context>

<pallas_src>
import jax
import jax.numpy as jnp
from jax.experimental import pallas as pl
from jax.experimental.pallas import tpu as pltpu


_NUM_WIN = 16            # 4x4 pool-window offsets, w = i*4 + j
_FPAD = 128              # lane-padded width of the 45 flattened pooled features
_COLS = _NUM_WIN * _FPAD # 2048
_IMG = 28 * 28           # 784


def _round_up(a, b):
    return (a + b - 1) // b * b


# ------------------------------ fused kernel -------------------------------

def _cnn_kernel(x_ref, mconv_ref, bcol_ref, wfc_ref, bfc_ref, out_ref):
    # x_ref:     (BN, 784)    flattened images (streamed per grid step)
    # mconv_ref: (784, 2048)  structured conv-as-matmul weights (VMEM resident)
    # bcol_ref:  (1, 128)     conv bias per pooled-feature column (resident)
    # wfc_ref:   (128, 128)   zero-padded FC weight (resident)
    # bfc_ref:   (1, 128)     zero-padded FC bias (resident)
    # out_ref:   (BN, 128)    zero-padded logits (streamed)
    z = jnp.dot(x_ref[...], mconv_ref[...],
                preferred_element_type=jnp.float32)           # (BN, 2048)

    # MaxPool2d(4): max over the 16 aligned 128-lane column groups (VPU only).
    m = z[:, 0:_FPAD]
    for w in range(1, _NUM_WIN):
        m = jnp.maximum(m, z[:, w * _FPAD:(w + 1) * _FPAD])

    # Conv bias + ReLU commute with the max (bias is constant per window, ReLU
    # is monotone), so apply them once on the pooled (BN, 128) block.
    pooled = jnp.maximum(m + bcol_ref[...], 0.0)              # (BN, 128)

    # Linear(45, 10) on the zero-padded feature/logit lanes.
    out_ref[...] = (
        jnp.dot(pooled, wfc_ref[...], preferred_element_type=jnp.float32)
        + bfc_ref[...]
    )


# --------------------------- parameter preparation -------------------------

def _prepare_params(w_conv, b_conv, w_fc, b_fc, dtype=jnp.float32):
    """Build the structured conv matrix and lane-padded FC params.

    Column index of M_conv: col = (i*4 + j) * 128 + (c*9 + ph*3 + pw), i.e. the
    4x4 pool-window offset major (128-lane aligned groups) and the PyTorch
    flatten order minor.  Row index: (2*oh + kh)*28 + (2*ow + kw) with
    oh = 4*ph + i, ow = 4*pw + j (only the 12x12 conv outputs the pool reads).
    Weight-only work -> can be hoisted/cached outside the per-batch forward.
    """
    I, J, PH, PW, C, KH, KW = jnp.meshgrid(
        jnp.arange(4), jnp.arange(4), jnp.arange(3), jnp.arange(3),
        jnp.arange(5), jnp.arange(4), jnp.arange(4), indexing="ij")
    oh = PH * 4 + I
    ow = PW * 4 + J
    rows = (2 * oh + KH) * 28 + (2 * ow + KW)                 # < 784
    cols = (I * 4 + J) * _FPAD + (C * 9 + PH * 3 + PW)        # < 2048
    vals = w_conv[C, 0, KH, KW].astype(dtype)
    mconv = jnp.zeros((_IMG, _COLS), dtype).at[rows.ravel(), cols.ravel()].set(
        vals.ravel())

    f = jnp.arange(_FPAD)
    bcol = jnp.where(f < 45, b_conv[jnp.minimum(f // 9, 4)], 0.0)
    bcol = bcol.astype(dtype).reshape(1, _FPAD)

    wfc_pad = jnp.zeros((_FPAD, _FPAD), dtype).at[:45, :10].set(w_fc.T.astype(dtype))
    bfc_pad = jnp.zeros((1, _FPAD), dtype).at[0, :10].set(b_fc.astype(dtype))
    return mconv, bcol, wfc_pad, bfc_pad


# ------------------------------ forward pass -------------------------------

def cnn_forward(x, w_conv, b_conv, w_fc, b_fc, *, block_n=256):
    """x: (N, 1, 28, 28) float32 (NCHW).  Returns logits (N, 10)."""
    N = x.shape[0]
    assert x.shape[1:] == (1, 28, 28)

    mconv, bcol, wfc_pad, bfc_pad = _prepare_params(w_conv, b_conv, w_fc, b_fc)

    x2 = x.reshape(N, _IMG).astype(jnp.float32)               # pure reshape, no shuffle
    bn = min(block_n, _round_up(N, 8))
    n_pad = _round_up(N, bn)
    if n_pad != N:
        x2 = jnp.pad(x2, ((0, n_pad - N), (0, 0)))
    grid = (n_pad // bn,)

    cost = pl.CostEstimate(
        flops=2 * n_pad * _IMG * _COLS + 2 * n_pad * _FPAD * _FPAD,
        transcendentals=0,
        bytes_accessed=4 * (x2.size + mconv.size + wfc_pad.size + n_pad * _FPAD),
    )

    out = pl.pallas_call(
        _cnn_kernel,
        out_shape=jax.ShapeDtypeStruct((n_pad, _FPAD), jnp.float32),
        grid=grid,
        in_specs=[
            pl.BlockSpec((bn, _IMG), lambda i: (i, 0)),        # streamed images
            pl.BlockSpec((_IMG, _COLS), lambda i: (0, 0)),     # resident conv matrix
            pl.BlockSpec((1, _FPAD), lambda i: (0, 0)),        # resident conv bias
            pl.BlockSpec((_FPAD, _FPAD), lambda i: (0, 0)),    # resident FC weight
            pl.BlockSpec((1, _FPAD), lambda i: (0, 0)),        # resident FC bias
        ],
        out_specs=pl.BlockSpec((bn, _FPAD), lambda i: (i, 0)),
        compiler_params=pltpu.CompilerParams(
            dimension_semantics=("parallel",),
            vmem_limit_bytes=32 * 1024 * 1024,
        ),
        cost_estimate=cost,
    )(x2, mconv, bcol, wfc_pad, bfc_pad)

    return out[:N, :10]


# --------------------------- pure-JAX reference ----------------------------

def _ref_forward(x, w_conv, b_conv, w_fc, b_fc):
    y = jax.lax.conv_general_dilated(
        x, w_conv, window_strides=(2, 2), padding="VALID",
        dimension_numbers=("NCHW", "OIHW", "NCHW"))
    y = jnp.maximum(y + b_conv[None, :, None, None], 0.0)
    y = jax.lax.reduce_window(y, -jnp.inf, jax.lax.max,
                              (1, 1, 4, 4), (1, 1, 4, 4), "VALID")
    flat = y.reshape(y.shape[0], -1)
    return flat @ w_fc.T + b_fc


# --------------------------------- main ------------------------------------

if __name__ == "__main__":
    key = jax.random.PRNGKey(0)
    k1, k2, k3, k4, k5 = jax.random.split(key, 5)

    # PyTorch-style uniform(-1/sqrt(fan_in), +1/sqrt(fan_in)) init.
    conv_bound = 1.0 / (1 * 4 * 4) ** 0.5
    fc_bound = 1.0 / 45.0 ** 0.5
    w_conv = jax.random.uniform(k1, (5, 1, 4, 4), jnp.float32, -conv_bound, conv_bound)
    b_conv = jax.random.uniform(k2, (5,), jnp.float32, -conv_bound, conv_bound)
    w_fc = jax.random.uniform(k3, (10, 45), jnp.float32, -fc_bound, fc_bound)
    b_fc = jax.random.uniform(k4, (10,), jnp.float32, -fc_bound, fc_bound)

    # Small batch of MNIST-sized inputs (Linear(45,10) implies 28x28 input).
    x = jax.random.normal(k5, (2, 1, 28, 28), jnp.float32)

    out = jax.jit(cnn_forward)(x, w_conv, b_conv, w_fc, b_fc)
    out = jax.block_until_ready(out)

    ref = _ref_forward(x, w_conv, b_conv, w_fc, b_fc)
    assert out.shape == (2, 10)
    assert jnp.allclose(out, ref, atol=1e-4, rtol=1e-4), "mismatch vs JAX reference"

    print("KERNEL_OK")
</pallas_src>

<mosaic_0001>
module attributes {stable_mosaic.version = 11 : i64} {
  func.func @_cnn_kernel(%arg0: i32, %arg1: memref<8x784xf32, #tpu.memory_space<vmem>>, %arg2: memref<784x2048xf32, #tpu.memory_space<vmem>>, %arg3: memref<1x128xf32, #tpu.memory_space<vmem>>, %arg4: memref<128x128xf32, #tpu.memory_space<vmem>>, %arg5: memref<1x128xf32, #tpu.memory_space<vmem>>, %arg6: memref<8x128xf32, #tpu.memory_space<vmem>>) attributes {dimension_semantics = [#tpu.dimension_semantics<parallel>], iteration_bounds = array<i64: 1>, scalar_prefetch = 0 : i64, scratch_operands = 0 : i64, tpu.core_type = #tpu.core_type<tc>, window_params = [{transform_indices = @transform_0, window_bounds = array<i64: 8, 784>}, {pipeline_mode = #tpu.pipeline_mode<synchronous>, transform_indices = @transform_1, window_bounds = array<i64: 784, 2048>}, {pipeline_mode = #tpu.pipeline_mode<synchronous>, transform_indices = @transform_2, window_bounds = array<i64: 1, 128>}, {pipeline_mode = #tpu.pipeline_mode<synchronous>, transform_indices = @transform_3, window_bounds = array<i64: 128, 128>}, {pipeline_mode = #tpu.pipeline_mode<synchronous>, transform_indices = @transform_4, window_bounds = array<i64: 1, 128>}, {transform_indices = @transform_5, window_bounds = array<i64: 8, 128>}]} {
    %c0 = arith.constant 0 : index
    %c0_0 = arith.constant 0 : index
    %0 = vector.load %arg1[%c0, %c0_0] : memref<8x784xf32, #tpu.memory_space<vmem>>, vector<8x784xf32>
    %c0_1 = arith.constant 0 : index
    %c0_2 = arith.constant 0 : index
    %1 = vector.load %arg2[%c0_1, %c0_2] : memref<784x2048xf32, #tpu.memory_space<vmem>>, vector<784x2048xf32>
    %cst = arith.constant dense<0.000000e+00> : vector<8x2048xf32>
    %2 = tpu.matmul %0, %1, %cst {dimension_numbers = #tpu.dot_dimension_numbers<[1], [0], [0], [1], [0, 0, 1, 1], [], []>} : vector<8x784xf32>, vector<784x2048xf32>, vector<8x2048xf32> -> vector<8x2048xf32>
    %3 = vector.extract_strided_slice %2 {offsets = [0, 0], sizes = [8, 128], strides = [1, 1]} : vector<8x2048xf32> to vector<8x128xf32>
    %4 = vector.extract_strided_slice %2 {offsets = [0, 128], sizes = [8, 128], strides = [1, 1]} : vector<8x2048xf32> to vector<8x128xf32>
    %5 = arith.maximumf %3, %4 : vector<8x128xf32>
    %6 = vector.extract_strided_slice %2 {offsets = [0, 256], sizes = [8, 128], strides = [1, 1]} : vector<8x2048xf32> to vector<8x128xf32>
    %7 = arith.maximumf %5, %6 : vector<8x128xf32>
    %8 = vector.extract_strided_slice %2 {offsets = [0, 384], sizes = [8, 128], strides = [1, 1]} : vector<8x2048xf32> to vector<8x128xf32>
    %9 = arith.maximumf %7, %8 : vector<8x128xf32>
    %10 = vector.extract_strided_slice %2 {offsets = [0, 512], sizes = [8, 128], strides = [1, 1]} : vector<8x2048xf32> to vector<8x128xf32>
    %11 = arith.maximumf %9, %10 : vector<8x128xf32>
    %12 = vector.extract_strided_slice %2 {offsets = [0, 640], sizes = [8, 128], strides = [1, 1]} : vector<8x2048xf32> to vector<8x128xf32>
    %13 = arith.maximumf %11, %12 : vector<8x128xf32>
    %14 = vector.extract_strided_slice %2 {offsets = [0, 768], sizes = [8, 128], strides = [1, 1]} : vector<8x2048xf32> to vector<8x128xf32>
    %15 = arith.maximumf %13, %14 : vector<8x128xf32>
    %16 = vector.extract_strided_slice %2 {offsets = [0, 896], sizes = [8, 128], strides = [1, 1]} : vector<8x2048xf32> to vector<8x128xf32>
    %17 = arith.maximumf %15, %16 : vector<8x128xf32>
    %18 = vector.extract_strided_slice %2 {offsets = [0, 1024], sizes = [8, 128], strides = [1, 1]} : vector<8x2048xf32> to vector<8x128xf32>
    %19 = arith.maximumf %17, %18 : vector<8x128xf32>
    %20 = vector.extract_strided_slice %2 {offsets = [0, 1152], sizes = [8, 128], strides = [1, 1]} : vector<8x2048xf32> to vector<8x128xf32>
    %21 = arith.maximumf %19, %20 : vector<8x128xf32>
    %22 = vector.extract_strided_slice %2 {offsets = [0, 1280], sizes = [8, 128], strides = [1, 1]} : vector<8x2048xf32> to vector<8x128xf32>
    %23 = arith.maximumf %21, %22 : vector<8x128xf32>
    %24 = vector.extract_strided_slice %2 {offsets = [0, 1408], sizes = [8, 128], strides = [1, 1]} : vector<8x2048xf32> to vector<8x128xf32>
    %25 = arith.maximumf %23, %24 : vector<8x128xf32>
    %26 = vector.extract_strided_slice %2 {offsets = [0, 1536], sizes = [8, 128], strides = [1, 1]} : vector<8x2048xf32> to vector<8x128xf32>
    %27 = arith.maximumf %25, %26 : vector<8x128xf32>
    %28 = vector.extract_strided_slice %2 {offsets = [0, 1664], sizes = [8, 128], strides = [1, 1]} : vector<8x2048xf32> to vector<8x128xf32>
    %29 = arith.maximumf %27, %28 : vector<8x128xf32>
    %30 = vector.extract_strided_slice %2 {offsets = [0, 1792], sizes = [8, 128], strides = [1, 1]} : vector<8x2048xf32> to vector<8x128xf32>
    %31 = arith.maximumf %29, %30 : vector<8x128xf32>
    %32 = vector.extract_strided_slice %2 {offsets = [0, 1920], sizes = [8, 128], strides = [1, 1]} : vector<8x2048xf32> to vector<8x128xf32>
    %33 = arith.maximumf %31, %32 : vector<8x128xf32>
    %c0_3 = arith.constant 0 : index
    %c0_4 = arith.constant 0 : index
    %34 = vector.load %arg3[%c0_3, %c0_4] : memref<1x128xf32, #tpu.memory_space<vmem>>, vector<1x128xf32>
    %35 = vector.broadcast %34 : vector<1x128xf32> to vector<8x128xf32>
    %36 = arith.addf %33, %35 : vector<8x128xf32>
    %cst_5 = arith.constant 0.000000e+00 : f32
    %37 = vector.broadcast %cst_5 : f32 to vector<8x128xf32>
    %38 = arith.maximumf %36, %37 : vector<8x128xf32>
    %c0_6 = arith.constant 0 : index
    %c0_7 = arith.constant 0 : index
    %39 = vector.load %arg4[%c0_6, %c0_7] : memref<128x128xf32, #tpu.memory_space<vmem>>, vector<128x128xf32>
    %cst_8 = arith.constant dense<0.000000e+00> : vector<8x128xf32>
    %40 = tpu.matmul %38, %39, %cst_8 {dimension_numbers = #tpu.dot_dimension_numbers<[1], [0], [0], [1], [0, 0, 1, 1], [], []>} : vector<8x128xf32>, vector<128x128xf32>, vector<8x128xf32> -> vector<8x128xf32>
    %c0_9 = arith.constant 0 : index
    %c0_10 = arith.constant 0 : index
    %41 = vector.load %arg5[%c0_9, %c0_10] : memref<1x128xf32, #tpu.memory_space<vmem>>, vector<1x128xf32>
    %42 = vector.broadcast %41 : vector<1x128xf32> to vector<8x128xf32>
    %43 = arith.addf %40, %42 : vector<8x128xf32>
    %c0_11 = arith.constant 0 : index
    %c0_12 = arith.constant 0 : index
    %44 = vector.load %arg6[%c0_11, %c0_12] : memref<8x128xf32, #tpu.memory_space<vmem>>, vector<8x128xf32>
    tpu.vector_store %arg6[%c0_11, %c0_12], %43 {strides = array<i32>} : memref<8x128xf32, #tpu.memory_space<vmem>>, vector<8x128xf32>,
    return
  }
  func.func @transform_0(%arg0: i32) -> (i32, i32) {
    %c0_i32 = arith.constant 0 : i32
    %c0_i32_0 = arith.constant 0 : i32
    return %arg0, %c0_i32 : i32, i32
  }
  func.func @transform_1(%arg0: i32) -> (i32, i32) {
    %c0_i32 = arith.constant 0 : i32
    %c0_i32_0 = arith.constant 0 : i32
    %c0_i32_1 = arith.constant 0 : i32
    return %c0_i32, %c0_i32_0 : i32, i32
  }
  func.func @transform_2(%arg0: i32) -> (i32, i32) {
    %c0_i32 = arith.constant 0 : i32
    %c0_i32_0 = arith.constant 0 : i32
    %c0_i32_1 = arith.constant 0 : i32
    return %c0_i32, %c0_i32_0 : i32, i32
  }
  func.func @transform_3(%arg0: i32) -> (i32, i32) {
    %c0_i32 = arith.constant 0 : i32
    %c0_i32_0 = arith.constant 0 : i32
    %c0_i32_1 = arith.constant 0 : i32
    return %c0_i32, %c0_i32_0 : i32, i32
  }
  func.func @transform_4(%arg0: i32) -> (i32, i32) {
    %c0_i32 = arith.constant 0 : i32
    %c0_i32_0 = arith.constant 0 : i32
    %c0_i32_1 = arith.constant 0 : i32
    return %c0_i32, %c0_i32_0 : i32, i32
  }
  func.func @transform_5(%arg0: i32) -> (i32, i32) {
    %c0_i32 = arith.constant 0 : i32
    %c0_i32_0 = arith.constant 0 : i32
    return %arg0, %c0_i32 : i32, i32
  }
}

</mosaic_0001>

<bundles_post_ra>
// kernel: cnn_forward.1
= control target key start
LH: loop header
LB: loop body
LE: loop exit
PB: predicated region body
PF: predicated region fallthrough
CT: control target
= control target key end

     0   :  { %vm1595_vm0 = vcmask 130048   ;;  %s9147_s1 = inlined_call_operand.vmem [shape: f32[784,2048], index: 1, kind: input, shape index: {}]   ;;  %s9148_s0 = inlined_call_operand.vmem [shape: f32[8,784], index: 0, kind: input, shape index: {}]   ;;  %s9149_s2 = inlined_call_operand.vmem [shape: f32[1,128], index: 2, kind: input, shape index: {}]   ;;  %s9150_s4 = inlined_call_operand.vmem [shape: f32[1,128], index: 4, kind: input, shape index: {}]   ;;  %s9151_s3 = inlined_call_operand.vmem [shape: f32[128,128], index: 3, kind: input, shape index: {}]   ;;  %s9152_s5 = inlined_call_operand.vmem [shape: f32[8,128], index: 5, kind: output, shape index: {}]  }
   0x1   :  { %v267_v0 = vld [vmem:[%s9147_s1 + $0x780] sm:$0xff] }
   0x2   :  { %v523_v1 = vld [vmem:[%s9147_s1 + $0xf80] sm:$0xff]  ;;  %1599 = vmatpush.msra.mxu0 %v267_v0 }
   0x3   :  { %v779_v2 = vld [vmem:[%s9147_s1 + $0x1780] sm:$0xff]  ;;  %1619 = vmatpush.msra.mxu1 %v523_v1 }
   0x4   :  { %v1035_v3 = vld [vmem:[%s9147_s1 + $0x1f80] sm:$0xff]  ;;  %1639 = vmatpush.msra.mxu2 %v779_v2 }
   0x5   :  { %v251_v4 = vld [vmem:[%s9147_s1 + $0x700] sm:$0xff]  ;;  %1659 = vmatpush.msra.mxu3 %v1035_v3  ;;  %v268_v3 = vld [vmem:[%s9147_s1 + $0x788] sm:$0xff] }
   0x6   :  { %v507_v5 = vld [vmem:[%s9147_s1 + $0xf00] sm:$0xff]  ;;  %1600 = vmatpush.msra.mxu0 %v251_v4 }
   0x7   :  { %v763_v6 = vld [vmem:[%s9147_s1 + $0x1700] sm:$0xff]  ;;  %1620 = vmatpush.msra.mxu1 %v507_v5 }
   0x8   :  { %v1019_v7 = vld [vmem:[%s9147_s1 + $0x1f00] sm:$0xff]  ;;  %1640 = vmatpush.msra.mxu2 %v763_v6 }
   0x9   :  { %v235_v8 = vld [vmem:[%s9147_s1 + $0x680] sm:$0xff]  ;;  %1660 = vmatpush.msra.mxu3 %v1019_v7  ;;  %v252_v7 = vld [vmem:[%s9147_s1 + $0x708] sm:$0xff] }
   0xa   :  { %v491_v9 = vld [vmem:[%s9147_s1 + $0xe80] sm:$0xff]  ;;  %1601 = vmatpush.msra.mxu0 %v235_v8  ;;  %v4207_v8 = vld [vmem:[%s9148_s0 + $0x10] sm:$0xff] }
   0xb   :  { %v747_v10 = vld [vmem:[%s9147_s1 + $0x1680] sm:$0xff]  ;;  %1621 = vmatpush.msra.mxu1 %v491_v9 }
   0xc   :  { %v1003_v11 = vld [vmem:[%s9147_s1 + $0x1e80] sm:$0xff]  ;;  %1641 = vmatpush.msra.mxu2 %v747_v10  ;;  %v524_v10 = vld [vmem:[%s9147_s1 + $0xf88] sm:$0xff] }
   0xd   :  { %v219_v12 = vld [vmem:[%s9147_s1 + $0x600] sm:$0xff]  ;;  %1661 = vmatpush.msra.mxu3 %v1003_v11 }
   0xe   :  { %v475_v13 = vld [vmem:[%s9147_s1 + $0xe00] sm:$0xff]  ;;  %1602 = vmatpush.msra.mxu0 %v219_v12  ;;  %v236_v12 = vld [vmem:[%s9147_s1 + $0x688] sm:$0xff] }
   0xf   :  { %v731_v14 = vld [vmem:[%s9147_s1 + $0x1600] sm:$0xff]  ;;  %1622 = vmatpush.msra.mxu1 %v475_v13 }
  0x10   :  { %v987_v15 = vld [vmem:[%s9147_s1 + $0x1e00] sm:$0xff]  ;;  %1642 = vmatpush.msra.mxu2 %v731_v14  ;;  %v4228_v14 = vld [vmem:[%s9148_s0 + $0x18] sm:$0xff] }
  0x11   :  { %v203_v16 = vld [vmem:[%s9147_s1 + $0x580] sm:$0xff]  ;;  %1662 = vmatpush.msra.mxu3 %v987_v15  ;;  %v508_v15 = vld [vmem:[%s9147_s1 + $0xf08] sm:$0xff] }
  0x12   :  { %v459_v17 = vld [vmem:[%s9147_s1 + $0xd80] sm:$0xff]  ;;  %1603 = vmatpush.msra.mxu0 %v203_v16 }
  0x13   :  { %v715_v18 = vld [vmem:[%s9147_s1 + $0x1580] sm:$0xff]  ;;  %1623 = vmatpush.msra.mxu1 %v459_v17  ;;  %v220_v17 = vld [vmem:[%s9147_s1 + $0x608] sm:$0xff] }
  0x14   :  { %v971_v19 = vld [vmem:[%s9147_s1 + $0x1d80] sm:$0xff]  ;;  %1643 = vmatpush.msra.mxu2 %v715_v18 }
  0x15   :  { %v187_v20 = vld [vmem:[%s9147_s1 + $0x500] sm:$0xff]  ;;  %1663 = vmatpush.msra.mxu3 %v971_v19  ;;  %v4247_v19 = vld [vmem:[%s9148_s0 + $0x8] sm:$0xff] }
  0x16   :  { %v443_v21 = vld [vmem:[%s9147_s1 + $0xd00] sm:$0xff]  ;;  %1604 = vmatpush.msra.mxu0 %v187_v20  ;;  %v492_v20 = vld [vmem:[%s9147_s1 + $0xe88] sm:$0xff] }
  0x17   :  { %v699_v22 = vld [vmem:[%s9147_s1 + $0x1500] sm:$0xff]  ;;  %1624 = vmatpush.msra.mxu1 %v443_v21 }
  0x18   :  { %v955_v23 = vld [vmem:[%s9147_s1 + $0x1d00] sm:$0xff]  ;;  %1644 = vmatpush.msra.mxu2 %v699_v22 }
  0x19   :  { %v171_v24 = vld [vmem:[%s9147_s1 + $0x480] sm:$0xff]  ;;  %1664 = vmatpush.msra.mxu3 %v955_v23  ;;  %v204_v23 = vld [vmem:[%s9147_s1 + $0x588] sm:$0xff] }
  0x1a   :  { %v427_v25 = vld [vmem:[%s9147_s1 + $0xc80] sm:$0xff]  ;;  %1605 = vmatpush.msra.mxu0 %v171_v24  ;;  %v476_v24 = vld [vmem:[%s9147_s1 + $0xe08] sm:$0xff] }
  0x1b   :  { %v683_v26 = vld [vmem:[%s9147_s1 + $0x1480] sm:$0xff]  ;;  %1625 = vmatpush.msra.mxu1 %v427_v25 }
  0x1c   :  { %v939_v27 = vld [vmem:[%s9147_s1 + $0x1c80] sm:$0xff]  ;;  %1645 = vmatpush.msra.mxu2 %v683_v26 }
  0x1d   :  { %v155_v28 = vld [vmem:[%s9147_s1 + $0x400] sm:$0xff]  ;;  %1665 = vmatpush.msra.mxu3 %v939_v27  ;;  %v188_v27 = vld [vmem:[%s9147_s1 + $0x508] sm:$0xff] }
  0x1e   :  { %v411_v29 = vld [vmem:[%s9147_s1 + $0xc00] sm:$0xff]  ;;  %1606 = vmatpush.msra.mxu0 %v155_v28  ;;  %v460_v28 = vld [vmem:[%s9147_s1 + $0xd88] sm:$0xff] }
  0x1f   :  { %v667_v30 = vld [vmem:[%s9147_s1 + $0x1400] sm:$0xff]  ;;  %1626 = vmatpush.msra.mxu1 %v411_v29 }
  0x20   :  { %v923_v31 = vld [vmem:[%s9147_s1 + $0x1c00] sm:$0xff]  ;;  %1646 = vmatpush.msra.mxu2 %v667_v30 }
  0x21   :  { %v139_v32 = vld [vmem:[%s9147_s1 + $0x380] sm:$0xff]  ;;  %1666 = vmatpush.msra.mxu3 %v923_v31  ;;  %v172_v31 = vld [vmem:[%s9147_s1 + $0x488] sm:$0xff] }
  0x22   :  { %v395_v33 = vld [vmem:[%s9147_s1 + $0xb80] sm:$0xff]  ;;  %1607 = vmatpush.msra.mxu0 %v139_v32  ;;  %v444_v32 = vld [vmem:[%s9147_s1 + $0xd08] sm:$0xff] }
  0x23   :  { %v651_v34 = vld [vmem:[%s9147_s1 + $0x1380] sm:$0xff]  ;;  %1627 = vmatpush.msra.mxu1 %v395_v33 }
  0x24   :  { %v907_v35 = vld [vmem:[%s9147_s1 + $0x1b80] sm:$0xff]  ;;  %1647 = vmatpush.msra.mxu2 %v651_v34 }
  0x25   :  { %v123_v36 = vld [vmem:[%s9147_s1 + $0x300] sm:$0xff]  ;;  %1667 = vmatpush.msra.mxu3 %v907_v35  ;;  %v156_v35 = vld [vmem:[%s9147_s1 + $0x408] sm:$0xff] }
  0x26   :  { %v379_v37 = vld [vmem:[%s9147_s1 + $0xb00] sm:$0xff]  ;;  %1608 = vmatpush.msra.mxu0 %v123_v36  ;;  %v428_v36 = vld [vmem:[%s9147_s1 + $0xc88] sm:$0xff] }
  0x27   :  { %v635_v38 = vld [vmem:[%s9147_s1 + $0x1300] sm:$0xff]  ;;  %1628 = vmatpush.msra.mxu1 %v379_v37 }
  0x28   :  { %v891_v39 = vld [vmem:[%s9147_s1 + $0x1b00] sm:$0xff]  ;;  %1648 = vmatpush.msra.mxu2 %v635_v38 }
  0x29   :  { %v107_v40 = vld [vmem:[%s9147_s1 + $0x280] sm:$0xff]  ;;  %1668 = vmatpush.msra.mxu3 %v891_v39  ;;  %v140_v39 = vld [vmem:[%s9147_s1 + $0x388] sm:$0xff] }
  0x2a   :  { %v363_v41 = vld [vmem:[%s9147_s1 + $0xa80] sm:$0xff]  ;;  %1609 = vmatpush.msra.mxu0 %v107_v40  ;;  %v412_v40 = vld [vmem:[%s9147_s1 + $0xc08] sm:$0xff] }
  0x2b   :  { %v619_v42 = vld [vmem:[%s9147_s1 + $0x1280] sm:$0xff]  ;;  %1629 = vmatpush.msra.mxu1 %v363_v41 }
  0x2c   :  { %v875_v43 = vld [vmem:[%s9147_s1 + $0x1a80] sm:$0xff]  ;;  %1649 = vmatpush.msra.mxu2 %v619_v42 }
  0x2d   :  { %v91_v44 = vld [vmem:[%s9147_s1 + $0x200] sm:$0xff]  ;;  %1669 = vmatpush.msra.mxu3 %v875_v43  ;;  %v124_v43 = vld [vmem:[%s9147_s1 + $0x308] sm:$0xff] }
  0x2e   :  { %v347_v45 = vld [vmem:[%s9147_s1 + $0xa00] sm:$0xff]  ;;  %1610 = vmatpush.msra.mxu0 %v91_v44  ;;  %v396_v44 = vld [vmem:[%s9147_s1 + $0xb88] sm:$0xff] }
  0x2f   :  { %v603_v46 = vld [vmem:[%s9147_s1 + $0x1200] sm:$0xff]  ;;  %1630 = vmatpush.msra.mxu1 %v347_v45 }
  0x30   :  { %v859_v47 = vld [vmem:[%s9147_s1 + $0x1a00] sm:$0xff]  ;;  %1650 = vmatpush.msra.mxu2 %v603_v46 }
  0x31   :  { %v75_v48 = vld [vmem:[%s9147_s1 + $0x180] sm:$0xff]  ;;  %1670 = vmatpush.msra.mxu3 %v859_v47  ;;  %v108_v47 = vld [vmem:[%s9147_s1 + $0x288] sm:$0xff] }
  0x32   :  { %v331_v49 = vld [vmem:[%s9147_s1 + $0x980] sm:$0xff]  ;;  %1611 = vmatpush.msra.mxu0 %v75_v48  ;;  %v380_v48 = vld [vmem:[%s9147_s1 + $0xb08] sm:$0xff] }
  0x33   :  { %v587_v50 = vld [vmem:[%s9147_s1 + $0x1180] sm:$0xff]  ;;  %1631 = vmatpush.msra.mxu1 %v331_v49 }
  0x34   :  { %v843_v51 = vld [vmem:[%s9147_s1 + $0x1980] sm:$0xff]  ;;  %1651 = vmatpush.msra.mxu2 %v587_v50 }
  0x35   :  { %v59_v52 = vld [vmem:[%s9147_s1 + $0x100] sm:$0xff]  ;;  %1671 = vmatpush.msra.mxu3 %v843_v51  ;;  %v92_v51 = vld [vmem:[%s9147_s1 + $0x208] sm:$0xff] }
  0x36   :  { %v315_v53 = vld [vmem:[%s9147_s1 + $0x900] sm:$0xff]  ;;  %1612 = vmatpush.msra.mxu0 %v59_v52  ;;  %v364_v52 = vld [vmem:[%s9147_s1 + $0xa88] sm:$0xff] }
  0x37   :  { %v571_v54 = vld [vmem:[%s9147_s1 + $0x1100] sm:$0xff]  ;;  %1632 = vmatpush.msra.mxu1 %v315_v53 }
  0x38   :  { %v827_v55 = vld [vmem:[%s9147_s1 + $0x1900] sm:$0xff]  ;;  %1652 = vmatpush.msra.mxu2 %v571_v54 }
  0x39   :  { %v43_v56 = vld [vmem:[%s9147_s1 + $0x80] sm:$0xff]  ;;  %1672 = vmatpush.msra.mxu3 %v827_v55  ;;  %v76_v55 = vld [vmem:[%s9147_s1 + $0x188] sm:$0xff] }
  0x3a   :  { %v299_v57 = vld [vmem:[%s9147_s1 + $0x880] sm:$0xff]  ;;  %1613 = vmatpush.msra.mxu0 %v43_v56  ;;  %v348_v56 = vld [vmem:[%s9147_s1 + $0xa08] sm:$0xff] }
  0x3b   :  { %v555_v58 = vld [vmem:[%s9147_s1 + $0x1080] sm:$0xff]  ;;  %1633 = vmatpush.msra.mxu1 %v299_v57 }
  0x3c   :  { %v811_v59 = vld [vmem:[%s9147_s1 + $0x1880] sm:$0xff]  ;;  %1653 = vmatpush.msra.mxu2 %v555_v58 }
  0x3d   :  { %v27_v60 = vld [vmem:[%s9147_s1] sm:$0xff]  ;;  %1673 = vmatpush.msra.mxu3 %v811_v59  ;;  %v60_v59 = vld [vmem:[%s9147_s1 + $0x108] sm:$0xff] }
  0x3e   :  { %v283_v61 = vld [vmem:[%s9147_s1 + $0x800] sm:$0xff]  ;;  %1614 = vmatpush.msra.mxu0 %v27_v60  ;;  %v332_v60 = vld [vmem:[%s9147_s1 + $0x988] sm:$0xff] }
  0x3f   :  { %v539_v62 = vld [vmem:[%s9147_s1 + $0x1000] sm:$0xff]  ;;  %1634 = vmatpush.msra.mxu1 %v283_v61 }
  0x40   :  { %v795_v63 = vld [vmem:[%s9147_s1 + $0x1800] sm:$0xff]  ;;  %1654 = vmatpush.msra.mxu2 %v539_v62  ;;  %1635 = vmatmul.f32.vlgmr.msra.gmra.mxu1 %v4247_v19 }
  0x41   :  { %v1291_v0 = vld [vmem:[%s9147_s1 + $0x2780] sm:$0xff]  ;;  %1674 = vmatpush.msra.mxu3 %v795_v63  ;;  %1655 = vmatmul.f32.vlgmr.msra.gmra.mxu2 %v4207_v8  ;;  %v44_v63 = vld [vmem:[%s9147_s1 + $0x88] sm:$0xff] }
  0x42   :  { %v1547_v1 = vld [vmem:[%s9147_s1 + $0x2f80] sm:$0xff]  ;;  %1679 = vmatpush.msrb.mxu0 %v1291_v0  ;;  %1675 = vmatmul.f32.vlgmr.msra.gmra.mxu3 %v4228_v14  ;;  %v4387_v0 = vld [vmem:[%s9148_s0 + $0x30] sm:$0xff] }
  0x43   :  { %v1579_v2 = vld [vmem:[%s9147_s1 + $0x3080] sm:$0xff]  ;;  %1699 = vmatpush.msrb.mxu1 %v1547_v1  ;;  %1739 = vmatpush.msrb.mxu3 %v268_v3 }
  0x44   :  { %v1275_v4 = vld [vmem:[%s9147_s1 + $0x2700] sm:$0xff]  ;;  %1733 = vmatpush.msrb.mxu2 %v1579_v2  ;;  %v316_v2 = vld [vmem:[%s9147_s1 + $0x908] sm:$0xff] }
  0x45   :  { %v1531_v5 = vld [vmem:[%s9147_s1 + $0x2f00] sm:$0xff]  ;;  %1680 = vmatpush.msrb.mxu0 %v1275_v4  ;;  %1740 = vmatpush.msrb.mxu3 %v252_v7  ;;  %v28_v4 = vld [vmem:[%s9147_s1 + $0x8] sm:$0xff] }
  0x46   :  { %v1563_v6 = vld [vmem:[%s9147_s1 + $0x3000] sm:$0xff]  ;;  %1700 = vmatpush.msrb.mxu1 %v1531_v5  ;;  %v1036_v7 = vld [vmem:[%s9147_s1 + $0x1f88] sm:$0xff] }
  0x47   :  { %v1259_v9 = vld [vmem:[%s9147_s1 + $0x2680] sm:$0xff]  ;;  %1734 = vmatpush.msrb.mxu2 %v1563_v6  ;;  %1741 = vmatpush.msrb.mxu3 %v236_v12  ;;  %v300_v6 = vld [vmem:[%s9147_s1 + $0x888] sm:$0xff] }
  0x48   :  { %v1515_v11 = vld [vmem:[%s9147_s1 + $0x2e80] sm:$0xff]  ;;  %1681 = vmatpush.msrb.mxu0 %v1259_v9  ;;  %v1292_v9 = vld [vmem:[%s9147_s1 + $0x2788] sm:$0xff] }
  0x49   :  { %v1243_v13 = vld [vmem:[%s9147_s1 + $0x2600] sm:$0xff]  ;;  %1759 = vmatpush.msra.mxu2 %v524_v10  ;;  %1701 = vmatpush.msrb.mxu1 %v1515_v11  ;;  %v4420_v10 = vld [vmem:[%s9148_s0 + $0x28] sm:$0xff] }
  0x4a   :  { %v1499_v16 = vld [vmem:[%s9147_s1 + $0x2e00] sm:$0xff]  ;;  %1682 = vmatpush.msrb.mxu0 %v1243_v13  ;;  %1742 = vmatpush.msrb.mxu3 %v220_v17  ;;  %v284_v11 = vld [vmem:[%s9147_s1 + $0x808] sm:$0xff] }
  0x4b   :  { %v4242_v18 = vld [vmem:[%s9148_s0] sm:$0xff]  ;;  %1760 = vmatpush.msra.mxu2 %v508_v15  ;;  %1702 = vmatpush.msrb.mxu1 %v1499_v16  ;;  %v1020_v12 = vld [vmem:[%s9147_s1 + $0x1f08] sm:$0xff] }
  0x4c   :  { %v1227_v21 = vld [vmem:[%s9147_s1 + $0x2580] sm:$0xff]  ;;  %1615 = vmatmul.f32.vlgmr.msra.gmra.mxu0 %v4242_v18  ;;  %1743 = vmatpush.msrb.mxu3 %v204_v23  ;;  %v1276_v13 = vld [vmem:[%s9147_s1 + $0x2708] sm:$0xff] }
  0x4d   :  { %v1483_v22 = vld [vmem:[%s9147_s1 + $0x2d80] sm:$0xff]  ;;  %1761 = vmatpush.msra.mxu2 %v492_v20  ;;  %1683 = vmatpush.msrb.mxu0 %v1227_v21  ;;  %v780_v15 = vld [vmem:[%s9147_s1 + $0x1788] sm:$0xff] }
  0x4e   :  { %v1211_v25 = vld [vmem:[%s9147_s1 + $0x2500] sm:$0xff]  ;;  %1703 = vmatpush.msrb.mxu1 %v1483_v22  ;;  %1744 = vmatpush.msrb.mxu3 %v188_v27  ;;  %v1548_v16 = vld [vmem:[%s9147_s1 + $0x2f88] sm:$0xff] }
  0x4f   :  { %v1467_v26 = vld [vmem:[%s9147_s1 + $0x2d00] sm:$0xff]  ;;  %1762 = vmatpush.msra.mxu2 %v476_v24  ;;  %1684 = vmatpush.msrb.mxu0 %v1211_v25  ;;  %v1004_v17 = vld [vmem:[%s9147_s1 + $0x1e88] sm:$0xff] }
  0x50   :  { %v1195_v29 = vld [vmem:[%s9147_s1 + $0x2480] sm:$0xff]  ;;  %1704 = vmatpush.msrb.mxu1 %v1467_v26  ;;  %1745 = vmatpush.msrb.mxu3 %v172_v31  ;;  %v1260_v20 = vld [vmem:[%s9147_s1 + $0x2688] sm:$0xff] }
  0x51   :  { %v1451_v30 = vld [vmem:[%s9147_s1 + $0x2c80] sm:$0xff]  ;;  %1763 = vmatpush.msra.mxu2 %v460_v28  ;;  %1685 = vmatpush.msrb.mxu0 %v1195_v29  ;;  %v764_v21 = vld [vmem:[%s9147_s1 + $0x1708] sm:$0xff] }
  0x52   :  { %v1179_v33 = vld [vmem:[%s9147_s1 + $0x2400] sm:$0xff]  ;;  %1705 = vmatpush.msrb.mxu1 %v1451_v30  ;;  %1746 = vmatpush.msrb.mxu3 %v156_v35  ;;  %v1532_v22 = vld [vmem:[%s9147_s1 + $0x2f08] sm:$0xff] }
  0x53   :  { %v1435_v34 = vld [vmem:[%s9147_s1 + $0x2c00] sm:$0xff]  ;;  %1764 = vmatpush.msra.mxu2 %v444_v32  ;;  %1686 = vmatpush.msrb.mxu0 %v1179_v33  ;;  %v988_v23 = vld [vmem:[%s9147_s1 + $0x1e08] sm:$0xff] }
  0x54   :  { %v1163_v37 = vld [vmem:[%s9147_s1 + $0x2380] sm:$0xff]  ;;  %1706 = vmatpush.msrb.mxu1 %v1435_v34  ;;  %1747 = vmatpush.msrb.mxu3 %v140_v39  ;;  %v1244_v24 = vld [vmem:[%s9147_s1 + $0x2608] sm:$0xff] }
  0x55   :  { %v1419_v38 = vld [vmem:[%s9147_s1 + $0x2b80] sm:$0xff]  ;;  %1765 = vmatpush.msra.mxu2 %v428_v36  ;;  %1687 = vmatpush.msrb.mxu0 %v1163_v37  ;;  %v748_v25 = vld [vmem:[%s9147_s1 + $0x1688] sm:$0xff] }
  0x56   :  { %v1147_v41 = vld [vmem:[%s9147_s1 + $0x2300] sm:$0xff]  ;;  %1707 = vmatpush.msrb.mxu1 %v1419_v38  ;;  %1748 = vmatpush.msrb.mxu3 %v124_v43  ;;  %v1516_v26 = vld [vmem:[%s9147_s1 + $0x2e88] sm:$0xff] }
  0x57   :  { %v1403_v42 = vld [vmem:[%s9147_s1 + $0x2b00] sm:$0xff]  ;;  %1766 = vmatpush.msra.mxu2 %v412_v40  ;;  %1688 = vmatpush.msrb.mxu0 %v1147_v41  ;;  %v972_v27 = vld [vmem:[%s9147_s1 + $0x1d88] sm:$0xff] }
  0x58   :  { %v1131_v45 = vld [vmem:[%s9147_s1 + $0x2280] sm:$0xff]  ;;  %1708 = vmatpush.msrb.mxu1 %v1403_v42  ;;  %1749 = vmatpush.msrb.mxu3 %v108_v47  ;;  %v1228_v28 = vld [vmem:[%s9147_s1 + $0x2588] sm:$0xff] }
  0x59   :  { %v1387_v46 = vld [vmem:[%s9147_s1 + $0x2a80] sm:$0xff]  ;;  %1767 = vmatpush.msra.mxu2 %v396_v44  ;;  %1689 = vmatpush.msrb.mxu0 %v1131_v45  ;;  %v732_v29 = vld [vmem:[%s9147_s1 + $0x1608] sm:$0xff] }
  0x5a   :  { %v1115_v49 = vld [vmem:[%s9147_s1 + $0x2200] sm:$0xff]  ;;  %1709 = vmatpush.msrb.mxu1 %v1387_v46  ;;  %1750 = vmatpush.msrb.mxu3 %v92_v51  ;;  %v1500_v30 = vld [vmem:[%s9147_s1 + $0x2e08] sm:$0xff] }
  0x5b   :  { %v1371_v50 = vld [vmem:[%s9147_s1 + $0x2a00] sm:$0xff]  ;;  %1768 = vmatpush.msra.mxu2 %v380_v48  ;;  %1690 = vmatpush.msrb.mxu0 %v1115_v49  ;;  %v956_v31 = vld [vmem:[%s9147_s1 + $0x1d08] sm:$0xff] }
  0x5c   :  { %v1099_v53 = vld [vmem:[%s9147_s1 + $0x2180] sm:$0xff]  ;;  %1710 = vmatpush.msrb.mxu1 %v1371_v50  ;;  %1751 = vmatpush.msrb.mxu3 %v76_v55  ;;  %v1212_v32 = vld [vmem:[%s9147_s1 + $0x2508] sm:$0xff] }
  0x5d   :  { %v1355_v54 = vld [vmem:[%s9147_s1 + $0x2980] sm:$0xff]  ;;  %1769 = vmatpush.msra.mxu2 %v364_v52  ;;  %1691 = vmatpush.msrb.mxu0 %v1099_v53  ;;  %v716_v33 = vld [vmem:[%s9147_s1 + $0x1588] sm:$0xff] }
  0x5e   :  { %v1083_v57 = vld [vmem:[%s9147_s1 + $0x2100] sm:$0xff]  ;;  %1711 = vmatpush.msrb.mxu1 %v1355_v54  ;;  %1752 = vmatpush.msrb.mxu3 %v60_v59  ;;  %v1484_v34 = vld [vmem:[%s9147_s1 + $0x2d88] sm:$0xff] }
  0x5f   :  { %v1339_v58 = vld [vmem:[%s9147_s1 + $0x2900] sm:$0xff]  ;;  %1770 = vmatpush.msra.mxu2 %v348_v56  ;;  %1692 = vmatpush.msrb.mxu0 %v1083_v57  ;;  %v940_v35 = vld [vmem:[%s9147_s1 + $0x1c88] sm:$0xff] }
  0x60   :  { %v1067_v61 = vld [vmem:[%s9147_s1 + $0x2080] sm:$0xff]  ;;  %1712 = vmatpush.msrb.mxu1 %v1339_v58  ;;  %1753 = vmatpush.msrb.mxu3 %v44_v63  ;;  %v1196_v36 = vld [vmem:[%s9147_s1 + $0x2488] sm:$0xff] }
  0x61   :  { %v1323_v62 = vld [vmem:[%s9147_s1 + $0x2880] sm:$0xff]  ;;  %1771 = vmatpush.msra.mxu2 %v332_v60  ;;  %1693 = vmatpush.msrb.mxu0 %v1067_v61  ;;  %v700_v37 = vld [vmem:[%s9147_s1 + $0x1508] sm:$0xff] }
  0x62   :  { %v1051_v1 = vld [vmem:[%s9147_s1 + $0x2000] sm:$0xff]  ;;  %1713 = vmatpush.msrb.mxu1 %v1323_v62  ;;  %3905 = vmatmul.msk.f32.vlgmr.msrb.gmra.mxu2 %vm1595_vm0, %v4387_v0  ;;  %v1468_v38 = vld [vmem:[%s9147_s1 + $0x2d08] sm:$0xff] }
  0x63   :  { %v1307_v3 = vld [vmem:[%s9147_s1 + $0x2800] sm:$0xff]  ;;  %1694 = vmatpush.msrb.mxu0 %v1051_v1  ;;  %1772 = vmatpush.msra.mxu2 %v316_v2  ;;  %v924_v39 = vld [vmem:[%s9147_s1 + $0x1c08] sm:$0xff] }
  0x64   :  { %v4404_v5 = vld [vmem:[%s9148_s0 + $0x20] sm:$0xff]  ;;  %1714 = vmatpush.msrb.mxu1 %v1307_v3  ;;  %1754 = vmatpush.msrb.mxu3 %v28_v4  ;;  %v1180_v40 = vld [vmem:[%s9147_s1 + $0x2408] sm:$0xff] }
  0x65   :  { %1695 = vmatmul.f32.vlgmr.msrb.gmra.mxu0 %v4404_v5  ;;  %1773 = vmatpush.msra.mxu2 %v300_v6  ;;  %v684_v41 = vld [vmem:[%s9147_s1 + $0x1488] sm:$0xff] }
  0x66   :  { %1799 = vmatpush.msra.mxu1 %v1036_v7  ;;  %1819 = vmatpush.msra.mxu3 %v1292_v9  ;;  %v1452_v42 = vld [vmem:[%s9147_s1 + $0x2c88] sm:$0xff] }
  0x67   :  { %1715 = vmatmul.f32.vlgmr.msrb.gmra.mxu1 %v4420_v10  ;;  %1774 = vmatpush.msra.mxu2 %v284_v11  ;;  %v908_v43 = vld [vmem:[%s9147_s1 + $0x1b88] sm:$0xff] }
  0x68   :  { %1800 = vmatpush.msra.mxu1 %v1020_v12  ;;  %1820 = vmatpush.msra.mxu3 %v1276_v13  ;;  %v1164_v44 = vld [vmem:[%s9147_s1 + $0x2388] sm:$0xff] }
  0x69   :  { %1779 = vmatpush.msra.mxu0 %v780_v15  ;;  %1839 = vmatpush.msrb.mxu2 %v1548_v16  ;;  %v668_v45 = vld [vmem:[%s9147_s1 + $0x1408] sm:$0xff]  ;;  %v269_v16 = vld [vmem:[%s9147_s1 + $0x790] sm:$0xff] }
  0x6a   :  { %1801 = vmatpush.msra.mxu1 %v1004_v17  ;;  %1821 = vmatpush.msra.mxu3 %v1260_v20  ;;  %v1436_v46 = vld [vmem:[%s9147_s1 + $0x2c08] sm:$0xff]  ;;  %v525_v17 = vld [vmem:[%s9147_s1 + $0xf90] sm:$0xff] }
  0x6b   :  { %1780 = vmatpush.msra.mxu0 %v764_v21  ;;  %1840 = vmatpush.msrb.mxu2 %v1532_v22  ;;  %v892_v47 = vld [vmem:[%s9147_s1 + $0x1b08] sm:$0xff]  ;;  %v253_v22 = vld [vmem:[%s9147_s1 + $0x710] sm:$0xff] }
  0x6c   :  { %1802 = vmatpush.msra.mxu1 %v988_v23  ;;  %1822 = vmatpush.msra.mxu3 %v1244_v24  ;;  %v1148_v48 = vld [vmem:[%s9147_s1 + $0x2308] sm:$0xff]  ;;  %v509_v23 = vld [vmem:[%s9147_s1 + $0xf10] sm:$0xff] }
  0x6d   :  { %1781 = vmatpush.msra.mxu0 %v748_v25  ;;  %1841 = vmatpush.msrb.mxu2 %v1516_v26  ;;  %v652_v49 = vld [vmem:[%s9147_s1 + $0x1388] sm:$0xff]  ;;  %v1037_v24 = vld [vmem:[%s9147_s1 + $0x1f90] sm:$0xff] }
  0x6e   :  { %1803 = vmatpush.msra.mxu1 %v972_v27  ;;  %1823 = vmatpush.msra.mxu3 %v1228_v28  ;;  %v1420_v50 = vld [vmem:[%s9147_s1 + $0x2b88] sm:$0xff]  ;;  %v237_v26 = vld [vmem:[%s9147_s1 + $0x690] sm:$0xff] }
  0x6f   :  { %1782 = vmatpush.msra.mxu0 %v732_v29  ;;  %1842 = vmatpush.msrb.mxu2 %v1500_v30  ;;  %v876_v51 = vld [vmem:[%s9147_s1 + $0x1a88] sm:$0xff]  ;;  %v493_v27 = vld [vmem:[%s9147_s1 + $0xe90] sm:$0xff] }
  0x70   :  { %1804 = vmatpush.msra.mxu1 %v956_v31  ;;  %1824 = vmatpush.msra.mxu3 %v1212_v32  ;;  %v1132_v52 = vld [vmem:[%s9147_s1 + $0x2288] sm:$0xff]  ;;  %v1021_v28 = vld [vmem:[%s9147_s1 + $0x1f10] sm:$0xff] }
  0x71   :  { %1783 = vmatpush.msra.mxu0 %v716_v33  ;;  %1843 = vmatpush.msrb.mxu2 %v1484_v34  ;;  %v636_v53 = vld [vmem:[%s9147_s1 + $0x1308] sm:$0xff]  ;;  %v221_v30 = vld [vmem:[%s9147_s1 + $0x610] sm:$0xff] }
  0x72   :  { %1805 = vmatpush.msra.mxu1 %v940_v35  ;;  %1825 = vmatpush.msra.mxu3 %v1196_v36  ;;  %v1404_v54 = vld [vmem:[%s9147_s1 + $0x2b08] sm:$0xff]  ;;  %v477_v31 = vld [vmem:[%s9147_s1 + $0xe10] sm:$0xff] }
  0x73   :  { %1784 = vmatpush.msra.mxu0 %v700_v37  ;;  %1844 = vmatpush.msrb.mxu2 %v1468_v38  ;;  %v860_v55 = vld [vmem:[%s9147_s1 + $0x1a08] sm:$0xff]  ;;  %v781_v32 = vld [vmem:[%s9147_s1 + $0x1790] sm:$0xff] }
  0x74   :  { %1806 = vmatpush.msra.mxu1 %v924_v39  ;;  %1826 = vmatpush.msra.mxu3 %v1180_v40  ;;  %v1116_v56 = vld [vmem:[%s9147_s1 + $0x2208] sm:$0xff]  ;;  %v1005_v33 = vld [vmem:[%s9147_s1 + $0x1e90] sm:$0xff] }
  0x75   :  { %1785 = vmatpush.msra.mxu0 %v684_v41  ;;  %1845 = vmatpush.msrb.mxu2 %v1452_v42  ;;  %v620_v57 = vld [vmem:[%s9147_s1 + $0x1288] sm:$0xff]  ;;  %v205_v34 = vld [vmem:[%s9147_s1 + $0x590] sm:$0xff] }
  0x76   :  { %1807 = vmatpush.msra.mxu1 %v908_v43  ;;  %1827 = vmatpush.msra.mxu3 %v1164_v44  ;;  %v1388_v58 = vld [vmem:[%s9147_s1 + $0x2a88] sm:$0xff]  ;;  %v461_v35 = vld [vmem:[%s9147_s1 + $0xd90] sm:$0xff] }
  0x77   :  { %1786 = vmatpush.msra.mxu0 %v668_v45  ;;  %1846 = vmatpush.msrb.mxu2 %v1436_v46  ;;  %v844_v59 = vld [vmem:[%s9147_s1 + $0x1988] sm:$0xff]  ;;  %v765_v36 = vld [vmem:[%s9147_s1 + $0x1710] sm:$0xff] }
  0x78   :  { %1808 = vmatpush.msra.mxu1 %v892_v47  ;;  %1828 = vmatpush.msra.mxu3 %v1148_v48  ;;  %v1100_v60 = vld [vmem:[%s9147_s1 + $0x2188] sm:$0xff]  ;;  %v989_v37 = vld [vmem:[%s9147_s1 + $0x1e10] sm:$0xff] }
  0x79   :  { %1787 = vmatpush.msra.mxu0 %v652_v49  ;;  %1847 = vmatpush.msrb.mxu2 %v1420_v50  ;;  %v604_v61 = vld [vmem:[%s9147_s1 + $0x1208] sm:$0xff]  ;;  %v189_v38 = vld [vmem:[%s9147_s1 + $0x510] sm:$0xff] }
  0x7a   :  { %1809 = vmatpush.msra.mxu1 %v876_v51  ;;  %1829 = vmatpush.msra.mxu3 %v1132_v52  ;;  %v1372_v62 = vld [vmem:[%s9147_s1 + $0x2a08] sm:$0xff]  ;;  %v445_v39 = vld [vmem:[%s9147_s1 + $0xd10] sm:$0xff] }
  0x7b   :  { %1788 = vmatpush.msra.mxu0 %v636_v53  ;;  %1848 = vmatpush.msrb.mxu2 %v1404_v54  ;;  %v828_v63 = vld [vmem:[%s9147_s1 + $0x1908] sm:$0xff]  ;;  %v749_v40 = vld [vmem:[%s9147_s1 + $0x1690] sm:$0xff] }
  0x7c   :  { %1810 = vmatpush.msra.mxu1 %v860_v55  ;;  %1830 = vmatpush.msra.mxu3 %v1116_v56  ;;  %v1084_v1 = vld [vmem:[%s9147_s1 + $0x2108] sm:$0xff]  ;;  %v973_v41 = vld [vmem:[%s9147_s1 + $0x1d90] sm:$0xff] }
  0x7d   :  { %1789 = vmatpush.msra.mxu0 %v620_v57  ;;  %1849 = vmatpush.msrb.mxu2 %v1388_v58  ;;  %v588_v2 = vld [vmem:[%s9147_s1 + $0x1188] sm:$0xff]  ;;  %v173_v42 = vld [vmem:[%s9147_s1 + $0x490] sm:$0xff] }
  0x7e   :  { %1755 = vmatmul.f32.vlgmr.msrb.gmra.mxu3 %v4242_v18  ;;  %1811 = vmatpush.msra.mxu1 %v844_v59  ;;  %v1356_v3 = vld [vmem:[%s9147_s1 + $0x2988] sm:$0xff]  ;;  %v429_v43 = vld [vmem:[%s9147_s1 + $0xc90] sm:$0xff] }
  0x7f   :  { %1831 = vmatpush.msra.mxu3 %v1100_v60  ;;  %1790 = vmatpush.msra.mxu0 %v604_v61  ;;  %v812_v4 = vld [vmem:[%s9147_s1 + $0x1888] sm:$0xff]  ;;  %v733_v44 = vld [vmem:[%s9147_s1 + $0x1610] sm:$0xff] }
  0x80   :  { %1850 = vmatpush.msrb.mxu2 %v1372_v62  ;;  %1812 = vmatpush.msra.mxu1 %v828_v63  ;;  %v1068_v6 = vld [vmem:[%s9147_s1 + $0x2088] sm:$0xff]  ;;  %v957_v45 = vld [vmem:[%s9147_s1 + $0x1d10] sm:$0xff] }
  0x81   :  { %1775 = vmatmul.f32.vlgmr.msra.gmra.mxu2 %v4247_v19  ;;  %v572_v7 = vld [vmem:[%s9147_s1 + $0x1108] sm:$0xff]  ;;  %1832 = vmatpush.msra.mxu3 %v1084_v1  ;;  %v157_v46 = vld [vmem:[%s9147_s1 + $0x410] sm:$0xff] }
  0x82   :  { %1791 = vmatpush.msra.mxu0 %v588_v2  ;;  %v1340_v9 = vld [vmem:[%s9147_s1 + $0x2908] sm:$0xff]  ;;  %1851 = vmatpush.msrb.mxu2 %v1356_v3  ;;  %v413_v47 = vld [vmem:[%s9147_s1 + $0xc10] sm:$0xff] }
  0x83   :  { %v796_v11 = vld [vmem:[%s9147_s1 + $0x1808] sm:$0xff]  ;;  %1813 = vmatpush.msra.mxu1 %v812_v4  ;;  %1833 = vmatpush.msra.mxu3 %v1068_v6  ;;  %v717_v48 = vld [vmem:[%s9147_s1 + $0x1590] sm:$0xff] }
  0x84   :  { %v1052_v12 = vld [vmem:[%s9147_s1 + $0x2008] sm:$0xff]  ;;  %1792 = vmatpush.msra.mxu0 %v572_v7  ;;  %1852 = vmatpush.msrb.mxu2 %v1340_v9  ;;  %v941_v49 = vld [vmem:[%s9147_s1 + $0x1c90] sm:$0xff] }
  0x85   :  { %v556_v13 = vld [vmem:[%s9147_s1 + $0x1088] sm:$0xff]  ;;  %1814 = vmatpush.msra.mxu1 %v796_v11  ;;  %1834 = vmatpush.msra.mxu3 %v1052_v12  ;;  %v141_v50 = vld [vmem:[%s9147_s1 + $0x390] sm:$0xff] }
  0x86   :  { %v1324_v15 = vld [vmem:[%s9147_s1 + $0x2888] sm:$0xff]  ;;  %1793 = vmatpush.msra.mxu0 %v556_v13  ;;  %1835 = vmatmul.f32.vlgmr.msra.gmra.mxu3 %v4404_v5  ;;  %v397_v51 = vld [vmem:[%s9147_s1 + $0xb90] sm:$0xff] }
  0x87   :  { %v540_v20 = vld [vmem:[%s9147_s1 + $0x1008] sm:$0xff]  ;;  %1853 = vmatpush.msrb.mxu2 %v1324_v15  ;;  %1879 = vmatpush.msrb.mxu1 %v269_v16  ;;  %v701_v52 = vld [vmem:[%s9147_s1 + $0x1510] sm:$0xff] }
  0x88   :  { %v1308_v21 = vld [vmem:[%s9147_s1 + $0x2808] sm:$0xff]  ;;  %1899 = vmatpush.msrb.mxu3 %v525_v17  ;;  %1794 = vmatpush.msra.mxu0 %v540_v20  ;;  %v925_v53 = vld [vmem:[%s9147_s1 + $0x1c10] sm:$0xff] }
  0x89   :  { %1854 = vmatpush.msrb.mxu2 %v1308_v21  ;;  %v1580_v25 = vld [vmem:[%s9147_s1 + $0x3088] sm:$0xff]  ;;  %1880 = vmatpush.msrb.mxu1 %v253_v22  ;;  %v125_v54 = vld [vmem:[%s9147_s1 + $0x310] sm:$0xff] }
  0x8a   :  { %1900 = vmatpush.msrb.mxu3 %v509_v23  ;;  %1795 = vmatmul.f32.vlgmr.msra.gmra.mxu0 %v4207_v8  ;;  %v1564_v29 = vld [vmem:[%s9147_s1 + $0x3008] sm:$0xff]  ;;  %v381_v55 = vld [vmem:[%s9147_s1 + $0xb10] sm:$0xff] }
  0x8b   :  { %1855 = vmatmul.f32.vlgmr.msrb.gmra.mxu2 %v4420_v10  ;;  %1873 = vmatpush.msrb.mxu0 %v1580_v25  ;;  %v685_v56 = vld [vmem:[%s9147_s1 + $0x1490] sm:$0xff] }
  0x8c   :  { %1939 = vmatpush.msra.mxu2 %v1037_v24  ;;  %1881 = vmatpush.msrb.mxu1 %v237_v26  ;;  %v909_v57 = vld [vmem:[%s9147_s1 + $0x1b90] sm:$0xff] }
  0x8d   :  { %1901 = vmatpush.msrb.mxu3 %v493_v27  ;;  %1815 = vmatmul.f32.vlgmr.msra.gmra.mxu1 %v4228_v14  ;;  %v109_v58 = vld [vmem:[%s9147_s1 + $0x290] sm:$0xff] }
  0x8e   :  { %1940 = vmatpush.msra.mxu2 %v1021_v28  ;;  %1874 = vmatpush.msrb.mxu0 %v1564_v29  ;;  %v365_v59 = vld [vmem:[%s9147_s1 + $0xa90] sm:$0xff] }
  0x8f   :  { %1882 = vmatpush.msrb.mxu1 %v221_v30  ;;  %1902 = vmatpush.msrb.mxu3 %v477_v31  ;;  %v669_v60 = vld [vmem:[%s9147_s1 + $0x1410] sm:$0xff]  ;;  %v270_v31 = vld [vmem:[%s9147_s1 + $0x798] sm:$0xff] }
  0x90   :  { %1919 = vmatpush.msra.mxu0 %v781_v32  ;;  %1941 = vmatpush.msra.mxu2 %v1005_v33  ;;  %v893_v61 = vld [vmem:[%s9147_s1 + $0x1b10] sm:$0xff] }
  0x91   :  { %1883 = vmatpush.msrb.mxu1 %v205_v34  ;;  %1903 = vmatpush.msrb.mxu3 %v461_v35  ;;  %v93_v62 = vld [vmem:[%s9147_s1 + $0x210] sm:$0xff]  ;;  %v254_v35 = vld [vmem:[%s9147_s1 + $0x718] sm:$0xff] }
  0x92   :  { %1920 = vmatpush.msra.mxu0 %v765_v36  ;;  %1942 = vmatpush.msra.mxu2 %v989_v37  ;;  %v349_v63 = vld [vmem:[%s9147_s1 + $0xa10] sm:$0xff] }
  0x93   :  { %1884 = vmatpush.msrb.mxu1 %v189_v38  ;;  %1904 = vmatpush.msrb.mxu3 %v445_v39  ;;  %v653_v1 = vld [vmem:[%s9147_s1 + $0x1390] sm:$0xff] }
  0x94   :  { %3906 = vmatmul.msk.f32.vlgmr.msrb.gmra.mxu0 %vm1595_vm0, %v4387_v0  ;;  %1943 = vmatpush.msra.mxu2 %v973_v41  ;;  %v877_v2 = vld [vmem:[%s9147_s1 + $0x1a90] sm:$0xff] }
  0x95   :  { %1921 = vmatpush.msra.mxu0 %v749_v40  ;;  %1885 = vmatpush.msrb.mxu1 %v173_v42  ;;  %v77_v3 = vld [vmem:[%s9147_s1 + $0x190] sm:$0xff]  ;;  %v238_v40 = vld [vmem:[%s9147_s1 + $0x698] sm:$0xff] }
  0x96   :  { %1905 = vmatpush.msrb.mxu3 %v429_v43  ;;  %1944 = vmatpush.msra.mxu2 %v957_v45  ;;  %v333_v4 = vld [vmem:[%s9147_s1 + $0x990] sm:$0xff] }
  0x97   :  { %1922 = vmatpush.msra.mxu0 %v733_v44  ;;  %1886 = vmatpush.msrb.mxu1 %v157_v46  ;;  %v637_v6 = vld [vmem:[%s9147_s1 + $0x1310] sm:$0xff]  ;;  %v526_v46 = vld [vmem:[%s9147_s1 + $0xf98] sm:$0xff] }
  0x98   :  { %1906 = vmatpush.msrb.mxu3 %v413_v47  ;;  %1945 = vmatpush.msra.mxu2 %v941_v49  ;;  %v861_v7 = vld [vmem:[%s9147_s1 + $0x1a10] sm:$0xff]  ;;  %v206_v47 = vld [vmem:[%s9147_s1 + $0x598] sm:$0xff] }
  0x99   :  { %1923 = vmatpush.msra.mxu0 %v717_v48  ;;  %1887 = vmatpush.msrb.mxu1 %v141_v50  ;;  %v61_v9 = vld [vmem:[%s9147_s1 + $0x110] sm:$0xff]  ;;  %v190_v50 = vld [vmem:[%s9147_s1 + $0x518] sm:$0xff] }
  0x9a   :  { %1907 = vmatpush.msrb.mxu3 %v397_v51  ;;  %1946 = vmatpush.msra.mxu2 %v925_v53  ;;  %v317_v11 = vld [vmem:[%s9147_s1 + $0x910] sm:$0xff]  ;;  %v174_v53 = vld [vmem:[%s9147_s1 + $0x498] sm:$0xff] }
  0x9b   :  { %1924 = vmatpush.msra.mxu0 %v701_v52  ;;  %1888 = vmatpush.msrb.mxu1 %v125_v54  ;;  %v621_v12 = vld [vmem:[%s9147_s1 + $0x1290] sm:$0xff]  ;;  %v494_v52 = vld [vmem:[%s9147_s1 + $0xe98] sm:$0xff] }
  0x9c   :  { %1908 = vmatpush.msrb.mxu3 %v381_v55  ;;  %1947 = vmatpush.msra.mxu2 %v909_v57  ;;  %v845_v13 = vld [vmem:[%s9147_s1 + $0x1990] sm:$0xff]  ;;  %v478_v55 = vld [vmem:[%s9147_s1 + $0xe18] sm:$0xff] }
  0x9d   :  { %1925 = vmatpush.msra.mxu0 %v685_v56  ;;  %1889 = vmatpush.msrb.mxu1 %v109_v58  ;;  %v45_v15 = vld [vmem:[%s9147_s1 + $0x90] sm:$0xff]  ;;  %v158_v56 = vld [vmem:[%s9147_s1 + $0x418] sm:$0xff] }
  0x9e   :  { %1909 = vmatpush.msrb.mxu3 %v365_v59  ;;  %1948 = vmatpush.msra.mxu2 %v893_v61  ;;  %v301_v16 = vld [vmem:[%s9147_s1 + $0x890] sm:$0xff]  ;;  %v462_v59 = vld [vmem:[%s9147_s1 + $0xd98] sm:$0xff] }
  0x9f   :  { %1926 = vmatpush.msra.mxu0 %v669_v60  ;;  %1890 = vmatpush.msrb.mxu1 %v93_v62  ;;  %v605_v17 = vld [vmem:[%s9147_s1 + $0x1210] sm:$0xff]  ;;  %v142_v60 = vld [vmem:[%s9147_s1 + $0x398] sm:$0xff] }
  0xa0   :  { %1910 = vmatpush.msrb.mxu3 %v349_v63  ;;  %1949 = vmatpush.msra.mxu2 %v877_v2  ;;  %v829_v20 = vld [vmem:[%s9147_s1 + $0x1910] sm:$0xff]  ;;  %v446_v63 = vld [vmem:[%s9147_s1 + $0xd18] sm:$0xff] }
  0xa1   :  { %1927 = vmatpush.msra.mxu0 %v653_v1  ;;  %1891 = vmatpush.msrb.mxu1 %v77_v3  ;;  %v29_v21 = vld [vmem:[%s9147_s1 + $0x10] sm:$0xff]  ;;  %v126_v1 = vld [vmem:[%s9147_s1 + $0x318] sm:$0xff] }
  0xa2   :  { %1911 = vmatpush.msrb.mxu3 %v333_v4  ;;  %1950 = vmatpush.msra.mxu2 %v861_v7  ;;  %v285_v22 = vld [vmem:[%s9147_s1 + $0x810] sm:$0xff]  ;;  %v430_v4 = vld [vmem:[%s9147_s1 + $0xc98] sm:$0xff] }
  0xa3   :  { %1928 = vmatpush.msra.mxu0 %v637_v6  ;;  %1892 = vmatpush.msrb.mxu1 %v61_v9  ;;  %v589_v23 = vld [vmem:[%s9147_s1 + $0x1190] sm:$0xff]  ;;  %v110_v6 = vld [vmem:[%s9147_s1 + $0x298] sm:$0xff] }
  0xa4   :  { %1912 = vmatpush.msrb.mxu3 %v317_v11  ;;  %1951 = vmatpush.msra.mxu2 %v845_v13  ;;  %v813_v24 = vld [vmem:[%s9147_s1 + $0x1890] sm:$0xff]  ;;  %v414_v11 = vld [vmem:[%s9147_s1 + $0xc18] sm:$0xff] }
  0xa5   :  { %1929 = vmatpush.msra.mxu0 %v621_v12  ;;  %1893 = vmatpush.msrb.mxu1 %v45_v15  ;;  %v1293_v25 = vld [vmem:[%s9147_s1 + $0x2790] sm:$0xff]  ;;  %v94_v12 = vld [vmem:[%s9147_s1 + $0x218] sm:$0xff] }
  0xa6   :  { %1913 = vmatpush.msrb.mxu3 %v301_v16  ;;  %1952 = vmatpush.msra.mxu2 %v829_v20  ;;  %v1549_v26 = vld [vmem:[%s9147_s1 + $0x2f90] sm:$0xff]  ;;  %v398_v16 = vld [vmem:[%s9147_s1 + $0xb98] sm:$0xff] }
  0xa7   :  { %1930 = vmatpush.msra.mxu0 %v605_v17  ;;  %1894 = vmatpush.msrb.mxu1 %v29_v21  ;;  %v573_v27 = vld [vmem:[%s9147_s1 + $0x1110] sm:$0xff]  ;;  %v78_v17 = vld [vmem:[%s9147_s1 + $0x198] sm:$0xff] }
  0xa8   :  { %1914 = vmatpush.msrb.mxu3 %v285_v22  ;;  %v797_v28 = vld [vmem:[%s9147_s1 + $0x1810] sm:$0xff]  ;;  %1953 = vmatpush.msra.mxu2 %v813_v24  ;;  %v382_v22 = vld [vmem:[%s9147_s1 + $0xb18] sm:$0xff] }
  0xa9   :  { %1931 = vmatpush.msra.mxu0 %v589_v23  ;;  %v1277_v29 = vld [vmem:[%s9147_s1 + $0x2710] sm:$0xff]  ;;  %1959 = vmatpush.msra.mxu1 %v1293_v25  ;;  %v62_v23 = vld [vmem:[%s9147_s1 + $0x118] sm:$0xff] }
  0xaa   :  { %v1533_v30 = vld [vmem:[%s9147_s1 + $0x2f10] sm:$0xff]  ;;  %1979 = vmatpush.msra.mxu3 %v1549_v26  ;;  %1954 = vmatpush.msra.mxu2 %v797_v28  ;;  %v366_v26 = vld [vmem:[%s9147_s1 + $0xa98] sm:$0xff] }
  0xab   :  { %v557_v32 = vld [vmem:[%s9147_s1 + $0x1090] sm:$0xff]  ;;  %1932 = vmatpush.msra.mxu0 %v573_v27  ;;  %1960 = vmatpush.msra.mxu1 %v1277_v29  ;;  %v46_v27 = vld [vmem:[%s9147_s1 + $0x98] sm:$0xff] }
  0xac   :  { %v1261_v33 = vld [vmem:[%s9147_s1 + $0x2690] sm:$0xff]  ;;  %1980 = vmatpush.msra.mxu3 %v1533_v30  ;;  %2019 = vmatpush.msrb.mxu2 %v270_v31  ;;  %v782_v28 = vld [vmem:[%s9147_s1 + $0x1798] sm:$0xff] }
  0xad   :  { %v1517_v34 = vld [vmem:[%s9147_s1 + $0x2e90] sm:$0xff]  ;;  %1933 = vmatpush.msra.mxu0 %v557_v32  ;;  %1961 = vmatpush.msra.mxu1 %v1261_v33  ;;  %v1038_v29 = vld [vmem:[%s9147_s1 + $0x1f98] sm:$0xff] }
  0xae   :  { %v541_v36 = vld [vmem:[%s9147_s1 + $0x1010] sm:$0xff]  ;;  %1981 = vmatpush.msra.mxu3 %v1517_v34  ;;  %2020 = vmatpush.msrb.mxu2 %v254_v35  ;;  %v350_v30 = vld [vmem:[%s9147_s1 + $0xa18] sm:$0xff] }
  0xaf   :  { %v1245_v37 = vld [vmem:[%s9147_s1 + $0x2610] sm:$0xff]  ;;  %1915 = vmatmul.f32.vlgmr.msrb.gmra.mxu3 %v4247_v19  ;;  %1934 = vmatpush.msra.mxu0 %v541_v36  ;;  %v222_v19 = vld [vmem:[%s9147_s1 + $0x618] sm:$0xff] }
  0xb0   :  { %v1501_v38 = vld [vmem:[%s9147_s1 + $0x2e10] sm:$0xff]  ;;  %1962 = vmatpush.msra.mxu1 %v1245_v37  ;;  %2021 = vmatpush.msrb.mxu2 %v238_v40  ;;  %v30_v31 = vld [vmem:[%s9147_s1 + $0x18] sm:$0xff] }
  0xb1   :  { %v1581_v39 = vld [vmem:[%s9147_s1 + $0x3090] sm:$0xff]  ;;  %1982 = vmatpush.msra.mxu3 %v1501_v38  ;;  %1935 = vmatmul.f32.vlgmr.msra.gmra.mxu0 %v4207_v8  ;;  %v510_v8 = vld [vmem:[%s9147_s1 + $0xf18] sm:$0xff] }
  0xb2   :  { %v1229_v41 = vld [vmem:[%s9147_s1 + $0x2590] sm:$0xff]  ;;  %2013 = vmatpush.msrb.mxu0 %v1581_v39  ;;  %2022 = vmatpush.msrb.mxu2 %v222_v19  ;;  %v766_v32 = vld [vmem:[%s9147_s1 + $0x1718] sm:$0xff] }
  0xb3   :  { %v1485_v42 = vld [vmem:[%s9147_s1 + $0x2d90] sm:$0xff]  ;;  %1963 = vmatpush.msra.mxu1 %v1229_v41  ;;  %1955 = vmatmul.f32.vlgmr.msra.gmra.mxu2 %v4228_v14  ;;  %v1022_v33 = vld [vmem:[%s9147_s1 + $0x1f18] sm:$0xff] }
  0xb4   :  { %v1565_v43 = vld [vmem:[%s9147_s1 + $0x3010] sm:$0xff]  ;;  %1983 = vmatpush.msra.mxu3 %v1485_v42  ;;  %2023 = vmatpush.msrb.mxu2 %v206_v47  ;;  %v1294_v34 = vld [vmem:[%s9147_s1 + $0x2798] sm:$0xff] }
  0xb5   :  { %v1213_v44 = vld [vmem:[%s9147_s1 + $0x2510] sm:$0xff]  ;;  %2014 = vmatpush.msrb.mxu0 %v1565_v43  ;;  %1895 = vmatmul.f32.vlgmr.msrb.gmra.mxu1 %v4242_v18  ;;  %v1006_v35 = vld [vmem:[%s9147_s1 + $0x1e98] sm:$0xff] }
  0xb6   :  { %v1469_v45 = vld [vmem:[%s9147_s1 + $0x2d10] sm:$0xff]  ;;  %1964 = vmatpush.msra.mxu1 %v1213_v44  ;;  %2024 = vmatpush.msrb.mxu2 %v190_v50  ;;  %v318_v36 = vld [vmem:[%s9147_s1 + $0x918] sm:$0xff] }
  0xb7   :  { %v1197_v48 = vld [vmem:[%s9147_s1 + $0x2490] sm:$0xff]  ;;  %1984 = vmatpush.msra.mxu3 %v1469_v45  ;;  %2039 = vmatpush.msra.mxu0 %v526_v46  ;;  %v1278_v37 = vld [vmem:[%s9147_s1 + $0x2718] sm:$0xff] }
  0xb8   :  { %v1453_v49 = vld [vmem:[%s9147_s1 + $0x2c90] sm:$0xff]  ;;  %1965 = vmatpush.msra.mxu1 %v1197_v48  ;;  %2025 = vmatpush.msrb.mxu2 %v174_v53  ;;  %v734_v38 = vld [vmem:[%s9147_s1 + $0x1618] sm:$0xff] }
  0xb9   :  { %v1181_v14 = vld [vmem:[%s9147_s1 + $0x2410] sm:$0xff]  ;;  %1985 = vmatpush.msra.mxu3 %v1453_v49  ;;  %2040 = vmatpush.msra.mxu0 %v510_v8  ;;  %v990_v39 = vld [vmem:[%s9147_s1 + $0x1e18] sm:$0xff] }
  0xba   :  { %v1437_v51 = vld [vmem:[%s9147_s1 + $0x2c10] sm:$0xff]  ;;  %1966 = vmatpush.msra.mxu1 %v1181_v14  ;;  %2026 = vmatpush.msrb.mxu2 %v158_v56  ;;  %v302_v40 = vld [vmem:[%s9147_s1 + $0x898] sm:$0xff] }
  0xbb   :  { %v1165_v18 = vld [vmem:[%s9147_s1 + $0x2390] sm:$0xff]  ;;  %1986 = vmatpush.msra.mxu3 %v1437_v51  ;;  %2041 = vmatpush.msra.mxu0 %v494_v52  ;;  %v1262_v41 = vld [vmem:[%s9147_s1 + $0x2698] sm:$0xff] }
  0xbc   :  { %v1421_v54 = vld [vmem:[%s9147_s1 + $0x2b90] sm:$0xff]  ;;  %1967 = vmatpush.msra.mxu1 %v1165_v18  ;;  %2027 = vmatpush.msrb.mxu2 %v142_v60  ;;  %v718_v42 = vld [vmem:[%s9147_s1 + $0x1598] sm:$0xff] }
  0xbd   :  { %v1149_v57 = vld [vmem:[%s9147_s1 + $0x2310] sm:$0xff]  ;;  %1987 = vmatpush.msra.mxu3 %v1421_v54  ;;  %2042 = vmatpush.msra.mxu0 %v478_v55  ;;  %v974_v43 = vld [vmem:[%s9147_s1 + $0x1d98] sm:$0xff] }
  0xbe   :  { %v1405_v58 = vld [vmem:[%s9147_s1 + $0x2b10] sm:$0xff]  ;;  %1968 = vmatpush.msra.mxu1 %v1149_v57  ;;  %2028 = vmatpush.msrb.mxu2 %v126_v1  ;;  %v286_v19 = vld [vmem:[%s9147_s1 + $0x818] sm:$0xff] }
  0xbf   :  { %v1133_v61 = vld [vmem:[%s9147_s1 + $0x2290] sm:$0xff]  ;;  %1988 = vmatpush.msra.mxu3 %v1405_v58  ;;  %2043 = vmatpush.msra.mxu0 %v462_v59  ;;  %v1246_v44 = vld [vmem:[%s9147_s1 + $0x2618] sm:$0xff] }
  0xc0   :  { %v1389_v62 = vld [vmem:[%s9147_s1 + $0x2a90] sm:$0xff]  ;;  %1969 = vmatpush.msra.mxu1 %v1133_v61  ;;  %2029 = vmatpush.msrb.mxu2 %v110_v6  ;;  %v702_v45 = vld [vmem:[%s9147_s1 + $0x1518] sm:$0xff] }
  0xc1   :  { %v1117_v2 = vld [vmem:[%s9147_s1 + $0x2210] sm:$0xff]  ;;  %1989 = vmatpush.msra.mxu3 %v1389_v62  ;;  %2044 = vmatpush.msra.mxu0 %v446_v63  ;;  %v958_v46 = vld [vmem:[%s9147_s1 + $0x1d18] sm:$0xff] }
  0xc2   :  { %v1373_v3 = vld [vmem:[%s9147_s1 + $0x2a10] sm:$0xff]  ;;  %1970 = vmatpush.msra.mxu1 %v1117_v2  ;;  %2030 = vmatpush.msrb.mxu2 %v94_v12  ;;  %v1550_v47 = vld [vmem:[%s9147_s1 + $0x2f98] sm:$0xff] }
  0xc3   :  { %v1101_v7 = vld [vmem:[%s9147_s1 + $0x2190] sm:$0xff]  ;;  %1990 = vmatpush.msra.mxu3 %v1373_v3  ;;  %2045 = vmatpush.msra.mxu0 %v430_v4  ;;  %v1230_v48 = vld [vmem:[%s9147_s1 + $0x2598] sm:$0xff] }
  0xc4   :  { %v1357_v9 = vld [vmem:[%s9147_s1 + $0x2990] sm:$0xff]  ;;  %1971 = vmatpush.msra.mxu1 %v1101_v7  ;;  %2031 = vmatpush.msrb.mxu2 %v78_v17  ;;  %v686_v49 = vld [vmem:[%s9147_s1 + $0x1498] sm:$0xff] }
  0xc5   :  { %v1085_v13 = vld [vmem:[%s9147_s1 + $0x2110] sm:$0xff]  ;;  %1991 = vmatpush.msra.mxu3 %v1357_v9  ;;  %2046 = vmatpush.msra.mxu0 %v414_v11  ;;  %v1534_v8 = vld [vmem:[%s9147_s1 + $0x2f18] sm:$0xff] }
  0xc6   :  { %v1341_v15 = vld [vmem:[%s9147_s1 + $0x2910] sm:$0xff]  ;;  %1972 = vmatpush.msra.mxu1 %v1085_v13  ;;  %2032 = vmatpush.msrb.mxu2 %v62_v23  ;;  %v1214_v50 = vld [vmem:[%s9147_s1 + $0x2518] sm:$0xff] }
  0xc7   :  { %v1069_v20 = vld [vmem:[%s9147_s1 + $0x2090] sm:$0xff]  ;;  %1992 = vmatpush.msra.mxu3 %v1341_v15  ;;  %2047 = vmatpush.msra.mxu0 %v398_v16  ;;  %v670_v14 = vld [vmem:[%s9147_s1 + $0x1418] sm:$0xff] }
  0xc8   :  { %v1325_v21 = vld [vmem:[%s9147_s1 + $0x2890] sm:$0xff]  ;;  %1973 = vmatpush.msra.mxu1 %v1069_v20  ;;  %2033 = vmatpush.msrb.mxu2 %v46_v27  ;;  %v926_v51 = vld [vmem:[%s9147_s1 + $0x1c18] sm:$0xff] }
  0xc9   :  { %v1053_v24 = vld [vmem:[%s9147_s1 + $0x2010] sm:$0xff]  ;;  %1993 = vmatpush.msra.mxu3 %v1325_v21  ;;  %2048 = vmatpush.msra.mxu0 %v382_v22  ;;  %v1518_v52 = vld [vmem:[%s9147_s1 + $0x2e98] sm:$0xff]  ;;  %v5184_v22 = vld [vmem:[%s9148_s0] sm:$0xff] }
  0xca   :  { %v1309_v25 = vld [vmem:[%s9147_s1 + $0x2810] sm:$0xff]  ;;  %1974 = vmatpush.msra.mxu1 %v1053_v24  ;;  %2034 = vmatpush.msrb.mxu2 %v30_v31  ;;  %v1198_v53 = vld [vmem:[%s9147_s1 + $0x2498] sm:$0xff] }
  0xcb   :  { %1994 = vmatpush.msra.mxu3 %v1309_v25  ;;  %2049 = vmatpush.msra.mxu0 %v366_v26  ;;  %v654_v18 = vld [vmem:[%s9147_s1 + $0x1398] sm:$0xff] }
  0xcc   :  { %1975 = vmatmul.f32.vlgmr.msra.gmra.mxu1 %v4404_v5  ;;  %1995 = vmatmul.f32.vlgmr.msra.gmra.mxu3 %v4420_v10  ;;  %v334_v5 = vld [vmem:[%s9147_s1 + $0x998] sm:$0xff] }
  0xcd   :  { %2059 = vmatpush.msrb.mxu1 %v782_v28  ;;  %2079 = vmatpush.msrb.mxu3 %v1038_v29  ;;  %v750_v10 = vld [vmem:[%s9147_s1 + $0x1698] sm:$0xff] }
  0xce   :  { %2050 = vmatpush.msra.mxu0 %v350_v30  ;;  %2099 = vmatpush.msra.mxu2 %v1294_v34  ;;  %v910_v54 = vld [vmem:[%s9147_s1 + $0x1b98] sm:$0xff]  ;;  %v271_v30 = vld [vmem:[%s9147_s1 + $0x7a0] sm:$0xff] }
  0xcf   :  { %2060 = vmatpush.msrb.mxu1 %v766_v32  ;;  %2080 = vmatpush.msrb.mxu3 %v1022_v33  ;;  %v1502_v55 = vld [vmem:[%s9147_s1 + $0x2e18] sm:$0xff] }
  0xd0   :  { %2051 = vmatpush.msra.mxu0 %v334_v5  ;;  %2100 = vmatpush.msra.mxu2 %v1278_v37  ;;  %v1182_v56 = vld [vmem:[%s9147_s1 + $0x2418] sm:$0xff]  ;;  %v255_v5 = vld [vmem:[%s9147_s1 + $0x720] sm:$0xff] }
  0xd1   :  { %2061 = vmatpush.msrb.mxu1 %v750_v10  ;;  %2081 = vmatpush.msrb.mxu3 %v1006_v35  ;;  %v638_v57 = vld [vmem:[%s9147_s1 + $0x1318] sm:$0xff]  ;;  %v527_v35 = vld [vmem:[%s9147_s1 + $0xfa0] sm:$0xff] }
  0xd2   :  { %2052 = vmatpush.msra.mxu0 %v318_v36  ;;  %2101 = vmatpush.msra.mxu2 %v1262_v41  ;;  %v894_v58 = vld [vmem:[%s9147_s1 + $0x1b18] sm:$0xff]  ;;  %v5238_v36 = vld [vmem:[%s9148_s0 + $0x8] sm:$0xff]  ;;  %v783_v37 = vld [vmem:[%s9147_s1 + $0x17a0] sm:$0xff] }
  0xd3   :  { %2062 = vmatpush.msrb.mxu1 %v734_v38  ;;  %2082 = vmatpush.msrb.mxu3 %v990_v39  ;;  %v1486_v59 = vld [vmem:[%s9147_s1 + $0x2d98] sm:$0xff]  ;;  %v239_v38 = vld [vmem:[%s9147_s1 + $0x6a0] sm:$0xff]  ;;  %v5250_v39 = vld [vmem:[%s9148_s0 + $0x10] sm:$0xff] }
  0xd4   :  { %2053 = vmatpush.msra.mxu0 %v302_v40  ;;  %2102 = vmatpush.msra.mxu2 %v1246_v44  ;;  %v1166_v60 = vld [vmem:[%s9147_s1 + $0x2398] sm:$0xff]  ;;  %v5256_v40 = vld [vmem:[%s9148_s0 + $0x20] sm:$0xff] }
  0xd5   :  { %3907 = vmatmul.msk.f32.vlgmr.msrb.gmra.mxu0 %vm1595_vm0, %v4387_v0  ;;  %2063 = vmatpush.msrb.mxu1 %v718_v42  ;;  %v942_v0 = vld [vmem:[%s9147_s1 + $0x1c98] sm:$0xff]  ;;  %v511_v42 = vld [vmem:[%s9147_s1 + $0xf20] sm:$0xff] }
  0xd6   :  { %2083 = vmatpush.msrb.mxu3 %v974_v43  ;;  %2054 = vmatpush.msra.mxu0 %v286_v19  ;;  %v622_v61 = vld [vmem:[%s9147_s1 + $0x1298] sm:$0xff]  ;;  %v767_v43 = vld [vmem:[%s9147_s1 + $0x1720] sm:$0xff] }
  0xd7   :  { %2064 = vmatpush.msrb.mxu1 %v702_v45  ;;  %2103 = vmatpush.msra.mxu2 %v1230_v48  ;;  %v878_v62 = vld [vmem:[%s9147_s1 + $0x1a98] sm:$0xff]  ;;  %v223_v19 = vld [vmem:[%s9147_s1 + $0x620] sm:$0xff] }
  0xd8   :  { %2084 = vmatpush.msrb.mxu3 %v958_v46  ;;  %2119 = vmatpush.msrb.mxu0 %v1550_v47  ;;  %v1470_v63 = vld [vmem:[%s9147_s1 + $0x2d18] sm:$0xff]  ;;  %v495_v45 = vld [vmem:[%s9147_s1 + $0xea0] sm:$0xff] }
  0xd9   :  { %2065 = vmatpush.msrb.mxu1 %v686_v49  ;;  %2104 = vmatpush.msra.mxu2 %v1214_v50  ;;  %v1150_v1 = vld [vmem:[%s9147_s1 + $0x2318] sm:$0xff]  ;;  %v751_v46 = vld [vmem:[%s9147_s1 + $0x16a0] sm:$0xff] }
  0xda   :  { %2085 = vmatpush.msrb.mxu3 %v942_v0  ;;  %2120 = vmatpush.msrb.mxu0 %v1534_v8  ;;  %v606_v2 = vld [vmem:[%s9147_s1 + $0x1218] sm:$0xff]  ;;  %v207_v47 = vld [vmem:[%s9147_s1 + $0x5a0] sm:$0xff] }
  0xdb   :  { %2066 = vmatpush.msrb.mxu1 %v670_v14  ;;  %2105 = vmatpush.msra.mxu2 %v1198_v53  ;;  %v862_v3 = vld [vmem:[%s9147_s1 + $0x1a18] sm:$0xff]  ;;  %v479_v49 = vld [vmem:[%s9147_s1 + $0xe20] sm:$0xff] }
  0xdc   :  { %2086 = vmatpush.msrb.mxu3 %v926_v51  ;;  %2121 = vmatpush.msrb.mxu0 %v1518_v52  ;;  %v1454_v4 = vld [vmem:[%s9147_s1 + $0x2c98] sm:$0xff]  ;;  %v735_v0 = vld [vmem:[%s9147_s1 + $0x1620] sm:$0xff] }
  0xdd   :  { %2067 = vmatpush.msrb.mxu1 %v654_v18  ;;  %2106 = vmatpush.msra.mxu2 %v1182_v56  ;;  %v1134_v6 = vld [vmem:[%s9147_s1 + $0x2298] sm:$0xff]  ;;  %v191_v8 = vld [vmem:[%s9147_s1 + $0x520] sm:$0xff] }
  0xde   :  { %2087 = vmatpush.msrb.mxu3 %v910_v54  ;;  %2122 = vmatpush.msrb.mxu0 %v1502_v55  ;;  %v590_v7 = vld [vmem:[%s9147_s1 + $0x1198] sm:$0xff]  ;;  %v1039_v50 = vld [vmem:[%s9147_s1 + $0x1fa0] sm:$0xff]  ;;  %v5316_v54 = vld [vmem:[%s9148_s0 + $0x28] sm:$0xff] }
  0xdf   :  { %2068 = vmatpush.msrb.mxu1 %v638_v57  ;;  %2107 = vmatpush.msra.mxu2 %v1166_v60  ;;  %v846_v9 = vld [vmem:[%s9147_s1 + $0x1998] sm:$0xff]  ;;  %v463_v14 = vld [vmem:[%s9147_s1 + $0xda0] sm:$0xff] }
  0xe0   :  { %2088 = vmatpush.msrb.mxu3 %v894_v58  ;;  %2123 = vmatpush.msrb.mxu0 %v1486_v59  ;;  %v1438_v11 = vld [vmem:[%s9147_s1 + $0x2c18] sm:$0xff]  ;;  %v719_v51 = vld [vmem:[%s9147_s1 + $0x15a0] sm:$0xff]  ;;  %v5334_v59 = vld [vmem:[%s9148_s0 + $0x30] sm:$0xff] }
  0xe1   :  { %2069 = vmatpush.msrb.mxu1 %v622_v61  ;;  %2108 = vmatpush.msra.mxu2 %v1150_v1  ;;  %v1118_v12 = vld [vmem:[%s9147_s1 + $0x2218] sm:$0xff]  ;;  %v175_v52 = vld [vmem:[%s9147_s1 + $0x4a0] sm:$0xff] }
  0xe2   :  { %2089 = vmatpush.msrb.mxu3 %v878_v62  ;;  %2124 = vmatpush.msrb.mxu0 %v1470_v63  ;;  %v574_v13 = vld [vmem:[%s9147_s1 + $0x1118] sm:$0xff]  ;;  %v1023_v53 = vld [vmem:[%s9147_s1 + $0x1f20] sm:$0xff] }
  0xe3   :  { %2070 = vmatpush.msrb.mxu1 %v606_v2  ;;  %2109 = vmatpush.msra.mxu2 %v1134_v6  ;;  %v830_v15 = vld [vmem:[%s9147_s1 + $0x1918] sm:$0xff]  ;;  %v703_v18 = vld [vmem:[%s9147_s1 + $0x1520] sm:$0xff] }
  0xe4   :  { %2090 = vmatpush.msrb.mxu3 %v862_v3  ;;  %2125 = vmatpush.msrb.mxu0 %v1454_v4  ;;  %v1422_v16 = vld [vmem:[%s9147_s1 + $0x2b98] sm:$0xff]  ;;  %v447_v55 = vld [vmem:[%s9147_s1 + $0xd20] sm:$0xff] }
  0xe5   :  { %2071 = vmatpush.msrb.mxu1 %v590_v7  ;;  %v1102_v17 = vld [vmem:[%s9147_s1 + $0x2198] sm:$0xff]  ;;  %2110 = vmatpush.msra.mxu2 %v1118_v12  ;;  %v159_v56 = vld [vmem:[%s9147_s1 + $0x420] sm:$0xff] }
  0xe6   :  { %2091 = vmatpush.msrb.mxu3 %v846_v9  ;;  %2126 = vmatpush.msrb.mxu0 %v1438_v11  ;;  %v558_v20 = vld [vmem:[%s9147_s1 + $0x1098] sm:$0xff]  ;;  %v1007_v57 = vld [vmem:[%s9147_s1 + $0x1ea0] sm:$0xff] }
  0xe7   :  { %2072 = vmatpush.msrb.mxu1 %v574_v13  ;;  %v814_v21 = vld [vmem:[%s9147_s1 + $0x1898] sm:$0xff]  ;;  %2035 = vmatmul.f32.vlgmr.msrb.gmra.mxu2 %v5184_v22  ;;  %v687_v58 = vld [vmem:[%s9147_s1 + $0x14a0] sm:$0xff] }
  0xe8   :  { %2092 = vmatpush.msrb.mxu3 %v830_v15  ;;  %v1406_v23 = vld [vmem:[%s9147_s1 + $0x2b18] sm:$0xff]  ;;  %2127 = vmatpush.msrb.mxu0 %v1422_v16  ;;  %v431_v60 = vld [vmem:[%s9147_s1 + $0xca0] sm:$0xff] }
  0xe9   :  { %v1086_v24 = vld [vmem:[%s9147_s1 + $0x2118] sm:$0xff]  ;;  %2111 = vmatpush.msra.mxu2 %v1102_v17  ;;  %2073 = vmatpush.msrb.mxu1 %v558_v20  ;;  %v143_v61 = vld [vmem:[%s9147_s1 + $0x3a0] sm:$0xff] }
  0xea   :  { %v542_v25 = vld [vmem:[%s9147_s1 + $0x1018] sm:$0xff]  ;;  %2093 = vmatpush.msrb.mxu3 %v814_v21  ;;  %2128 = vmatpush.msrb.mxu0 %v1406_v23  ;;  %v991_v62 = vld [vmem:[%s9147_s1 + $0x1e20] sm:$0xff] }
  0xeb   :  { %v798_v26 = vld [vmem:[%s9147_s1 + $0x1818] sm:$0xff]  ;;  %2112 = vmatpush.msra.mxu2 %v1086_v24  ;;  %2074 = vmatpush.msrb.mxu1 %v542_v25  ;;  %v671_v63 = vld [vmem:[%s9147_s1 + $0x1420] sm:$0xff] }
  0xec   :  { %v1390_v27 = vld [vmem:[%s9147_s1 + $0x2a98] sm:$0xff]  ;;  %2094 = vmatpush.msrb.mxu3 %v798_v26  ;;  %2055 = vmatmul.f32.vlgmr.msra.gmra.mxu0 %v5238_v36  ;;  %v415_v1 = vld [vmem:[%s9147_s1 + $0xc20] sm:$0xff] }
  0xed   :  { %v1070_v28 = vld [vmem:[%s9147_s1 + $0x2098] sm:$0xff]  ;;  %2129 = vmatpush.msrb.mxu0 %v1390_v27  ;;  %2075 = vmatmul.f32.vlgmr.msrb.gmra.mxu1 %v5250_v39  ;;  %v127_v2 = vld [vmem:[%s9147_s1 + $0x320] sm:$0xff] }
  0xee   :  { %v1582_v29 = vld [vmem:[%s9147_s1 + $0x3098] sm:$0xff]  ;;  %2113 = vmatpush.msra.mxu2 %v1070_v28  ;;  %2159 = vmatpush.msra.mxu3 %v271_v30  ;;  %v975_v3 = vld [vmem:[%s9147_s1 + $0x1da0] sm:$0xff] }
  0xef   :  { %v1374_v31 = vld [vmem:[%s9147_s1 + $0x2a18] sm:$0xff]  ;;  %2153 = vmatpush.msra.mxu1 %v1582_v29  ;;  %v655_v4 = vld [vmem:[%s9147_s1 + $0x13a0] sm:$0xff] }
  0xf0   :  { %v1054_v32 = vld [vmem:[%s9147_s1 + $0x2018] sm:$0xff]  ;;  %2130 = vmatpush.msrb.mxu0 %v1374_v31  ;;  %2160 = vmatpush.msra.mxu3 %v255_v5  ;;  %v399_v6 = vld [vmem:[%s9147_s1 + $0xba0] sm:$0xff] }
  0xf1   :  { %v1566_v33 = vld [vmem:[%s9147_s1 + $0x3018] sm:$0xff]  ;;  %2114 = vmatpush.msra.mxu2 %v1054_v32  ;;  %v111_v7 = vld [vmem:[%s9147_s1 + $0x2a0] sm:$0xff] }
  0xf2   :  { %v5226_v34 = vld [vmem:[%s9148_s0 + $0x18] sm:$0xff]  ;;  %2154 = vmatpush.msra.mxu1 %v1566_v33  ;;  %2115 = vmatmul.f32.vlgmr.msra.gmra.mxu2 %v5256_v40  ;;  %v959_v9 = vld [vmem:[%s9147_s1 + $0x1d20] sm:$0xff] }
  0xf3   :  { %2095 = vmatmul.f32.vlgmr.msrb.gmra.mxu3 %v5226_v34  ;;  %v1358_v10 = vld [vmem:[%s9147_s1 + $0x2998] sm:$0xff]  ;;  %2199 = vmatpush.msrb.mxu2 %v783_v37  ;;  %v639_v11 = vld [vmem:[%s9147_s1 + $0x1320] sm:$0xff] }
  0xf4   :  { %v1342_v41 = vld [vmem:[%s9147_s1 + $0x2918] sm:$0xff]  ;;  %2131 = vmatpush.msrb.mxu0 %v1358_v10  ;;  %2179 = vmatpush.msrb.mxu1 %v527_v35  ;;  %v383_v12 = vld [vmem:[%s9147_s1 + $0xb20] sm:$0xff] }
  0xf5   :  { %2161 = vmatpush.msra.mxu3 %v239_v38  ;;  %v1326_v44 = vld [vmem:[%s9147_s1 + $0x2898] sm:$0xff]  ;;  %2200 = vmatpush.msrb.mxu2 %v767_v43  ;;  %v95_v13 = vld [vmem:[%s9147_s1 + $0x220] sm:$0xff] }
  0xf6   :  { %2132 = vmatpush.msrb.mxu0 %v1342_v41  ;;  %2180 = vmatpush.msrb.mxu1 %v511_v42  ;;  %v1310_v48 = vld [vmem:[%s9147_s1 + $0x2818] sm:$0xff]  ;;  %v943_v15 = vld [vmem:[%s9147_s1 + $0x1ca0] sm:$0xff] }
  0xf7   :  { %2162 = vmatpush.msra.mxu3 %v223_v19  ;;  %2201 = vmatpush.msrb.mxu2 %v751_v46  ;;  %v623_v16 = vld [vmem:[%s9147_s1 + $0x12a0] sm:$0xff] }
  0xf8   :  { %2133 = vmatpush.msrb.mxu0 %v1326_v44  ;;  %2181 = vmatpush.msrb.mxu1 %v495_v45  ;;  %v367_v17 = vld [vmem:[%s9147_s1 + $0xaa0] sm:$0xff] }
  0xf9   :  { %2163 = vmatpush.msra.mxu3 %v207_v47  ;;  %2202 = vmatpush.msrb.mxu2 %v735_v0  ;;  %v79_v20 = vld [vmem:[%s9147_s1 + $0x1a0] sm:$0xff] }
  0xfa   :  { %2134 = vmatpush.msrb.mxu0 %v1310_v48  ;;  %2182 = vmatpush.msrb.mxu1 %v479_v49  ;;  %v927_v21 = vld [vmem:[%s9147_s1 + $0x1c20] sm:$0xff] }
  0xfb   :  { %2164 = vmatpush.msra.mxu3 %v191_v8  ;;  %2135 = vmatmul.f32.vlgmr.msrb.gmra.mxu0 %v5316_v54  ;;  %v607_v23 = vld [vmem:[%s9147_s1 + $0x1220] sm:$0xff]  ;;  %v528_v8 = vld [vmem:[%s9147_s1 + $0xfa8] sm:$0xff] }
  0xfc   :  { %2219 = vmatpush.msra.mxu0 %v1039_v50  ;;  %2183 = vmatpush.msrb.mxu1 %v463_v14  ;;  %v351_v24 = vld [vmem:[%s9147_s1 + $0xa20] sm:$0xff] }
  0xfd   :  { %2203 = vmatpush.msrb.mxu2 %v719_v51  ;;  %2165 = vmatpush.msra.mxu3 %v175_v52  ;;  %v63_v25 = vld [vmem:[%s9147_s1 + $0x120] sm:$0xff]  ;;  %v512_v52 = vld [vmem:[%s9147_s1 + $0xf28] sm:$0xff] }
  0xfe   :  { %2220 = vmatpush.msra.mxu0 %v1023_v53  ;;  %3908 = vmatmul.msk.f32.vlgmr.msra.gmra.mxu1 %vm1595_vm0, %v5334_v59  ;;  %v911_v26 = vld [vmem:[%s9147_s1 + $0x1ba0] sm:$0xff] }
  0xff   :  { %2204 = vmatpush.msrb.mxu2 %v703_v18  ;;  %2184 = vmatpush.msrb.mxu1 %v447_v55  ;;  %v591_v27 = vld [vmem:[%s9147_s1 + $0x11a0] sm:$0xff] }
 0x100   :  { %2166 = vmatpush.msra.mxu3 %v159_v56  ;;  %2221 = vmatpush.msra.mxu0 %v1007_v57  ;;  %v335_v28 = vld [vmem:[%s9147_s1 + $0x9a0] sm:$0xff]  ;;  %v272_v56 = vld [vmem:[%s9147_s1 + $0x7a8] sm:$0xff] }
 0x101   :  { %2205 = vmatpush.msrb.mxu2 %v687_v58  ;;  %2185 = vmatpush.msrb.mxu1 %v431_v60  ;;  %v47_v29 = vld [vmem:[%s9147_s1 + $0xa0] sm:$0xff]  ;;  %v496_v57 = vld [vmem:[%s9147_s1 + $0xea8] sm:$0xff] }
 0x102   :  { %2167 = vmatpush.msra.mxu3 %v143_v61  ;;  %2222 = vmatpush.msra.mxu0 %v991_v62  ;;  %v895_v30 = vld [vmem:[%s9147_s1 + $0x1b20] sm:$0xff]  ;;  %v256_v61 = vld [vmem:[%s9147_s1 + $0x728] sm:$0xff] }
 0x103   :  { %2206 = vmatpush.msrb.mxu2 %v671_v63  ;;  %2186 = vmatpush.msrb.mxu1 %v415_v1  ;;  %v575_v31 = vld [vmem:[%s9147_s1 + $0x1120] sm:$0xff]  ;;  %v480_v62 = vld [vmem:[%s9147_s1 + $0xe28] sm:$0xff] }
 0x104   :  { %2168 = vmatpush.msra.mxu3 %v127_v2  ;;  %2223 = vmatpush.msra.mxu0 %v975_v3  ;;  %v319_v32 = vld [vmem:[%s9147_s1 + $0x920] sm:$0xff]  ;;  %v240_v2 = vld [vmem:[%s9147_s1 + $0x6a8] sm:$0xff] }
 0x105   :  { %2207 = vmatpush.msrb.mxu2 %v655_v4  ;;  %2187 = vmatpush.msrb.mxu1 %v399_v6  ;;  %v31_v33 = vld [vmem:[%s9147_s1 + $0x20] sm:$0xff]  ;;  %v464_v3 = vld [vmem:[%s9147_s1 + $0xda8] sm:$0xff] }
 0x106   :  { %2169 = vmatpush.msra.mxu3 %v111_v7  ;;  %2224 = vmatpush.msra.mxu0 %v959_v9  ;;  %v879_v5 = vld [vmem:[%s9147_s1 + $0x1aa0] sm:$0xff]  ;;  %v224_v7 = vld [vmem:[%s9147_s1 + $0x628] sm:$0xff] }
 0x107   :  { %2208 = vmatpush.msrb.mxu2 %v639_v11  ;;  %2188 = vmatpush.msrb.mxu1 %v383_v12  ;;  %v559_v10 = vld [vmem:[%s9147_s1 + $0x10a0] sm:$0xff]  ;;  %v448_v9 = vld [vmem:[%s9147_s1 + $0xd28] sm:$0xff] }
 0x108   :  { %2170 = vmatpush.msra.mxu3 %v95_v13  ;;  %2225 = vmatpush.msra.mxu0 %v943_v15  ;;  %v303_v35 = vld [vmem:[%s9147_s1 + $0x8a0] sm:$0xff]  ;;  %v5552_v13 = vpop.f32.mrf.mxu0  ;;  %v208_v15 = vld [vmem:[%s9147_s1 + $0x5a8] sm:$0xff] }
 0x109   :  { %2209 = vmatpush.msrb.mxu2 %v623_v16  ;;  %2189 = vmatpush.msrb.mxu1 %v367_v17  ;;  %v1295_v37 = vld [vmem:[%s9147_s1 + $0x27a0] sm:$0xff]  ;;  %v432_v16 = vld [vmem:[%s9147_s1 + $0xca8] sm:$0xff] }
 0x10a   :  { %2171 = vmatpush.msra.mxu3 %v79_v20  ;;  %2226 = vmatpush.msra.mxu0 %v927_v21  ;;  %v863_v38 = vld [vmem:[%s9147_s1 + $0x1a20] sm:$0xff]  ;;  %v192_v21 = vld [vmem:[%s9147_s1 + $0x528] sm:$0xff] }
 0x10b   :  { %2210 = vmatpush.msrb.mxu2 %v607_v23  ;;  %2190 = vmatpush.msrb.mxu1 %v351_v24  ;;  %v543_v41 = vld [vmem:[%s9147_s1 + $0x1020] sm:$0xff]  ;;  %v416_v23 = vld [vmem:[%s9147_s1 + $0xc28] sm:$0xff]  ;;  %v5572_v24 = vpop.f32.mrf.mxu2 }
 0x10c   :  { %2172 = vmatpush.msra.mxu3 %v63_v25  ;;  %2227 = vmatpush.msra.mxu0 %v911_v26  ;;  %v287_v42 = vld [vmem:[%s9147_s1 + $0x820] sm:$0xff] }
 0x10d   :  { %2211 = vmatpush.msrb.mxu2 %v591_v27  ;;  %2191 = vmatpush.msrb.mxu1 %v335_v28  ;;  %v1279_v43 = vld [vmem:[%s9147_s1 + $0x2720] sm:$0xff]  ;;  %v5580_v27 = vpop.f32.mrf.mxu3  ;;  %v176_v28 = vld [vmem:[%s9147_s1 + $0x4a8] sm:$0xff] }
 0x10e   :  { %2173 = vmatpush.msra.mxu3 %v47_v29  ;;  %2228 = vmatpush.msra.mxu0 %v895_v30  ;;  %v847_v19 = vld [vmem:[%s9147_s1 + $0x19a0] sm:$0xff]  ;;  %v400_v29 = vld [vmem:[%s9147_s1 + $0xba8] sm:$0xff] }
 0x10f   :  { %2212 = vmatpush.msrb.mxu2 %v575_v31  ;;  %2192 = vmatpush.msrb.mxu1 %v319_v32  ;;  %v1551_v44 = vld [vmem:[%s9147_s1 + $0x2fa0] sm:$0xff]  ;;  %v5594_v32 = vpop.f32.mrf.mxu1 }
 0x110   :  { %2174 = vmatpush.msra.mxu3 %v31_v33  ;;  %2229 = vmatpush.msra.mxu0 %v879_v5  ;;  %v1583_v45 = vld [vmem:[%s9147_s1 + $0x30a0] sm:$0xff]  ;;  %v160_v33 = vld [vmem:[%s9147_s1 + $0x428] sm:$0xff] }
 0x111   :  { %2213 = vmatpush.msrb.mxu2 %v559_v10  ;;  %2193 = vmatpush.msrb.mxu1 %v303_v35  ;;  %v1263_v46 = vld [vmem:[%s9147_s1 + $0x26a0] sm:$0xff]  ;;  %v384_v5 = vld [vmem:[%s9147_s1 + $0xb28] sm:$0xff] }
 0x112   :  { %2239 = vmatpush.msrb.mxu3 %v1295_v37  ;;  %2230 = vmatpush.msra.mxu0 %v863_v38  ;;  %v831_v47 = vld [vmem:[%s9147_s1 + $0x1920] sm:$0xff]  ;;  %v5608_v37 = vpop.f32.mrf.mxu0  ;;  %v144_v38 = vld [vmem:[%s9147_s1 + $0x3a8] sm:$0xff] }
 0x113   :  { %2214 = vmatpush.msrb.mxu2 %v543_v41  ;;  %2194 = vmatpush.msrb.mxu1 %v287_v42  ;;  %v1535_v48 = vld [vmem:[%s9147_s1 + $0x2f20] sm:$0xff]  ;;  %v368_v41 = vld [vmem:[%s9147_s1 + $0xaa8] sm:$0xff] }
 0x114   :  { %2240 = vmatpush.msrb.mxu3 %v1279_v43  ;;  %2231 = vmatpush.msra.mxu0 %v847_v19  ;;  %v1567_v49 = vld [vmem:[%s9147_s1 + $0x3020] sm:$0xff]  ;;  %v128_v19 = vld [vmem:[%s9147_s1 + $0x328] sm:$0xff] }
 0x115   :  { %2259 = vmatpush.msra.mxu1 %v1551_v44  ;;  %2293 = vmatpush.msra.mxu2 %v1583_v45  ;;  %v1247_v0 = vld [vmem:[%s9147_s1 + $0x2620] sm:$0xff]  ;;  %v352_v44 = vld [vmem:[%s9147_s1 + $0xa28] sm:$0xff]  ;;  %v5628_v45 = vpop.f32.mrf.mxu2 }
 0x116   :  { %2175 = vmatmul.f32.vlgmr.msra.gmra.mxu3 %v5184_v22  ;;  %2232 = vmatpush.msra.mxu0 %v831_v47  ;;  %v815_v50 = vld [vmem:[%s9147_s1 + $0x18a0] sm:$0xff] }
 0x117   :  { %2241 = vmatpush.msrb.mxu3 %v1263_v46  ;;  %2260 = vmatpush.msra.mxu1 %v1535_v48  ;;  %v1519_v14 = vld [vmem:[%s9147_s1 + $0x2ea0] sm:$0xff]  ;;  %v1756_v48 = vpop.f32.mrf.mxu3 }
 0x118   :  { %2294 = vmatpush.msra.mxu2 %v1567_v49  ;;  %v1231_v51 = vld [vmem:[%s9147_s1 + $0x25a0] sm:$0xff]  ;;  %2233 = vmatpush.msra.mxu0 %v815_v50  ;;  %v112_v49 = vld [vmem:[%s9147_s1 + $0x2a8] sm:$0xff]  ;;  %v5645_v50 = vpop.f32.mrf.mxu1 }
 0x119   :  { %2215 = vmatmul.f32.vlgmr.msrb.gmra.mxu2 %v5250_v39  ;;  %2242 = vmatpush.msrb.mxu3 %v1247_v0  ;;  %v799_v53 = vld [vmem:[%s9147_s1 + $0x1820] sm:$0xff]  ;;  %v336_v0 = vld [vmem:[%s9147_s1 + $0x9a8] sm:$0xff] }
 0x11a   :  { %2319 = vmatpush.msrb.mxu2 %v528_v8  ;;  %v1503_v18 = vld [vmem:[%s9147_s1 + $0x2e20] sm:$0xff]  ;;  %2261 = vmatpush.msra.mxu1 %v1519_v14  ;;  %v784_v14 = vld [vmem:[%s9147_s1 + $0x17a8] sm:$0xff] }
 0x11b   :  { %v1215_v55 = vld [vmem:[%s9147_s1 + $0x2520] sm:$0xff]  ;;  %2243 = vmatpush.msrb.mxu3 %v1231_v51  ;;  %2234 = vmatpush.msra.mxu0 %v799_v53  ;;  %v96_v51 = vld [vmem:[%s9147_s1 + $0x228] sm:$0xff] }
 0x11c   :  { %2320 = vmatpush.msrb.mxu2 %v512_v52  ;;  %v1487_v58 = vld [vmem:[%s9147_s1 + $0x2da0] sm:$0xff]  ;;  %2262 = vmatpush.msra.mxu1 %v1503_v18  ;;  %v320_v52 = vld [vmem:[%s9147_s1 + $0x928] sm:$0xff]  ;;  %v1796_v18 = vpop.f32.mrf.mxu0 }
 0x11d   :  { %2244 = vmatpush.msrb.mxu3 %v1215_v55  ;;  %v1199_v60 = vld [vmem:[%s9147_s1 + $0x24a0] sm:$0xff]  ;;  %2195 = vmatmul.f32.vlgmr.msrb.gmra.mxu1 %v5238_v36  ;;  %v768_v55 = vld [vmem:[%s9147_s1 + $0x1728] sm:$0xff] }
 0x11e   :  { %2299 = vmatpush.msrb.mxu0 %v272_v56  ;;  %v1471_v63 = vld [vmem:[%s9147_s1 + $0x2d20] sm:$0xff]  ;;  %2321 = vmatpush.msrb.mxu2 %v496_v57  ;;  %v80_v56 = vld [vmem:[%s9147_s1 + $0x1a8] sm:$0xff] }
 0x11f   :  { %2263 = vmatpush.msra.mxu1 %v1487_v58  ;;  %v1183_v1 = vld [vmem:[%s9147_s1 + $0x2420] sm:$0xff]  ;;  %2245 = vmatpush.msrb.mxu3 %v1199_v60  ;;  %v304_v57 = vld [vmem:[%s9147_s1 + $0x8a8] sm:$0xff] }
 0x120   :  { %2300 = vmatpush.msrb.mxu0 %v256_v61  ;;  %2322 = vmatpush.msrb.mxu2 %v480_v62  ;;  %v1455_v4 = vld [vmem:[%s9147_s1 + $0x2ca0] sm:$0xff]  ;;  %v1040_v58 = vld [vmem:[%s9147_s1 + $0x1fa8] sm:$0xff]  ;;  %v1776_v61 = vpop.f32.mrf.mxu2 }
 0x121   :  { %2264 = vmatpush.msra.mxu1 %v1471_v63  ;;  %v1167_v6 = vld [vmem:[%s9147_s1 + $0x23a0] sm:$0xff]  ;;  %2235 = vmatmul.f32.vlgmr.msra.gmra.mxu0 %v5226_v34  ;;  %v752_v60 = vld [vmem:[%s9147_s1 + $0x16a8] sm:$0xff] }
 0x122   :  { %2246 = vmatpush.msrb.mxu3 %v1183_v1  ;;  %2301 = vmatpush.msrb.mxu0 %v240_v2  ;;  %v1439_v11 = vld [vmem:[%s9147_s1 + $0x2c20] sm:$0xff]  ;;  %v64_v62 = vld [vmem:[%s9147_s1 + $0x128] sm:$0xff] }
 0x123   :  { %2323 = vmatpush.msrb.mxu2 %v464_v3  ;;  %v1151_v12 = vld [vmem:[%s9147_s1 + $0x2320] sm:$0xff]  ;;  %2265 = vmatpush.msra.mxu1 %v1455_v4  ;;  %v288_v63 = vld [vmem:[%s9147_s1 + $0x828] sm:$0xff] }
 0x124   :  { %2247 = vmatpush.msrb.mxu3 %v1167_v6  ;;  %2302 = vmatpush.msrb.mxu0 %v224_v7  ;;  %v1423_v17 = vld [vmem:[%s9147_s1 + $0x2ba0] sm:$0xff]  ;;  %v1024_v1 = vld [vmem:[%s9147_s1 + $0x1f28] sm:$0xff]  ;;  %v1816_v6 = vpop.f32.mrf.mxu1  ;;  %v5695_v7 = vpop.f32.mrf.mxu3 }
 0x125   :  { %2324 = vmatpush.msrb.mxu2 %v448_v9  ;;  %v1135_v20 = vld [vmem:[%s9147_s1 + $0x22a0] sm:$0xff]  ;;  %2266 = vmatpush.msra.mxu1 %v1439_v11  ;;  %v736_v2 = vld [vmem:[%s9147_s1 + $0x1628] sm:$0xff] }
 0x126   :  { %2248 = vmatpush.msrb.mxu3 %v1151_v12  ;;  %2303 = vmatpush.msrb.mxu0 %v208_v15  ;;  %v1407_v25 = vld [vmem:[%s9147_s1 + $0x2b20] sm:$0xff]  ;;  %v1552_v3 = vld [vmem:[%s9147_s1 + $0x2fa8] sm:$0xff]  ;;  %v1777_v15 = vadd.f32 %v1776_v61, %v1756_v48 }
 0x127   :  { %2325 = vmatpush.msrb.mxu2 %v432_v16  ;;  %v1119_v26 = vld [vmem:[%s9147_s1 + $0x2220] sm:$0xff]  ;;  %2267 = vmatpush.msra.mxu1 %v1423_v17  ;;  %v48_v4 = vld [vmem:[%s9147_s1 + $0xa8] sm:$0xff] }
 0x128   :  { %2249 = vmatpush.msrb.mxu3 %v1135_v20  ;;  %2304 = vmatpush.msrb.mxu0 %v192_v21  ;;  %v1391_v30 = vld [vmem:[%s9147_s1 + $0x2aa0] sm:$0xff]  ;;  %v1008_v9 = vld [vmem:[%s9147_s1 + $0x1ea8] sm:$0xff] }
 0x129   :  { %2326 = vmatpush.msrb.mxu2 %v416_v23  ;;  %v1103_v31 = vld [vmem:[%s9147_s1 + $0x21a0] sm:$0xff]  ;;  %2268 = vmatpush.msra.mxu1 %v1407_v25  ;;  %v720_v11 = vld [vmem:[%s9147_s1 + $0x15a8] sm:$0xff]  ;;  %v5718_v23 = vpop.f32.mrf.mxu0 }
 0x12a   :  { %2250 = vmatpush.msrb.mxu3 %v1119_v26  ;;  %2305 = vmatpush.msrb.mxu0 %v176_v28  ;;  %v1375_v10 = vld [vmem:[%s9147_s1 + $0x2a20] sm:$0xff]  ;;  %v1536_v12 = vld [vmem:[%s9147_s1 + $0x2f28] sm:$0xff] }
 0x12b   :  { %2327 = vmatpush.msrb.mxu2 %v400_v29  ;;  %v1087_v35 = vld [vmem:[%s9147_s1 + $0x2120] sm:$0xff]  ;;  %2269 = vmatpush.msra.mxu1 %v1391_v30  ;;  %v32_v16 = vld [vmem:[%s9147_s1 + $0x28] sm:$0xff]  ;;  %v1637_v30 = vadd.f32 %v5594_v32, %v5552_v13 }
 0x12c   :  { %2251 = vmatpush.msrb.mxu3 %v1103_v31  ;;  %2306 = vmatpush.msrb.mxu0 %v160_v33  ;;  %v1359_v42 = vld [vmem:[%s9147_s1 + $0x29a0] sm:$0xff]  ;;  %v992_v17 = vld [vmem:[%s9147_s1 + $0x1e28] sm:$0xff]  ;;  %v1797_v31 = vadd.f32 %v1796_v18, %v1777_v15 }
 0x12d   :  { %2328 = vmatpush.msrb.mxu2 %v384_v5  ;;  %v1071_v43 = vld [vmem:[%s9147_s1 + $0x20a0] sm:$0xff]  ;;  %2270 = vmatpush.msra.mxu1 %v1375_v10  ;;  %v704_v20 = vld [vmem:[%s9147_s1 + $0x1528] sm:$0xff]  ;;  %v1856_v10 = vpop.f32.mrf.mxu2 }
 0x12e   :  { %2252 = vmatpush.msrb.mxu3 %v1087_v35  ;;  %2307 = vmatpush.msrb.mxu0 %v144_v38  ;;  %v1343_v46 = vld [vmem:[%s9147_s1 + $0x2920] sm:$0xff]  ;;  %v1296_v21 = vld [vmem:[%s9147_s1 + $0x27a8] sm:$0xff] }
 0x12f   :  { %2329 = vmatpush.msrb.mxu2 %v368_v41  ;;  %v1055_v47 = vld [vmem:[%s9147_s1 + $0x2020] sm:$0xff]  ;;  %2271 = vmatpush.msra.mxu1 %v1359_v42  ;;  %v1520_v25 = vld [vmem:[%s9147_s1 + $0x2ea8] sm:$0xff] }
 0x130   :  { %2253 = vmatpush.msrb.mxu3 %v1071_v43  ;;  %2308 = vmatpush.msrb.mxu0 %v128_v19  ;;  %v1327_v8 = vld [vmem:[%s9147_s1 + $0x28a0] sm:$0xff]  ;;  %v976_v26 = vld [vmem:[%s9147_s1 + $0x1da8] sm:$0xff] }
 0x131   :  { %2330 = vmatpush.msrb.mxu2 %v352_v44  ;;  %2272 = vmatpush.msra.mxu1 %v1343_v46  ;;  %v1311_v53 = vld [vmem:[%s9147_s1 + $0x2820] sm:$0xff]  ;;  %v688_v28 = vld [vmem:[%s9147_s1 + $0x14a8] sm:$0xff]  ;;  %v1657_v44 = vadd.f32 %v5572_v24, %v1637_v30  ;;  %v1817_v46 = vadd.f32 %v1816_v6, %v1797_v31 }
 0x132   :  { %2254 = vmatpush.msrb.mxu3 %v1055_v47  ;;  %2309 = vmatpush.msrb.mxu0 %v112_v49  ;;  %v1280_v29 = vld [vmem:[%s9147_s1 + $0x2728] sm:$0xff]  ;;  %v1896_v32 = vpop.f32.mrf.mxu1  ;;  %v1916_v38 = vpop.f32.mrf.mxu3 }
 0x133   :  { %2331 = vmatpush.msrb.mxu2 %v336_v0  ;;  %2255 = vmatmul.f32.vlgmr.msrb.gmra.mxu3 %v5256_v40  ;;  %v1504_v33 = vld [vmem:[%s9147_s1 + $0x2e28] sm:$0xff]  ;;  %v1917_v49 = vadd.f32 %v1916_v38, %v1896_v32  ;;  %v1677_v18 = vadd.f32 %v5580_v27, %v1657_v44 }
 0x134   :  { %2273 = vmatpush.msra.mxu1 %v1327_v8  ;;  %2339 = vmatpush.msra.mxu3 %v784_v14  ;;  %v960_v5 = vld [vmem:[%s9147_s1 + $0x1d28] sm:$0xff]  ;;  %v1936_v8 = vpop.f32.mrf.mxu0 }
 0x135   :  { %2310 = vmatpush.msrb.mxu0 %v96_v51  ;;  %2332 = vmatpush.msrb.mxu2 %v320_v52  ;;  %v672_v35 = vld [vmem:[%s9147_s1 + $0x1428] sm:$0xff]  ;;  %v1697_v61 = vadd.f32 %v5608_v37, %v1677_v18  ;;  %v1009_v18 = vld [vmem:[%s9147_s1 + $0x1eb0] sm:$0xff] }
 0x136   :  { %2274 = vmatpush.msra.mxu1 %v1311_v53  ;;  %2340 = vmatpush.msra.mxu3 %v768_v55  ;;  %v1264_v13 = vld [vmem:[%s9147_s1 + $0x26a8] sm:$0xff]  ;;  %v1837_v55 = vadd.f32 %v5695_v7, %v1817_v46  ;;  %v497_v46 = vld [vmem:[%s9147_s1 + $0xeb0] sm:$0xff] }
 0x137   :  { %2311 = vmatpush.msrb.mxu0 %v80_v56  ;;  %2333 = vmatpush.msrb.mxu2 %v304_v57  ;;  %v1488_v41 = vld [vmem:[%s9147_s1 + $0x2da8] sm:$0xff]  ;;  %v1717_v15 = vadd.f32 %v5645_v50, %v1697_v61  ;;  %v977_v61 = vld [vmem:[%s9147_s1 + $0x1db0] sm:$0xff] }
 0x138   :  { %2359 = vmatpush.msrb.mxu1 %v1040_v58  ;;  %3909 = vmatmul.msk.f32.vlgmr.msra.gmra.mxu2 %vm1595_vm0, %v5334_v59  ;;  %v944_v42 = vld [vmem:[%s9147_s1 + $0x1ca8] sm:$0xff]  ;;  %v1937_v58 = vadd.f32 %v1936_v8, %v1917_v49  ;;  %v481_v49 = vld [vmem:[%s9147_s1 + $0xe30] sm:$0xff] }
 0x139   :  { %2341 = vmatpush.msra.mxu3 %v752_v60  ;;  %2312 = vmatpush.msrb.mxu0 %v64_v62  ;;  %v656_v43 = vld [vmem:[%s9147_s1 + $0x13a8] sm:$0xff]  ;;  %v1956_v62 = vpop.f32.mrf.mxu2 }
 0x13a   :  { %2334 = vmatpush.msrb.mxu2 %v288_v63  ;;  %2360 = vmatpush.msrb.mxu1 %v1024_v1  ;;  %v1248_v19 = vld [vmem:[%s9147_s1 + $0x2628] sm:$0xff] }
 0x13b   :  { %2342 = vmatpush.msra.mxu3 %v736_v2  ;;  %2313 = vmatpush.msrb.mxu0 %v48_v4  ;;  %v1472_v47 = vld [vmem:[%s9147_s1 + $0x2d28] sm:$0xff] }
 0x13c   :  { %2399 = vmatpush.msra.mxu2 %v1552_v3  ;;  %2361 = vmatpush.msrb.mxu1 %v1008_v9  ;;  %v928_v48 = vld [vmem:[%s9147_s1 + $0x1c28] sm:$0xff]  ;;  %v1857_v3 = vadd.f32 %v1856_v10, %v1837_v55  ;;  %v1957_v9 = vadd.f32 %v1956_v62, %v1937_v58  ;;  %v785_v55 = vld [vmem:[%s9147_s1 + $0x17b0] sm:$0xff] }
 0x13d   :  { %2343 = vmatpush.msra.mxu3 %v720_v11  ;;  %2275 = vmatmul.f32.vlgmr.msra.gmra.mxu1 %v5316_v54  ;;  %v640_v0 = vld [vmem:[%s9147_s1 + $0x1328] sm:$0xff]  ;;  %v993_v58 = vld [vmem:[%s9147_s1 + $0x1e30] sm:$0xff] }
 0x13e   :  { %2400 = vmatpush.msra.mxu2 %v1536_v12  ;;  %2314 = vmatpush.msrb.mxu0 %v32_v16  ;;  %v1232_v24 = vld [vmem:[%s9147_s1 + $0x25a8] sm:$0xff]  ;;  %v753_v62 = vld [vmem:[%s9147_s1 + $0x16b0] sm:$0xff] }
 0x13f   :  { %2362 = vmatpush.msrb.mxu1 %v992_v17  ;;  %2344 = vmatpush.msra.mxu3 %v704_v20  ;;  %v1456_v14 = vld [vmem:[%s9147_s1 + $0x2ca8] sm:$0xff] }
 0x140   :  { %2379 = vmatpush.msra.mxu0 %v1296_v21  ;;  %2401 = vmatpush.msra.mxu2 %v1520_v25  ;;  %v912_v51 = vld [vmem:[%s9147_s1 + $0x1ba8] sm:$0xff]  ;;  %v1877_v25 = vadd.f32 %v5718_v23, %v1857_v3  ;;  %v1737_v23 = vadd.f32 %v5628_v45, %v1717_v15  ;;  %v529_v45 = vld [vmem:[%s9147_s1 + $0xfb0] sm:$0xff] }
 0x141   :  { %2363 = vmatpush.msrb.mxu1 %v976_v26  ;;  %2345 = vmatpush.msra.mxu3 %v688_v28  ;;  %v624_v52 = vld [vmem:[%s9147_s1 + $0x12a8] sm:$0xff]  ;;  %v385_v3 = vld [vmem:[%s9147_s1 + $0xb30] sm:$0xff] }
 0x142   :  { %2380 = vmatpush.msra.mxu0 %v1280_v29  ;;  %2402 = vmatpush.msra.mxu2 %v1504_v33  ;;  %v1216_v53 = vld [vmem:[%s9147_s1 + $0x2528] sm:$0xff]  ;;  %v353_v15 = vld [vmem:[%s9147_s1 + $0xa30] sm:$0xff] }
 0x143   :  { %2364 = vmatpush.msrb.mxu1 %v960_v5  ;;  %2346 = vmatpush.msra.mxu3 %v672_v35  ;;  %v1440_v56 = vld [vmem:[%s9147_s1 + $0x2c28] sm:$0xff] }
 0x144   :  { %2381 = vmatpush.msra.mxu0 %v1264_v13  ;;  %2403 = vmatpush.msra.mxu2 %v1488_v41  ;;  %v896_v57 = vld [vmem:[%s9147_s1 + $0x1b28] sm:$0xff]  ;;  %v3839_v13 = vmax.f32 %v1737_v23, %v1877_v25  ;;  %v129_v25 = vld [vmem:[%s9147_s1 + $0x330] sm:$0xff] }
 0x145   :  { %2365 = vmatpush.msrb.mxu1 %v944_v42  ;;  %2347 = vmatpush.msra.mxu3 %v656_v43  ;;  %v608_v60 = vld [vmem:[%s9147_s1 + $0x1228] sm:$0xff]  ;;  %v513_v42 = vld [vmem:[%s9147_s1 + $0xf30] sm:$0xff] }
 0x146   :  { %2382 = vmatpush.msra.mxu0 %v1248_v19  ;;  %2404 = vmatpush.msra.mxu2 %v1472_v47  ;;  %v1200_v27 = vld [vmem:[%s9147_s1 + $0x24a8] sm:$0xff] }
 0x147   :  { %2366 = vmatpush.msrb.mxu1 %v928_v48  ;;  %2348 = vmatpush.msra.mxu3 %v640_v0  ;;  %v1424_v63 = vld [vmem:[%s9147_s1 + $0x2ba8] sm:$0xff]  ;;  %v273_v0 = vld [vmem:[%s9147_s1 + $0x7b0] sm:$0xff] }
 0x148   :  { %2383 = vmatpush.msra.mxu0 %v1232_v24  ;;  %2405 = vmatpush.msra.mxu2 %v1456_v14  ;;  %v880_v1 = vld [vmem:[%s9147_s1 + $0x1aa8] sm:$0xff]  ;;  %v1041_v24 = vld [vmem:[%s9147_s1 + $0x1fb0] sm:$0xff] }
 0x149   :  { %2367 = vmatpush.msrb.mxu1 %v912_v51  ;;  %2349 = vmatpush.msra.mxu3 %v624_v52  ;;  %v592_v2 = vld [vmem:[%s9147_s1 + $0x11a8] sm:$0xff]  ;;  %v1976_v7 = vpop.f32.mrf.mxu1  ;;  %v465_v14 = vld [vmem:[%s9147_s1 + $0xdb0] sm:$0xff] }
 0x14a   :  { %2384 = vmatpush.msra.mxu0 %v1216_v53  ;;  %2406 = vmatpush.msra.mxu2 %v1440_v56  ;;  %v1184_v37 = vld [vmem:[%s9147_s1 + $0x2428] sm:$0xff]  ;;  %v1977_v21 = vadd.f32 %v1976_v7, %v1957_v9  ;;  %v257_v51 = vld [vmem:[%s9147_s1 + $0x730] sm:$0xff] }
 0x14b   :  { %2368 = vmatpush.msrb.mxu1 %v896_v57  ;;  %2350 = vmatpush.msra.mxu3 %v608_v60  ;;  %v1408_v4 = vld [vmem:[%s9147_s1 + $0x2b28] sm:$0xff]  ;;  %v1025_v52 = vld [vmem:[%s9147_s1 + $0x1f30] sm:$0xff] }
 0x14c   :  { %2385 = vmatpush.msra.mxu0 %v1200_v27  ;;  %v864_v6 = vld [vmem:[%s9147_s1 + $0x1a28] sm:$0xff]  ;;  %2407 = vmatpush.msra.mxu2 %v1424_v63  ;;  %v449_v53 = vld [vmem:[%s9147_s1 + $0xd30] sm:$0xff] }
 0x14d   :  { %2369 = vmatpush.msrb.mxu1 %v880_v1  ;;  %v576_v11 = vld [vmem:[%s9147_s1 + $0x1128] sm:$0xff]  ;;  %2351 = vmatpush.msra.mxu3 %v592_v2  ;;  %v225_v56 = vld [vmem:[%s9147_s1 + $0x630] sm:$0xff] }
 0x14e   :  { %v1168_v12 = vld [vmem:[%s9147_s1 + $0x23a8] sm:$0xff]  ;;  %2386 = vmatpush.msra.mxu0 %v1184_v37  ;;  %2408 = vmatpush.msra.mxu2 %v1408_v4  ;;  %v433_v57 = vld [vmem:[%s9147_s1 + $0xcb0] sm:$0xff] }
 0x14f   :  { %v1392_v16 = vld [vmem:[%s9147_s1 + $0x2aa8] sm:$0xff]  ;;  %2370 = vmatpush.msrb.mxu1 %v864_v6  ;;  %2352 = vmatpush.msra.mxu3 %v576_v11  ;;  %v1996_v29 = vpop.f32.mrf.mxu3  ;;  %v769_v60 = vld [vmem:[%s9147_s1 + $0x1730] sm:$0xff] }
 0x150   :  { %v848_v17 = vld [vmem:[%s9147_s1 + $0x19a8] sm:$0xff]  ;;  %2387 = vmatpush.msra.mxu0 %v1168_v12  ;;  %2409 = vmatpush.msra.mxu2 %v1392_v16  ;;  %v1997_v31 = vadd.f32 %v1996_v29, %v1977_v21  ;;  %v417_v27 = vld [vmem:[%s9147_s1 + $0xc30] sm:$0xff] }
 0x151   :  { %v560_v20 = vld [vmem:[%s9147_s1 + $0x10a8] sm:$0xff]  ;;  %2371 = vmatpush.msrb.mxu1 %v848_v17  ;;  %2335 = vmatmul.f32.vlgmr.msrb.gmra.mxu2 %v5238_v36  ;;  %v401_v63 = vld [vmem:[%s9147_s1 + $0xbb0] sm:$0xff] }
 0x152   :  { %v1152_v50 = vld [vmem:[%s9147_s1 + $0x2328] sm:$0xff]  ;;  %2353 = vmatpush.msra.mxu3 %v560_v20  ;;  %v2016_v35 = vpop.f32.mrf.mxu0  ;;  %2315 = vmatmul.f32.vlgmr.msrb.gmra.mxu0 %v5184_v22  ;;  %v193_v1 = vld [vmem:[%s9147_s1 + $0x530] sm:$0xff] }
 0x153   :  { %v1376_v26 = vld [vmem:[%s9147_s1 + $0x2a28] sm:$0xff]  ;;  %2388 = vmatpush.msra.mxu0 %v1152_v50  ;;  %v2017_v38 = vadd.f32 %v2016_v35, %v1997_v31  ;;  %v961_v2 = vld [vmem:[%s9147_s1 + $0x1d30] sm:$0xff] }
 0x154   :  { %v832_v28 = vld [vmem:[%s9147_s1 + $0x1928] sm:$0xff]  ;;  %2410 = vmatpush.msra.mxu2 %v1376_v26  ;;  %v737_v37 = vld [vmem:[%s9147_s1 + $0x1630] sm:$0xff] }
 0x155   :  { %v544_v30 = vld [vmem:[%s9147_s1 + $0x1028] sm:$0xff]  ;;  %2372 = vmatpush.msrb.mxu1 %v832_v28  ;;  %v5873_v43 = vmax.f32 %v3839_v13, %v2017_v38  ;;  %v945_v4 = vld [vmem:[%s9147_s1 + $0x1cb0] sm:$0xff] }
 0x156   :  { %v1136_v33 = vld [vmem:[%s9147_s1 + $0x22a8] sm:$0xff]  ;;  %2354 = vmatpush.msra.mxu3 %v544_v30  ;;  %v721_v6 = vld [vmem:[%s9147_s1 + $0x15b0] sm:$0xff] }
 0x157   :  { %v1360_v5 = vld [vmem:[%s9147_s1 + $0x29a8] sm:$0xff]  ;;  %2389 = vmatpush.msra.mxu0 %v1136_v33  ;;  %2355 = vmatmul.f32.vlgmr.msra.gmra.mxu3 %v5250_v39  ;;  %v369_v7 = vld [vmem:[%s9147_s1 + $0xab0] sm:$0xff] }
 0x158   :  { %v816_v10 = vld [vmem:[%s9147_s1 + $0x18a8] sm:$0xff]  ;;  %2411 = vmatpush.msra.mxu2 %v1360_v5  ;;  %2459 = vmatpush.msrb.mxu3 %v529_v45  ;;  %v161_v9 = vld [vmem:[%s9147_s1 + $0x430] sm:$0xff] }
 0x159   :  { %v1120_v32 = vld [vmem:[%s9147_s1 + $0x2228] sm:$0xff]  ;;  %2373 = vmatpush.msrb.mxu1 %v816_v10  ;;  %v929_v11 = vld [vmem:[%s9147_s1 + $0x1c30] sm:$0xff] }
 0x15a   :  { %v1344_v41 = vld [vmem:[%s9147_s1 + $0x2928] sm:$0xff]  ;;  %2390 = vmatpush.msra.mxu0 %v1120_v32  ;;  %2460 = vmatpush.msrb.mxu3 %v513_v42  ;;  %v705_v12 = vld [vmem:[%s9147_s1 + $0x1530] sm:$0xff] }
 0x15b   :  { %v800_v36 = vld [vmem:[%s9147_s1 + $0x1828] sm:$0xff]  ;;  %2412 = vmatpush.msra.mxu2 %v1344_v41  ;;  %v145_v17 = vld [vmem:[%s9147_s1 + $0x3b0] sm:$0xff] }
 0x15c   :  { %v1104_v19 = vld [vmem:[%s9147_s1 + $0x21a8] sm:$0xff]  ;;  %2374 = vmatpush.msrb.mxu1 %v800_v36  ;;  %2461 = vmatpush.msrb.mxu3 %v497_v46  ;;  %v913_v20 = vld [vmem:[%s9147_s1 + $0x1bb0] sm:$0xff] }
 0x15d   :  { %v1328_v39 = vld [vmem:[%s9147_s1 + $0x28a8] sm:$0xff]  ;;  %2391 = vmatpush.msra.mxu0 %v1104_v19  ;;  %2375 = vmatmul.f32.vlgmr.msrb.gmra.mxu1 %v5226_v34  ;;  %v241_v34 = vld [vmem:[%s9147_s1 + $0x6b0] sm:$0xff] }
 0x15e   :  { %v1584_v44 = vld [vmem:[%s9147_s1 + $0x30a8] sm:$0xff]  ;;  %2413 = vmatpush.msra.mxu2 %v1328_v39  ;;  %2462 = vmatpush.msrb.mxu3 %v481_v49  ;;  %v689_v50 = vld [vmem:[%s9147_s1 + $0x14b0] sm:$0xff] }
 0x15f   :  { %v1088_v47 = vld [vmem:[%s9147_s1 + $0x2128] sm:$0xff]  ;;  %2433 = vmatpush.msra.mxu1 %v1584_v44  ;;  %v337_v21 = vld [vmem:[%s9147_s1 + $0x9b0] sm:$0xff] }
 0x160   :  { %v1312_v48 = vld [vmem:[%s9147_s1 + $0x2828] sm:$0xff]  ;;  %2392 = vmatpush.msra.mxu0 %v1088_v47  ;;  %2463 = vmatpush.msrb.mxu3 %v465_v14  ;;  %v897_v26 = vld [vmem:[%s9147_s1 + $0x1b30] sm:$0xff] }
 0x161   :  { %v1568_v22 = vld [vmem:[%s9147_s1 + $0x3028] sm:$0xff]  ;;  %2414 = vmatpush.msra.mxu2 %v1312_v48  ;;  %v673_v29 = vld [vmem:[%s9147_s1 + $0x1430] sm:$0xff] }
 0x162   :  { %2434 = vmatpush.msra.mxu1 %v1568_v22  ;;  %2415 = vmatmul.f32.vlgmr.msra.gmra.mxu2 %v5316_v54  ;;  %v1072_v8 = vld [vmem:[%s9147_s1 + $0x20a8] sm:$0xff]  ;;  %v321_v30 = vld [vmem:[%s9147_s1 + $0x930] sm:$0xff] }
 0x163   :  { %2499 = vmatpush.msrb.mxu2 %v1041_v24  ;;  %v1056_v54 = vld [vmem:[%s9147_s1 + $0x2028] sm:$0xff]  ;;  %2393 = vmatpush.msra.mxu0 %v1072_v8  ;;  %v113_v33 = vld [vmem:[%s9147_s1 + $0x2b0] sm:$0xff] }
 0x164   :  { %2439 = vmatpush.msrb.mxu1 %v273_v0  ;;  %2464 = vmatpush.msrb.mxu3 %v449_v53  ;;  %v881_v5 = vld [vmem:[%s9147_s1 + $0x1ab0] sm:$0xff] }
 0x165   :  { %2500 = vmatpush.msrb.mxu2 %v1025_v52  ;;  %2394 = vmatpush.msra.mxu0 %v1056_v54  ;;  %v657_v10 = vld [vmem:[%s9147_s1 + $0x13b0] sm:$0xff] }
 0x166   :  { %2440 = vmatpush.msrb.mxu1 %v257_v51  ;;  %2395 = vmatmul.f32.vlgmr.msra.gmra.mxu0 %v5256_v40  ;;  %v209_v40 = vld [vmem:[%s9147_s1 + $0x5b0] sm:$0xff] }
 0x167   :  { %2501 = vmatpush.msrb.mxu2 %v1009_v18  ;;  %2479 = vmatpush.msrb.mxu0 %v785_v55  ;;  %v305_v35 = vld [vmem:[%s9147_s1 + $0x8b0] sm:$0xff] }
 0x168   :  { %2441 = vmatpush.msrb.mxu1 %v241_v34  ;;  %2465 = vmatpush.msrb.mxu3 %v433_v57  ;;  %v97_v45 = vld [vmem:[%s9147_s1 + $0x230] sm:$0xff] }
 0x169   :  { %2502 = vmatpush.msrb.mxu2 %v993_v58  ;;  %2480 = vmatpush.msrb.mxu0 %v769_v60  ;;  %v2056_v28 = vpop.f32.mrf.mxu0  ;;  %v865_v32 = vld [vmem:[%s9147_s1 + $0x1a30] sm:$0xff]  ;;  %v274_v60 = vld [vmem:[%s9147_s1 + $0x7b8] sm:$0xff] }
 0x16a   :  { %2442 = vmatpush.msrb.mxu1 %v225_v56  ;;  %2466 = vmatpush.msrb.mxu3 %v417_v27  ;;  %v2036_v16 = vpop.f32.mrf.mxu2  ;;  %v2076_v23 = vpop.f32.mrf.mxu1  ;;  %v641_v41 = vld [vmem:[%s9147_s1 + $0x1330] sm:$0xff] }
 0x16b   :  { %3910 = vmatmul.msk.f32.vlgmr.msra.gmra.mxu1 %vm1595_vm0, %v5334_v59  ;;  %2503 = vmatpush.msrb.mxu2 %v977_v61  ;;  %v177_v59 = vld [vmem:[%s9147_s1 + $0x4b0] sm:$0xff]  ;;  %v2057_v31 = vadd.f32 %v2056_v28, %v2036_v16  ;;  %v194_v28 = vld [vmem:[%s9147_s1 + $0x538] sm:$0xff] }
 0x16c   :  { %2443 = vmatpush.msrb.mxu1 %v209_v40  ;;  %2481 = vmatpush.msrb.mxu0 %v753_v62  ;;  %v289_v36 = vld [vmem:[%s9147_s1 + $0x830] sm:$0xff] }
 0x16d   :  { %2467 = vmatpush.msrb.mxu3 %v401_v63  ;;  %2504 = vmatpush.msrb.mxu2 %v961_v2  ;;  %v2077_v13 = vadd.f32 %v2076_v23, %v2057_v31  ;;  %v81_v19 = vld [vmem:[%s9147_s1 + $0x1b0] sm:$0xff]  ;;  %v258_v63 = vld [vmem:[%s9147_s1 + $0x738] sm:$0xff]  ;;  %v6194_v31 = vld [vmem:[%s9148_s0] sm:$0xff] }
 0x16e   :  { %2444 = vmatpush.msrb.mxu1 %v193_v1  ;;  %2482 = vmatpush.msrb.mxu0 %v737_v37  ;;  %v849_v39 = vld [vmem:[%s9147_s1 + $0x19b0] sm:$0xff] }
 0x16f   :  { %2468 = vmatpush.msrb.mxu3 %v385_v3  ;;  %2505 = vmatpush.msrb.mxu2 %v945_v4  ;;  %v625_v44 = vld [vmem:[%s9147_s1 + $0x12b0] sm:$0xff] }
 0x170   :  { %2445 = vmatpush.msrb.mxu1 %v177_v59  ;;  %2483 = vmatpush.msrb.mxu0 %v721_v6  ;;  %v1553_v46 = vld [vmem:[%s9147_s1 + $0x2fb0] sm:$0xff]  ;;  %v242_v59 = vld [vmem:[%s9147_s1 + $0x6b8] sm:$0xff]  ;;  %v6137_v6 = vld [vmem:[%s9148_s0 + $0x8] sm:$0xff] }
 0x171   :  { %2469 = vmatpush.msrb.mxu3 %v369_v7  ;;  %2506 = vmatpush.msrb.mxu2 %v929_v11  ;;  %v65_v48 = vld [vmem:[%s9147_s1 + $0x130] sm:$0xff]  ;;  %v226_v11 = vld [vmem:[%s9147_s1 + $0x638] sm:$0xff] }
 0x172   :  { %2446 = vmatpush.msrb.mxu1 %v161_v9  ;;  %2484 = vmatpush.msrb.mxu0 %v705_v12  ;;  %v833_v22 = vld [vmem:[%s9147_s1 + $0x1930] sm:$0xff] }
 0x173   :  { %2470 = vmatpush.msrb.mxu3 %v353_v15  ;;  %2507 = vmatpush.msrb.mxu2 %v913_v20  ;;  %v609_v0 = vld [vmem:[%s9147_s1 + $0x1230] sm:$0xff]  ;;  %v530_v20 = vld [vmem:[%s9147_s1 + $0xfb8] sm:$0xff] }
 0x174   :  { %2447 = vmatpush.msrb.mxu1 %v145_v17  ;;  %2485 = vmatpush.msrb.mxu0 %v689_v50  ;;  %v1537_v24 = vld [vmem:[%s9147_s1 + $0x2f30] sm:$0xff]  ;;  %v210_v17 = vld [vmem:[%s9147_s1 + $0x5b8] sm:$0xff] }
 0x175   :  { %2471 = vmatpush.msrb.mxu3 %v337_v21  ;;  %2508 = vmatpush.msrb.mxu2 %v897_v26  ;;  %v2116_v47 = vpop.f32.mrf.mxu2  ;;  %v49_v8 = vld [vmem:[%s9147_s1 + $0xb0] sm:$0xff]  ;;  %v6167_v50 = vld [vmem:[%s9148_s0 + $0x18] sm:$0xff] }
 0x176   :  { %2448 = vmatpush.msrb.mxu1 %v129_v25  ;;  %2486 = vmatpush.msrb.mxu0 %v673_v29  ;;  %v2096_v38 = vpop.f32.mrf.mxu3  ;;  %v817_v14 = vld [vmem:[%s9147_s1 + $0x18b0] sm:$0xff]  ;;  %v514_v29 = vld [vmem:[%s9147_s1 + $0xf38] sm:$0xff] }
 0x177   :  { %2472 = vmatpush.msrb.mxu3 %v321_v30  ;;  %2509 = vmatpush.msrb.mxu2 %v881_v5  ;;  %v2097_v42 = vadd.f32 %v2096_v38, %v2077_v13  ;;  %v593_v51 = vld [vmem:[%s9147_s1 + $0x11b0] sm:$0xff]  ;;  %v498_v5 = vld [vmem:[%s9147_s1 + $0xeb8] sm:$0xff] }
 0x178   :  { %2449 = vmatpush.msrb.mxu1 %v113_v33  ;;  %2487 = vmatpush.msrb.mxu0 %v657_v10  ;;  %v1521_v52 = vld [vmem:[%s9147_s1 + $0x2eb0] sm:$0xff]  ;;  %v2136_v54 = vpop.f32.mrf.mxu0  ;;  %v178_v33 = vld [vmem:[%s9147_s1 + $0x4b8] sm:$0xff] }
 0x179   :  { %2473 = vmatpush.msrb.mxu3 %v305_v35  ;;  %2510 = vmatpush.msrb.mxu2 %v865_v32  ;;  %v2117_v49 = vadd.f32 %v2116_v47, %v2097_v42  ;;  %v33_v53 = vld [vmem:[%s9147_s1 + $0x30] sm:$0xff]  ;;  %v162_v13 = vld [vmem:[%s9147_s1 + $0x438] sm:$0xff] }
 0x17a   :  { %2450 = vmatpush.msrb.mxu1 %v97_v45  ;;  %2488 = vmatpush.msrb.mxu0 %v641_v41  ;;  %v801_v34 = vld [vmem:[%s9147_s1 + $0x1830] sm:$0xff]  ;;  %v482_v45 = vld [vmem:[%s9147_s1 + $0xe38] sm:$0xff] }
 0x17b   :  { %2474 = vmatpush.msrb.mxu3 %v289_v36  ;;  %2511 = vmatpush.msrb.mxu2 %v849_v39  ;;  %v2137_v18 = vadd.f32 %v2136_v54, %v2117_v49  ;;  %v577_v55 = vld [vmem:[%s9147_s1 + $0x1130] sm:$0xff]  ;;  %v2156_v57 = vpop.f32.mrf.mxu1  ;;  %v146_v41 = vld [vmem:[%s9147_s1 + $0x3b8] sm:$0xff] }
 0x17c   :  { %2451 = vmatpush.msrb.mxu1 %v81_v19  ;;  %2489 = vmatpush.msrb.mxu0 %v625_v44  ;;  %v1297_v56 = vld [vmem:[%s9147_s1 + $0x27b0] sm:$0xff]  ;;  %v466_v36 = vld [vmem:[%s9147_s1 + $0xdb8] sm:$0xff] }
 0x17d   :  { %2539 = vmatpush.msra.mxu3 %v1553_v46  ;;  %2512 = vmatpush.msrb.mxu2 %v833_v22  ;;  %v1505_v58 = vld [vmem:[%s9147_s1 + $0x2e30] sm:$0xff]  ;;  %v6103_v27 = vadd.f32 %v2156_v57, %v2137_v18  ;;  %v130_v39 = vld [vmem:[%s9147_s1 + $0x338] sm:$0xff] }
 0x17e   :  { %2452 = vmatpush.msrb.mxu1 %v65_v48  ;;  %2490 = vmatpush.msrb.mxu0 %v609_v0  ;;  %v561_v40 = vld [vmem:[%s9147_s1 + $0x10b0] sm:$0xff]  ;;  %v450_v44 = vld [vmem:[%s9147_s1 + $0xd38] sm:$0xff] }
 0x17f   :  { %2540 = vmatpush.msra.mxu3 %v1537_v24  ;;  %2513 = vmatpush.msrb.mxu2 %v817_v14  ;;  %v1281_v61 = vld [vmem:[%s9147_s1 + $0x2730] sm:$0xff]  ;;  %v3841_v1 = vmax.f32 %v5873_v43, %v6103_v27  ;;  %v114_v48 = vld [vmem:[%s9147_s1 + $0x2b8] sm:$0xff]  ;;  %v787_v43 = vld [vmem:[%s9147_s1 + $0x17c0] sm:$0xff] }
 0x180   :  { %2453 = vmatpush.msrb.mxu1 %v49_v8  ;;  %2491 = vmatpush.msrb.mxu0 %v593_v51  ;;  %v1489_v62 = vld [vmem:[%s9147_s1 + $0x2db0] sm:$0xff]  ;;  %v434_v22 = vld [vmem:[%s9147_s1 + $0xcb8] sm:$0xff] }
 0x181   :  { %2541 = vmatpush.msra.mxu3 %v1521_v52  ;;  %2514 = vmatpush.msrb.mxu2 %v801_v34  ;;  %v545_v2 = vld [vmem:[%s9147_s1 + $0x1030] sm:$0xff]  ;;  %v98_v24 = vld [vmem:[%s9147_s1 + $0x238] sm:$0xff] }
 0x182   :  { %2454 = vmatpush.msrb.mxu1 %v33_v53  ;;  %2492 = vmatpush.msrb.mxu0 %v577_v55  ;;  %v1265_v37 = vld [vmem:[%s9147_s1 + $0x26b0] sm:$0xff]  ;;  %v418_v8 = vld [vmem:[%s9147_s1 + $0xc38] sm:$0xff] }
 0x183   :  { %2542 = vmatpush.msra.mxu3 %v1505_v58  ;;  %2579 = vmatpush.msra.mxu2 %v274_v60  ;;  %v1473_v3 = vld [vmem:[%s9147_s1 + $0x2d30] sm:$0xff]  ;;  %v82_v52 = vld [vmem:[%s9147_s1 + $0x1b8] sm:$0xff] }
 0x184   :  { %2519 = vmatpush.msra.mxu1 %v1297_v56  ;;  %2493 = vmatpush.msrb.mxu0 %v561_v40  ;;  %v1585_v4 = vld [vmem:[%s9147_s1 + $0x30b0] sm:$0xff]  ;;  %v402_v54 = vld [vmem:[%s9147_s1 + $0xbb8] sm:$0xff] }
 0x185   :  { %2543 = vmatpush.msra.mxu3 %v1489_v62  ;;  %2580 = vmatpush.msra.mxu2 %v258_v63  ;;  %v1249_v7 = vld [vmem:[%s9147_s1 + $0x2630] sm:$0xff]  ;;  %v1042_v53 = vld [vmem:[%s9147_s1 + $0x1fb8] sm:$0xff] }
 0x186   :  { %2520 = vmatpush.msra.mxu1 %v1281_v61  ;;  %2475 = vmatmul.f32.vlgmr.msrb.gmra.mxu3 %v6137_v6  ;;  %v1457_v9 = vld [vmem:[%s9147_s1 + $0x2cb0] sm:$0xff]  ;;  %v66_v18 = vld [vmem:[%s9147_s1 + $0x138] sm:$0xff] }
 0x187   :  { %2494 = vmatpush.msrb.mxu0 %v545_v2  ;;  %2544 = vmatpush.msra.mxu3 %v1473_v3  ;;  %v1569_v12 = vld [vmem:[%s9147_s1 + $0x3030] sm:$0xff]  ;;  %v386_v56 = vld [vmem:[%s9147_s1 + $0xb38] sm:$0xff]  ;;  %v6305_v2 = vld [vmem:[%s9148_s0 + $0x28] sm:$0xff] }
 0x188   :  { %2521 = vmatpush.msra.mxu1 %v1265_v37  ;;  %2581 = vmatpush.msra.mxu2 %v242_v59  ;;  %v1233_v15 = vld [vmem:[%s9147_s1 + $0x25b0] sm:$0xff]  ;;  %v1026_v57 = vld [vmem:[%s9147_s1 + $0x1f38] sm:$0xff] }
 0x189   :  { %2573 = vmatpush.msra.mxu0 %v1585_v4  ;;  %2545 = vmatpush.msra.mxu3 %v1457_v9  ;;  %v1441_v16 = vld [vmem:[%s9147_s1 + $0x2c30] sm:$0xff]  ;;  %v50_v40 = vld [vmem:[%s9147_s1 + $0xb8] sm:$0xff] }
 0x18a   :  { %2522 = vmatpush.msra.mxu1 %v1249_v7  ;;  %2582 = vmatpush.msra.mxu2 %v226_v11  ;;  %v6173_v21 = vld [vmem:[%s9148_s0 + $0x10] sm:$0xff]  ;;  %v370_v61 = vld [vmem:[%s9147_s1 + $0xab8] sm:$0xff] }
 0x18b   :  { %2574 = vmatpush.msra.mxu0 %v1569_v12  ;;  %2515 = vmatmul.f32.vlgmr.msrb.gmra.mxu2 %v6167_v50  ;;  %v1425_v25 = vld [vmem:[%s9147_s1 + $0x2bb0] sm:$0xff]  ;;  %v1010_v37 = vld [vmem:[%s9147_s1 + $0x1eb8] sm:$0xff] }
 0x18c   :  { %2495 = vmatmul.f32.vlgmr.msrb.gmra.mxu0 %v6173_v21  ;;  %2523 = vmatpush.msra.mxu1 %v1233_v15  ;;  %v1217_v26 = vld [vmem:[%s9147_s1 + $0x2530] sm:$0xff]  ;;  %v34_v59 = vld [vmem:[%s9147_s1 + $0x38] sm:$0xff] }
 0x18d   :  { %2546 = vmatpush.msra.mxu3 %v1441_v16  ;;  %2583 = vmatpush.msra.mxu2 %v210_v17  ;;  %v1409_v30 = vld [vmem:[%s9147_s1 + $0x2b30] sm:$0xff]  ;;  %v354_v4 = vld [vmem:[%s9147_s1 + $0xa38] sm:$0xff] }
 0x18e   :  { %2599 = vmatpush.msrb.mxu0 %v530_v20  ;;  %2455 = vmatmul.f32.vlgmr.msrb.gmra.mxu1 %v6194_v31  ;;  %v1201_v23 = vld [vmem:[%s9147_s1 + $0x24b0] sm:$0xff]  ;;  %v994_v9 = vld [vmem:[%s9147_s1 + $0x1e38] sm:$0xff] }
 0x18f   :  { %2547 = vmatpush.msra.mxu3 %v1425_v25  ;;  %2524 = vmatpush.msra.mxu1 %v1217_v26  ;;  %v1393_v10 = vld [vmem:[%s9147_s1 + $0x2ab0] sm:$0xff]  ;;  %v786_v12 = vld [vmem:[%s9147_s1 + $0x17b8] sm:$0xff]  ;;  %v6340_v25 = vld [vmem:[%s9148_s0 + $0x20] sm:$0xff] }
 0x190   :  { %2584 = vmatpush.msra.mxu2 %v194_v28  ;;  %2600 = vmatpush.msrb.mxu0 %v514_v29  ;;  %v1185_v35 = vld [vmem:[%s9147_s1 + $0x2430] sm:$0xff]  ;;  %v1298_v15 = vld [vmem:[%s9147_s1 + $0x27b8] sm:$0xff] }
 0x191   :  { %2548 = vmatpush.msra.mxu3 %v1409_v30  ;;  %2525 = vmatpush.msra.mxu1 %v1201_v23  ;;  %v1377_v32 = vld [vmem:[%s9147_s1 + $0x2a30] sm:$0xff]  ;;  %v338_v17 = vld [vmem:[%s9147_s1 + $0x9b8] sm:$0xff] }
 0x192   :  { %2585 = vmatpush.msra.mxu2 %v178_v33  ;;  %2601 = vmatpush.msrb.mxu0 %v498_v5  ;;  %v1169_v38 = vld [vmem:[%s9147_s1 + $0x23b0] sm:$0xff]  ;;  %v978_v20 = vld [vmem:[%s9147_s1 + $0x1db8] sm:$0xff] }
 0x193   :  { %2549 = vmatpush.msra.mxu3 %v1393_v10  ;;  %2526 = vmatpush.msra.mxu1 %v1185_v35  ;;  %v1361_v42 = vld [vmem:[%s9147_s1 + $0x29b0] sm:$0xff]  ;;  %v770_v26 = vld [vmem:[%s9147_s1 + $0x1738] sm:$0xff] }
 0x194   :  { %2586 = vmatpush.msra.mxu2 %v162_v13  ;;  %2602 = vmatpush.msrb.mxu0 %v482_v45  ;;  %v1153_v19 = vld [vmem:[%s9147_s1 + $0x2330] sm:$0xff]  ;;  %v1282_v28 = vld [vmem:[%s9147_s1 + $0x2738] sm:$0xff] }
 0x195   :  { %2550 = vmatpush.msra.mxu3 %v1377_v32  ;;  %2527 = vmatpush.msra.mxu1 %v1169_v38  ;;  %v1345_v46 = vld [vmem:[%s9147_s1 + $0x2930] sm:$0xff]  ;;  %v322_v29 = vld [vmem:[%s9147_s1 + $0x938] sm:$0xff] }
 0x196   :  { %2587 = vmatpush.msra.mxu2 %v146_v41  ;;  %2603 = vmatpush.msrb.mxu0 %v466_v36  ;;  %v1137_v47 = vld [vmem:[%s9147_s1 + $0x22b0] sm:$0xff]  ;;  %v962_v30 = vld [vmem:[%s9147_s1 + $0x1d38] sm:$0xff] }
 0x197   :  { %2551 = vmatpush.msra.mxu3 %v1361_v42  ;;  %2528 = vmatpush.msra.mxu1 %v1153_v19  ;;  %v1329_v49 = vld [vmem:[%s9147_s1 + $0x28b0] sm:$0xff]  ;;  %v754_v23 = vld [vmem:[%s9147_s1 + $0x16b8] sm:$0xff] }
 0x198   :  { %2588 = vmatpush.msra.mxu2 %v130_v39  ;;  %2604 = vmatpush.msrb.mxu0 %v450_v44  ;;  %v1121_v0 = vld [vmem:[%s9147_s1 + $0x2230] sm:$0xff]  ;;  %v1266_v33 = vld [vmem:[%s9147_s1 + $0x26b8] sm:$0xff] }
 0x199   :  { %2552 = vmatpush.msra.mxu3 %v1345_v46  ;;  %2529 = vmatpush.msra.mxu1 %v1137_v47  ;;  %v1313_v14 = vld [vmem:[%s9147_s1 + $0x2830] sm:$0xff]  ;;  %v2176_v55 = vpop.f32.mrf.mxu3  ;;  %v306_v5 = vld [vmem:[%s9147_s1 + $0x8b8] sm:$0xff] }
 0x19a   :  { %2589 = vmatpush.msra.mxu2 %v114_v48  ;;  %2605 = vmatpush.msrb.mxu0 %v434_v22  ;;  %v1105_v51 = vld [vmem:[%s9147_s1 + $0x21b0] sm:$0xff]  ;;  %v2196_v60 = vpop.f32.mrf.mxu1  ;;  %v738_v10 = vld [vmem:[%s9147_s1 + $0x1638] sm:$0xff] }
 0x19b   :  { %2553 = vmatpush.msra.mxu3 %v1329_v49  ;;  %2530 = vmatpush.msra.mxu1 %v1121_v0  ;;  %v1089_v34 = vld [vmem:[%s9147_s1 + $0x2130] sm:$0xff]  ;;  %v2197_v62 = vadd.f32 %v2196_v60, %v2176_v55  ;;  %v946_v35 = vld [vmem:[%s9147_s1 + $0x1cb8] sm:$0xff] }
 0x19c   :  { %2590 = vmatpush.msra.mxu2 %v98_v24  ;;  %2606 = vmatpush.msrb.mxu0 %v418_v8  ;;  %v1073_v58 = vld [vmem:[%s9147_s1 + $0x20b0] sm:$0xff]  ;;  %v2216_v63 = vpop.f32.mrf.mxu2  ;;  %v1250_v45 = vld [vmem:[%s9147_s1 + $0x2638] sm:$0xff] }
 0x19d   :  { %2554 = vmatpush.msra.mxu3 %v1313_v14  ;;  %2531 = vmatpush.msra.mxu1 %v1105_v51  ;;  %v1057_v3 = vld [vmem:[%s9147_s1 + $0x2030] sm:$0xff]  ;;  %v2217_v7 = vadd.f32 %v2216_v63, %v2197_v62  ;;  %v290_v32 = vld [vmem:[%s9147_s1 + $0x838] sm:$0xff] }
 0x19e   :  { %2591 = vmatpush.msra.mxu2 %v82_v52  ;;  %2607 = vmatpush.msrb.mxu0 %v402_v54  ;;  %v2236_v11 = vpop.f32.mrf.mxu0  ;;  %v6373_v13 = vld [vmem:[%s9148_s0 + $0x30] sm:$0xff]  ;;  %v722_v38 = vld [vmem:[%s9147_s1 + $0x15b8] sm:$0xff] }
 0x19f   :  { %2639 = vmatpush.msrb.mxu3 %v1042_v53  ;;  %2532 = vmatpush.msra.mxu1 %v1089_v34  ;;  %v6329_v16 = vadd.f32 %v2236_v11, %v2217_v7  ;;  %v930_v41 = vld [vmem:[%s9147_s1 + $0x1c38] sm:$0xff] }
 0x1a0   :  { %2592 = vmatpush.msra.mxu2 %v66_v18  ;;  %2608 = vmatpush.msrb.mxu0 %v386_v56  ;;  %v1234_v36 = vld [vmem:[%s9147_s1 + $0x25b8] sm:$0xff] }
 0x1a1   :  { %2555 = vmatmul.f32.vlgmr.msra.gmra.mxu3 %v6305_v2  ;;  %2533 = vmatpush.msra.mxu1 %v1073_v58  ;;  %v1554_v42 = vld [vmem:[%s9147_s1 + $0x2fb8] sm:$0xff] }
 0x1a2   :  { %2640 = vmatpush.msrb.mxu3 %v1026_v57  ;;  %2593 = vmatpush.msra.mxu2 %v50_v40  ;;  %v706_v19 = vld [vmem:[%s9147_s1 + $0x1538] sm:$0xff] }
 0x1a3   :  { %2609 = vmatpush.msrb.mxu0 %v370_v61  ;;  %2534 = vmatpush.msra.mxu1 %v1057_v3  ;;  %v914_v39 = vld [vmem:[%s9147_s1 + $0x1bb8] sm:$0xff] }
 0x1a4   :  { %2641 = vmatpush.msrb.mxu3 %v1010_v37  ;;  %2594 = vmatpush.msra.mxu2 %v34_v59  ;;  %v1218_v44 = vld [vmem:[%s9147_s1 + $0x2538] sm:$0xff] }
 0x1a5   :  { %2610 = vmatpush.msrb.mxu0 %v354_v4  ;;  %2535 = vmatmul.f32.vlgmr.msra.gmra.mxu1 %v6340_v25  ;;  %v1538_v46 = vld [vmem:[%s9147_s1 + $0x2f38] sm:$0xff] }
 0x1a6   :  { %2642 = vmatpush.msrb.mxu3 %v994_v9  ;;  %2619 = vmatpush.msrb.mxu1 %v786_v12  ;;  %v690_v47 = vld [vmem:[%s9147_s1 + $0x14b8] sm:$0xff]  ;;  %v275_v12 = vld [vmem:[%s9147_s1 + $0x7c0] sm:$0xff] }
 0x1a7   :  { %2659 = vmatpush.msrb.mxu2 %v1298_v15  ;;  %2611 = vmatpush.msrb.mxu0 %v338_v17  ;;  %v898_v48 = vld [vmem:[%s9147_s1 + $0x1b38] sm:$0xff] }
 0x1a8   :  { %2643 = vmatpush.msrb.mxu3 %v978_v20  ;;  %2620 = vmatpush.msrb.mxu1 %v770_v26  ;;  %v1202_v22 = vld [vmem:[%s9147_s1 + $0x24b8] sm:$0xff]  ;;  %v259_v26 = vld [vmem:[%s9147_s1 + $0x740] sm:$0xff] }
 0x1a9   :  { %2660 = vmatpush.msrb.mxu2 %v1282_v28  ;;  %2612 = vmatpush.msrb.mxu0 %v322_v29  ;;  %v1522_v49 = vld [vmem:[%s9147_s1 + $0x2eb8] sm:$0xff] }
 0x1aa   :  { %2644 = vmatpush.msrb.mxu3 %v962_v30  ;;  %3911 = vmatmul.msk.f32.vlgmr.msra.gmra.mxu0 %vm1595_vm0, %v6373_v13  ;;  %v674_v0 = vld [vmem:[%s9147_s1 + $0x1438] sm:$0xff] }
 0x1ab   :  { %2621 = vmatpush.msrb.mxu1 %v754_v23  ;;  %2661 = vmatpush.msrb.mxu2 %v1266_v33  ;;  %v882_v24 = vld [vmem:[%s9147_s1 + $0x1ab8] sm:$0xff] }
 0x1ac   :  { %2613 = vmatpush.msrb.mxu0 %v306_v5  ;;  %2645 = vmatpush.msrb.mxu3 %v946_v35  ;;  %v1186_v8 = vld [vmem:[%s9147_s1 + $0x2438] sm:$0xff] }
 0x1ad   :  { %2622 = vmatpush.msrb.mxu1 %v738_v10  ;;  %2662 = vmatpush.msrb.mxu2 %v1250_v45  ;;  %v1506_v14 = vld [vmem:[%s9147_s1 + $0x2e38] sm:$0xff]  ;;  %v243_v10 = vld [vmem:[%s9147_s1 + $0x6c0] sm:$0xff] }
 0x1ae   :  { %2614 = vmatpush.msrb.mxu0 %v290_v32  ;;  %2646 = vmatpush.msrb.mxu3 %v930_v41  ;;  %v658_v51 = vld [vmem:[%s9147_s1 + $0x13b8] sm:$0xff] }
 0x1af   :  { %2623 = vmatpush.msrb.mxu1 %v722_v38  ;;  %2663 = vmatpush.msrb.mxu2 %v1234_v36  ;;  %v866_v52 = vld [vmem:[%s9147_s1 + $0x1a38] sm:$0xff]  ;;  %v227_v36 = vld [vmem:[%s9147_s1 + $0x640] sm:$0xff] }
 0x1b0   :  { %2679 = vmatpush.msra.mxu0 %v1554_v42  ;;  %2647 = vmatpush.msrb.mxu3 %v914_v39  ;;  %v1170_v54 = vld [vmem:[%s9147_s1 + $0x23b8] sm:$0xff] }
 0x1b1   :  { %2624 = vmatpush.msrb.mxu1 %v706_v19  ;;  %2664 = vmatpush.msrb.mxu2 %v1218_v44  ;;  %v1490_v53 = vld [vmem:[%s9147_s1 + $0x2db8] sm:$0xff]  ;;  %v771_v19 = vld [vmem:[%s9147_s1 + $0x1740] sm:$0xff] }
 0x1b2   :  { %2680 = vmatpush.msra.mxu0 %v1538_v46  ;;  %2648 = vmatpush.msrb.mxu3 %v898_v48  ;;  %v642_v34 = vld [vmem:[%s9147_s1 + $0x1338] sm:$0xff]  ;;  %v531_v44 = vld [vmem:[%s9147_s1 + $0xfc0] sm:$0xff] }
 0x1b3   :  { %2625 = vmatpush.msrb.mxu1 %v690_v47  ;;  %2665 = vmatpush.msrb.mxu2 %v1202_v22  ;;  %v850_v18 = vld [vmem:[%s9147_s1 + $0x19b8] sm:$0xff]  ;;  %v195_v46 = vld [vmem:[%s9147_s1 + $0x540] sm:$0xff] }
 0x1b4   :  { %2681 = vmatpush.msra.mxu0 %v1522_v49  ;;  %2649 = vmatpush.msrb.mxu3 %v882_v24  ;;  %v1154_v55 = vld [vmem:[%s9147_s1 + $0x2338] sm:$0xff]  ;;  %v755_v47 = vld [vmem:[%s9147_s1 + $0x16c0] sm:$0xff] }
 0x1b5   :  { %2626 = vmatpush.msrb.mxu1 %v674_v0  ;;  %2666 = vmatpush.msrb.mxu2 %v1186_v8  ;;  %v1474_v56 = vld [vmem:[%s9147_s1 + $0x2d38] sm:$0xff]  ;;  %v515_v22 = vld [vmem:[%s9147_s1 + $0xf40] sm:$0xff] }
 0x1b6   :  { %2682 = vmatpush.msra.mxu0 %v1506_v14  ;;  %2650 = vmatpush.msrb.mxu3 %v866_v52  ;;  %v626_v57 = vld [vmem:[%s9147_s1 + $0x12b8] sm:$0xff]  ;;  %v2256_v3 = vpop.f32.mrf.mxu3  ;;  %v179_v49 = vld [vmem:[%s9147_s1 + $0x4c0] sm:$0xff] }
 0x1b7   :  { %2627 = vmatpush.msrb.mxu1 %v658_v51  ;;  %2667 = vmatpush.msrb.mxu2 %v1170_v54  ;;  %v834_v58 = vld [vmem:[%s9147_s1 + $0x1938] sm:$0xff]  ;;  %v2257_v4 = vadd.f32 %v2256_v3, %v6329_v16  ;;  %v739_v0 = vld [vmem:[%s9147_s1 + $0x1640] sm:$0xff] }
 0x1b8   :  { %2683 = vmatpush.msra.mxu0 %v1490_v53  ;;  %2651 = vmatpush.msrb.mxu3 %v850_v18  ;;  %v1138_v60 = vld [vmem:[%s9147_s1 + $0x22b8] sm:$0xff]  ;;  %v499_v8 = vld [vmem:[%s9147_s1 + $0xec0] sm:$0xff] }
 0x1b9   :  { %2628 = vmatpush.msrb.mxu1 %v642_v34  ;;  %v1458_v40 = vld [vmem:[%s9147_s1 + $0x2cb8] sm:$0xff]  ;;  %2668 = vmatpush.msrb.mxu2 %v1154_v55  ;;  %v163_v14 = vld [vmem:[%s9147_s1 + $0x440] sm:$0xff] }
 0x1ba   :  { %2684 = vmatpush.msra.mxu0 %v1474_v56  ;;  %v610_v61 = vld [vmem:[%s9147_s1 + $0x1238] sm:$0xff]  ;;  %2652 = vmatpush.msrb.mxu3 %v834_v58  ;;  %v2276_v17 = vpop.f32.mrf.mxu1  ;;  %v723_v51 = vld [vmem:[%s9147_s1 + $0x15c0] sm:$0xff] }
 0x1bb   :  { %v818_v62 = vld [vmem:[%s9147_s1 + $0x18b8] sm:$0xff]  ;;  %2629 = vmatpush.msrb.mxu1 %v626_v57  ;;  %2669 = vmatpush.msrb.mxu2 %v1138_v60  ;;  %v2277_v28 = vadd.f32 %v2276_v17, %v2257_v4  ;;  %v2296_v29 = vpop.f32.mrf.mxu2  ;;  %v483_v52 = vld [vmem:[%s9147_s1 + $0xe40] sm:$0xff] }
 0x1bc   :  { %v1122_v63 = vld [vmem:[%s9147_s1 + $0x2238] sm:$0xff]  ;;  %2685 = vmatpush.msra.mxu0 %v1458_v40  ;;  %2653 = vmatpush.msrb.mxu3 %v818_v62  ;;  %v147_v54 = vld [vmem:[%s9147_s1 + $0x3c0] sm:$0xff] }
 0x1bd   :  { %v1442_v37 = vld [vmem:[%s9147_s1 + $0x2c38] sm:$0xff]  ;;  %2630 = vmatpush.msrb.mxu1 %v610_v61  ;;  %2670 = vmatpush.msrb.mxu2 %v1122_v63  ;;  %v2297_v5 = vadd.f32 %v2296_v29, %v2277_v28  ;;  %v707_v53 = vld [vmem:[%s9147_s1 + $0x1540] sm:$0xff] }
 0x1be   :  { %v594_v59 = vld [vmem:[%s9147_s1 + $0x11b8] sm:$0xff]  ;;  %2686 = vmatpush.msra.mxu0 %v1442_v37  ;;  %2595 = vmatmul.f32.vlgmr.msra.gmra.mxu2 %v6194_v31  ;;  %v1043_v34 = vld [vmem:[%s9147_s1 + $0x1fc0] sm:$0xff] }
 0x1bf   :  { %v802_v7 = vld [vmem:[%s9147_s1 + $0x1838] sm:$0xff]  ;;  %2631 = vmatpush.msrb.mxu1 %v594_v59  ;;  %v6532_v38 = vmax.f32 %v3841_v1, %v2297_v5  ;;  %2615 = vmatmul.f32.vlgmr.msrb.gmra.mxu0 %v6137_v6  ;;  %v211_v1 = vld [vmem:[%s9147_s1 + $0x5c0] sm:$0xff] }
 0x1c0   :  { %v1106_v9 = vld [vmem:[%s9147_s1 + $0x21b8] sm:$0xff]  ;;  %2654 = vmatpush.msrb.mxu3 %v802_v7  ;;  %v467_v18 = vld [vmem:[%s9147_s1 + $0xdc0] sm:$0xff] }
 0x1c1   :  { %v1426_v11 = vld [vmem:[%s9147_s1 + $0x2bb8] sm:$0xff]  ;;  %2671 = vmatpush.msrb.mxu2 %v1106_v9  ;;  %2655 = vmatmul.f32.vlgmr.msrb.gmra.mxu3 %v6167_v50  ;;  %v131_v55 = vld [vmem:[%s9147_s1 + $0x340] sm:$0xff] }
 0x1c2   :  { %v578_v15 = vld [vmem:[%s9147_s1 + $0x1138] sm:$0xff]  ;;  %2687 = vmatpush.msra.mxu0 %v1426_v11  ;;  %2719 = vmatpush.msra.mxu3 %v275_v12  ;;  %v691_v56 = vld [vmem:[%s9147_s1 + $0x14c0] sm:$0xff] }
 0x1c3   :  { %v1090_v16 = vld [vmem:[%s9147_s1 + $0x2138] sm:$0xff]  ;;  %2632 = vmatpush.msrb.mxu1 %v578_v15  ;;  %v1027_v57 = vld [vmem:[%s9147_s1 + $0x1f40] sm:$0xff] }
 0x1c4   :  { %v1410_v20 = vld [vmem:[%s9147_s1 + $0x2b38] sm:$0xff]  ;;  %2672 = vmatpush.msrb.mxu2 %v1090_v16  ;;  %2720 = vmatpush.msra.mxu3 %v259_v26  ;;  %v451_v58 = vld [vmem:[%s9147_s1 + $0xd40] sm:$0xff] }
 0x1c5   :  { %v562_v30 = vld [vmem:[%s9147_s1 + $0x10b8] sm:$0xff]  ;;  %2688 = vmatpush.msra.mxu0 %v1410_v20  ;;  %v115_v60 = vld [vmem:[%s9147_s1 + $0x2c0] sm:$0xff] }
 0x1c6   :  { %v1074_v23 = vld [vmem:[%s9147_s1 + $0x20b8] sm:$0xff]  ;;  %2633 = vmatpush.msrb.mxu1 %v562_v30  ;;  %2721 = vmatpush.msra.mxu3 %v243_v10  ;;  %v675_v40 = vld [vmem:[%s9147_s1 + $0x1440] sm:$0xff] }
 0x1c7   :  { %v1394_v33 = vld [vmem:[%s9147_s1 + $0x2ab8] sm:$0xff]  ;;  %2673 = vmatpush.msrb.mxu2 %v1074_v23  ;;  %v1011_v61 = vld [vmem:[%s9147_s1 + $0x1ec0] sm:$0xff] }
 0x1c8   :  { %v546_v35 = vld [vmem:[%s9147_s1 + $0x1038] sm:$0xff]  ;;  %2689 = vmatpush.msra.mxu0 %v1394_v33  ;;  %2722 = vmatpush.msra.mxu3 %v227_v36  ;;  %v435_v62 = vld [vmem:[%s9147_s1 + $0xcc0] sm:$0xff] }
 0x1c9   :  { %v1058_v45 = vld [vmem:[%s9147_s1 + $0x2038] sm:$0xff]  ;;  %2634 = vmatpush.msrb.mxu1 %v546_v35  ;;  %v99_v63 = vld [vmem:[%s9147_s1 + $0x240] sm:$0xff] }
 0x1ca   :  { %v1378_v32 = vld [vmem:[%s9147_s1 + $0x2a38] sm:$0xff]  ;;  %2674 = vmatpush.msrb.mxu2 %v1058_v45  ;;  %2635 = vmatmul.f32.vlgmr.msrb.gmra.mxu1 %v6173_v21  ;;  %v659_v37 = vld [vmem:[%s9147_s1 + $0x13c0] sm:$0xff] }
 0x1cb   :  { %v1586_v41 = vld [vmem:[%s9147_s1 + $0x30b8] sm:$0xff]  ;;  %2690 = vmatpush.msra.mxu0 %v1378_v32  ;;  %2675 = vmatmul.f32.vlgmr.msrb.gmra.mxu2 %v6340_v25  ;;  %v995_v3 = vld [vmem:[%s9147_s1 + $0x1e40] sm:$0xff] }
 0x1cc   :  { %v1362_v27 = vld [vmem:[%s9147_s1 + $0x29b8] sm:$0xff]  ;;  %2713 = vmatpush.msra.mxu1 %v1586_v41  ;;  %2759 = vmatpush.msra.mxu2 %v787_v43  ;;  %v419_v59 = vld [vmem:[%s9147_s1 + $0xc40] sm:$0xff] }
 0x1cd   :  { %v1570_v42 = vld [vmem:[%s9147_s1 + $0x3038] sm:$0xff]  ;;  %2691 = vmatpush.msra.mxu0 %v1362_v27  ;;  %2723 = vmatpush.msra.mxu3 %v211_v1  ;;  %v83_v4 = vld [vmem:[%s9147_s1 + $0x1c0] sm:$0xff] }
 0x1ce   :  { %v1346_v39 = vld [vmem:[%s9147_s1 + $0x2938] sm:$0xff]  ;;  %2714 = vmatpush.msra.mxu1 %v1570_v42  ;;  %2760 = vmatpush.msra.mxu2 %v771_v19  ;;  %v643_v7 = vld [vmem:[%s9147_s1 + $0x1340] sm:$0xff] }
 0x1cf   :  { %v1330_v48 = vld [vmem:[%s9147_s1 + $0x28b8] sm:$0xff]  ;;  %2692 = vmatpush.msra.mxu0 %v1346_v39  ;;  %2724 = vmatpush.msra.mxu3 %v195_v46  ;;  %v979_v9 = vld [vmem:[%s9147_s1 + $0x1dc0] sm:$0xff]  ;;  %v2316_v11 = vpop.f32.mrf.mxu0 }
 0x1d0   :  { %2739 = vmatpush.msrb.mxu1 %v531_v44  ;;  %2761 = vmatpush.msra.mxu2 %v755_v47  ;;  %v1314_v24 = vld [vmem:[%s9147_s1 + $0x2838] sm:$0xff]  ;;  %v403_v12 = vld [vmem:[%s9147_s1 + $0xbc0] sm:$0xff] }
 0x1d1   :  { %2693 = vmatpush.msra.mxu0 %v1330_v48  ;;  %2725 = vmatpush.msra.mxu3 %v179_v49  ;;  %v67_v15 = vld [vmem:[%s9147_s1 + $0x140] sm:$0xff] }
 0x1d2   :  { %2740 = vmatpush.msrb.mxu1 %v515_v22  ;;  %2762 = vmatpush.msra.mxu2 %v739_v0  ;;  %v627_v17 = vld [vmem:[%s9147_s1 + $0x12c0] sm:$0xff] }
 0x1d3   :  { %2694 = vmatpush.msra.mxu0 %v1314_v24  ;;  %2726 = vmatpush.msra.mxu3 %v163_v14  ;;  %v963_v20 = vld [vmem:[%s9147_s1 + $0x1d40] sm:$0xff] }
 0x1d4   :  { %2741 = vmatpush.msrb.mxu1 %v499_v8  ;;  %2695 = vmatmul.f32.vlgmr.msra.gmra.mxu0 %v6305_v2  ;;  %v2336_v16 = vpop.f32.mrf.mxu2  ;;  %v387_v28 = vld [vmem:[%s9147_s1 + $0xb40] sm:$0xff] }
 0x1d5   :  { %2763 = vmatpush.msra.mxu2 %v723_v51  ;;  %3912 = vmatmul.msk.f32.vlgmr.msra.gmra.mxu1 %vm1595_vm0, %v6373_v13  ;;  %v2337_v26 = vadd.f32 %v2336_v16, %v2316_v11  ;;  %v51_v29 = vld [vmem:[%s9147_s1 + $0xc0] sm:$0xff] }
 0x1d6   :  { %2742 = vmatpush.msrb.mxu1 %v483_v52  ;;  %2727 = vmatpush.msra.mxu3 %v147_v54  ;;  %v611_v23 = vld [vmem:[%s9147_s1 + $0x1240] sm:$0xff] }
 0x1d7   :  { %2764 = vmatpush.msra.mxu2 %v707_v53  ;;  %2779 = vmatpush.msrb.mxu0 %v1043_v34  ;;  %v947_v33 = vld [vmem:[%s9147_s1 + $0x1cc0] sm:$0xff] }
 0x1d8   :  { %2743 = vmatpush.msrb.mxu1 %v467_v18  ;;  %2728 = vmatpush.msra.mxu3 %v131_v55  ;;  %v371_v10 = vld [vmem:[%s9147_s1 + $0xac0] sm:$0xff] }
 0x1d9   :  { %2765 = vmatpush.msra.mxu2 %v691_v56  ;;  %2780 = vmatpush.msrb.mxu0 %v1027_v57  ;;  %v35_v35 = vld [vmem:[%s9147_s1 + $0x40] sm:$0xff] }
 0x1da   :  { %2744 = vmatpush.msrb.mxu1 %v451_v58  ;;  %2729 = vmatpush.msra.mxu3 %v115_v60  ;;  %v2356_v30 = vpop.f32.mrf.mxu3  ;;  %v2376_v45 = vpop.f32.mrf.mxu1  ;;  %v595_v32 = vld [vmem:[%s9147_s1 + $0x11c0] sm:$0xff] }
 0x1db   :  { %2766 = vmatpush.msra.mxu2 %v675_v40  ;;  %2781 = vmatpush.msrb.mxu0 %v1011_v61  ;;  %v2357_v5 = vadd.f32 %v2356_v30, %v2337_v26  ;;  %v931_v41 = vld [vmem:[%s9147_s1 + $0x1c40] sm:$0xff]  ;;  %v532_v61 = vld [vmem:[%s9147_s1 + $0xfc8] sm:$0xff] }
 0x1dc   :  { %2745 = vmatpush.msrb.mxu1 %v435_v62  ;;  %2730 = vmatpush.msra.mxu3 %v99_v63  ;;  %v355_v43 = vld [vmem:[%s9147_s1 + $0xa40] sm:$0xff]  ;;  %v260_v26 = vld [vmem:[%s9147_s1 + $0x748] sm:$0xff] }
 0x1dd   :  { %2767 = vmatpush.msra.mxu2 %v659_v37  ;;  %2782 = vmatpush.msrb.mxu0 %v995_v3  ;;  %v2377_v36 = vadd.f32 %v2376_v45, %v2357_v5  ;;  %v1299_v27 = vld [vmem:[%s9147_s1 + $0x27c0] sm:$0xff]  ;;  %v516_v37 = vld [vmem:[%s9147_s1 + $0xf48] sm:$0xff] }
 0x1de   :  { %2746 = vmatpush.msrb.mxu1 %v419_v59  ;;  %2731 = vmatpush.msra.mxu3 %v83_v4  ;;  %v579_v1 = vld [vmem:[%s9147_s1 + $0x1140] sm:$0xff]  ;;  %v500_v4 = vld [vmem:[%s9147_s1 + $0xec8] sm:$0xff] }
 0x1df   :  { %2768 = vmatpush.msra.mxu2 %v643_v7  ;;  %2783 = vmatpush.msrb.mxu0 %v979_v9  ;;  %v915_v42 = vld [vmem:[%s9147_s1 + $0x1bc0] sm:$0xff]  ;;  %v436_v5 = vld [vmem:[%s9147_s1 + $0xcc8] sm:$0xff] }
 0x1e0   :  { %2747 = vmatpush.msrb.mxu1 %v403_v12  ;;  %2732 = vmatpush.msra.mxu3 %v67_v15  ;;  %v339_v19 = vld [vmem:[%s9147_s1 + $0x9c0] sm:$0xff]  ;;  %v484_v12 = vld [vmem:[%s9147_s1 + $0xe48] sm:$0xff] }
 0x1e1   :  { %2769 = vmatpush.msra.mxu2 %v627_v17  ;;  %2784 = vmatpush.msrb.mxu0 %v963_v20  ;;  %v1283_v39 = vld [vmem:[%s9147_s1 + $0x2740] sm:$0xff]  ;;  %v468_v17 = vld [vmem:[%s9147_s1 + $0xdc8] sm:$0xff] }
 0x1e2   :  { %2748 = vmatpush.msrb.mxu1 %v387_v28  ;;  %2733 = vmatpush.msra.mxu3 %v51_v29  ;;  %v563_v44 = vld [vmem:[%s9147_s1 + $0x10c0] sm:$0xff]  ;;  %v452_v29 = vld [vmem:[%s9147_s1 + $0xd48] sm:$0xff] }
 0x1e3   :  { %2770 = vmatpush.msra.mxu2 %v611_v23  ;;  %2785 = vmatpush.msrb.mxu0 %v947_v33  ;;  %v899_v46 = vld [vmem:[%s9147_s1 + $0x1b40] sm:$0xff]  ;;  %v2396_v47 = vpop.f32.mrf.mxu0  ;;  %v244_v23 = vld [vmem:[%s9147_s1 + $0x6c8] sm:$0xff] }
 0x1e4   :  { %2749 = vmatpush.msrb.mxu1 %v371_v10  ;;  %2734 = vmatpush.msra.mxu3 %v35_v35  ;;  %v323_v22 = vld [vmem:[%s9147_s1 + $0x940] sm:$0xff]  ;;  %v2397_v0 = vadd.f32 %v2396_v47, %v2377_v36  ;;  %v228_v10 = vld [vmem:[%s9147_s1 + $0x648] sm:$0xff] }
 0x1e5   :  { %2771 = vmatpush.msra.mxu2 %v595_v32  ;;  %2786 = vmatpush.msrb.mxu0 %v931_v41  ;;  %v2416_v48 = vpop.f32.mrf.mxu2  ;;  %v1267_v49 = vld [vmem:[%s9147_s1 + $0x26c0] sm:$0xff]  ;;  %v420_v45 = vld [vmem:[%s9147_s1 + $0xc48] sm:$0xff] }
 0x1e6   :  { %2750 = vmatpush.msrb.mxu1 %v355_v43  ;;  %2799 = vmatpush.msrb.mxu3 %v1299_v27  ;;  %v547_v24 = vld [vmem:[%s9147_s1 + $0x1040] sm:$0xff]  ;;  %v2417_v52 = vadd.f32 %v2416_v48, %v2397_v0  ;;  %v212_v41 = vld [vmem:[%s9147_s1 + $0x5c8] sm:$0xff] }
 0x1e7   :  { %2772 = vmatpush.msra.mxu2 %v579_v1  ;;  %2787 = vmatpush.msrb.mxu0 %v915_v42  ;;  %v883_v8 = vld [vmem:[%s9147_s1 + $0x1ac0] sm:$0xff]  ;;  %v404_v43 = vld [vmem:[%s9147_s1 + $0xbc8] sm:$0xff] }
 0x1e8   :  { %2751 = vmatpush.msrb.mxu1 %v339_v19  ;;  %2800 = vmatpush.msrb.mxu3 %v1283_v39  ;;  %v307_v14 = vld [vmem:[%s9147_s1 + $0x8c0] sm:$0xff]  ;;  %v2436_v53 = vpop.f32.mrf.mxu1  ;;  %v196_v1 = vld [vmem:[%s9147_s1 + $0x548] sm:$0xff] }
 0x1e9   :  { %2773 = vmatpush.msra.mxu2 %v563_v44  ;;  %2788 = vmatpush.msrb.mxu0 %v899_v46  ;;  %v1251_v51 = vld [vmem:[%s9147_s1 + $0x2640] sm:$0xff]  ;;  %v6745_v55 = vadd.f32 %v2436_v53, %v2417_v52  ;;  %v388_v19 = vld [vmem:[%s9147_s1 + $0xb48] sm:$0xff] }
 0x1ea   :  { %2752 = vmatpush.msrb.mxu1 %v323_v22  ;;  %2801 = vmatpush.msrb.mxu3 %v1267_v49  ;;  %v1587_v54 = vld [vmem:[%s9147_s1 + $0x30c0] sm:$0xff]  ;;  %v180_v44 = vld [vmem:[%s9147_s1 + $0x4c8] sm:$0xff] }
 0x1eb   :  { %2774 = vmatpush.msra.mxu2 %v547_v24  ;;  %2789 = vmatpush.msrb.mxu0 %v883_v8  ;;  %v867_v34 = vld [vmem:[%s9147_s1 + $0x1a40] sm:$0xff]  ;;  %v3843_v60 = vmax.f32 %v6532_v38, %v6745_v55  ;;  %v372_v47 = vld [vmem:[%s9147_s1 + $0xac8] sm:$0xff]  ;;  %v7158_v55 = vld [vmem:[%s9148_s0 + $0x10] sm:$0xff] }
 0x1ec   :  { %v291_v18 = vld [vmem:[%s9147_s1 + $0x840] sm:$0xff]  ;;  %2753 = vmatpush.msrb.mxu1 %v307_v14  ;;  %2802 = vmatpush.msrb.mxu3 %v1251_v51  ;;  %v164_v22 = vld [vmem:[%s9147_s1 + $0x448] sm:$0xff] }
 0x1ed   :  { %v1235_v56 = vld [vmem:[%s9147_s1 + $0x25c0] sm:$0xff]  ;;  %2853 = vmatpush.msrb.mxu2 %v1587_v54  ;;  %2735 = vmatmul.f32.vlgmr.msra.gmra.mxu3 %v6194_v31  ;;  %v356_v0 = vld [vmem:[%s9147_s1 + $0xa48] sm:$0xff] }
 0x1ee   :  { %v1571_v57 = vld [vmem:[%s9147_s1 + $0x3040] sm:$0xff]  ;;  %2790 = vmatpush.msrb.mxu0 %v867_v34  ;;  %2754 = vmatpush.msrb.mxu1 %v291_v18  ;;  %v788_v24 = vld [vmem:[%s9147_s1 + $0x17c8] sm:$0xff] }
 0x1ef   :  { %v851_v58 = vld [vmem:[%s9147_s1 + $0x19c0] sm:$0xff]  ;;  %2803 = vmatpush.msrb.mxu3 %v1235_v56  ;;  %2854 = vmatpush.msrb.mxu2 %v1571_v57  ;;  %v148_v8 = vld [vmem:[%s9147_s1 + $0x3c8] sm:$0xff] }
 0x1f0   :  { %v1555_v40 = vld [vmem:[%s9147_s1 + $0x2fc0] sm:$0xff]  ;;  %2775 = vmatmul.f32.vlgmr.msra.gmra.mxu2 %v6173_v21  ;;  %2791 = vmatpush.msrb.mxu0 %v851_v58  ;;  %v340_v51 = vld [vmem:[%s9147_s1 + $0x9c8] sm:$0xff] }
 0x1f1   :  { %v1219_v31 = vld [vmem:[%s9147_s1 + $0x2540] sm:$0xff]  ;;  %2819 = vmatpush.msra.mxu1 %v1555_v40  ;;  %2879 = vmatpush.msra.mxu2 %v532_v61  ;;  %v772_v52 = vld [vmem:[%s9147_s1 + $0x1748] sm:$0xff] }
 0x1f2   :  { %v835_v62 = vld [vmem:[%s9147_s1 + $0x1940] sm:$0xff]  ;;  %2804 = vmatpush.msrb.mxu3 %v1219_v31  ;;  %2755 = vmatmul.f32.vlgmr.msrb.gmra.mxu1 %v6137_v6  ;;  %v276_v6 = vld [vmem:[%s9147_s1 + $0x7c8] sm:$0xff] }
 0x1f3   :  { %v1539_v63 = vld [vmem:[%s9147_s1 + $0x2f40] sm:$0xff]  ;;  %2792 = vmatpush.msrb.mxu0 %v835_v62  ;;  %2880 = vmatpush.msra.mxu2 %v516_v37  ;;  %v132_v54 = vld [vmem:[%s9147_s1 + $0x348] sm:$0xff] }
 0x1f4   :  { %v1203_v3 = vld [vmem:[%s9147_s1 + $0x24c0] sm:$0xff]  ;;  %2820 = vmatpush.msra.mxu1 %v1539_v63  ;;  %v756_v34 = vld [vmem:[%s9147_s1 + $0x16c8] sm:$0xff] }
 0x1f5   :  { %v819_v21 = vld [vmem:[%s9147_s1 + $0x18c0] sm:$0xff]  ;;  %2805 = vmatpush.msrb.mxu3 %v1203_v3  ;;  %2881 = vmatpush.msra.mxu2 %v500_v4  ;;  %v116_v18 = vld [vmem:[%s9147_s1 + $0x2c8] sm:$0xff] }
 0x1f6   :  { %v1523_v59 = vld [vmem:[%s9147_s1 + $0x2ec0] sm:$0xff]  ;;  %2793 = vmatpush.msrb.mxu0 %v819_v21  ;;  %v308_v57 = vld [vmem:[%s9147_s1 + $0x8c8] sm:$0xff] }
 0x1f7   :  { %v1187_v7 = vld [vmem:[%s9147_s1 + $0x2440] sm:$0xff]  ;;  %2821 = vmatpush.msra.mxu1 %v1523_v59  ;;  %2882 = vmatpush.msra.mxu2 %v484_v12  ;;  %v740_v40 = vld [vmem:[%s9147_s1 + $0x1648] sm:$0xff] }
 0x1f8   :  { %v803_v9 = vld [vmem:[%s9147_s1 + $0x1840] sm:$0xff]  ;;  %2806 = vmatpush.msrb.mxu3 %v1187_v7  ;;  %v100_v61 = vld [vmem:[%s9147_s1 + $0x248] sm:$0xff]  ;;  %3913 = vmatmul.msk.f32.vlgmr.msrb.gmra.mxu2 %vm1595_vm0, %v6373_v13 }
 0x1f9   :  { %v1507_v11 = vld [vmem:[%s9147_s1 + $0x2e40] sm:$0xff]  ;;  %2794 = vmatpush.msrb.mxu0 %v803_v9  ;;  %2883 = vmatpush.msra.mxu2 %v468_v17  ;;  %v292_v62 = vld [vmem:[%s9147_s1 + $0x848] sm:$0xff] }
 0x1fa   :  { %v1171_v15 = vld [vmem:[%s9147_s1 + $0x23c0] sm:$0xff]  ;;  %2822 = vmatpush.msra.mxu1 %v1507_v11  ;;  %2795 = vmatmul.f32.vlgmr.msrb.gmra.mxu0 %v6167_v50  ;;  %v724_v3 = vld [vmem:[%s9147_s1 + $0x15c8] sm:$0xff] }
 0x1fb   :  { %v1491_v16 = vld [vmem:[%s9147_s1 + $0x2dc0] sm:$0xff]  ;;  %2807 = vmatpush.msrb.mxu3 %v1171_v15  ;;  %2859 = vmatpush.msra.mxu0 %v276_v6  ;;  %v84_v13 = vld [vmem:[%s9147_s1 + $0x1c8] sm:$0xff] }
 0x1fc   :  { %v1155_v20 = vld [vmem:[%s9147_s1 + $0x2340] sm:$0xff]  ;;  %2823 = vmatpush.msra.mxu1 %v1491_v16  ;;  %2884 = vmatpush.msra.mxu2 %v452_v29  ;;  %v1044_v59 = vld [vmem:[%s9147_s1 + $0x1fc8] sm:$0xff] }
 0x1fd   :  { %v1475_v28 = vld [vmem:[%s9147_s1 + $0x2d40] sm:$0xff]  ;;  %2808 = vmatpush.msrb.mxu3 %v1155_v20  ;;  %2860 = vmatpush.msra.mxu0 %v260_v26  ;;  %v1556_v4 = vld [vmem:[%s9147_s1 + $0x2fc8] sm:$0xff] }
 0x1fe   :  { %v1139_v30 = vld [vmem:[%s9147_s1 + $0x22c0] sm:$0xff]  ;;  %2824 = vmatpush.msra.mxu1 %v1475_v28  ;;  %2885 = vmatpush.msra.mxu2 %v436_v5  ;;  %v708_v7 = vld [vmem:[%s9147_s1 + $0x1548] sm:$0xff] }
 0x1ff   :  { %v1459_v33 = vld [vmem:[%s9147_s1 + $0x2cc0] sm:$0xff]  ;;  %2809 = vmatpush.msrb.mxu3 %v1139_v30  ;;  %2861 = vmatpush.msra.mxu0 %v244_v23  ;;  %v68_v12 = vld [vmem:[%s9147_s1 + $0x148] sm:$0xff] }
 0x200   :  { %v1123_v50 = vld [vmem:[%s9147_s1 + $0x2240] sm:$0xff]  ;;  %2825 = vmatpush.msra.mxu1 %v1459_v33  ;;  %2886 = vmatpush.msra.mxu2 %v420_v45  ;;  %v1028_v15 = vld [vmem:[%s9147_s1 + $0x1f48] sm:$0xff] }
 0x201   :  { %v1443_v35 = vld [vmem:[%s9147_s1 + $0x2c40] sm:$0xff]  ;;  %2810 = vmatpush.msrb.mxu3 %v1123_v50  ;;  %2862 = vmatpush.msra.mxu0 %v228_v10  ;;  %v1540_v6 = vld [vmem:[%s9147_s1 + $0x2f48] sm:$0xff] }
 0x202   :  { %v1107_v32 = vld [vmem:[%s9147_s1 + $0x21c0] sm:$0xff]  ;;  %2826 = vmatpush.msra.mxu1 %v1443_v35  ;;  %2887 = vmatpush.msra.mxu2 %v404_v43  ;;  %v692_v16 = vld [vmem:[%s9147_s1 + $0x14c8] sm:$0xff] }
 0x203   :  { %v1427_v36 = vld [vmem:[%s9147_s1 + $0x2bc0] sm:$0xff]  ;;  %2811 = vmatpush.msrb.mxu3 %v1107_v32  ;;  %2863 = vmatpush.msra.mxu0 %v212_v41  ;;  %v1012_v20 = vld [vmem:[%s9147_s1 + $0x1ec8] sm:$0xff] }
 0x204   :  { %v1091_v27 = vld [vmem:[%s9147_s1 + $0x2140] sm:$0xff]  ;;  %2827 = vmatpush.msra.mxu1 %v1427_v36  ;;  %2888 = vmatpush.msra.mxu2 %v388_v19  ;;  %v1524_v26 = vld [vmem:[%s9147_s1 + $0x2ec8] sm:$0xff] }
 0x205   :  { %v1411_v42 = vld [vmem:[%s9147_s1 + $0x2b40] sm:$0xff]  ;;  %2812 = vmatpush.msrb.mxu3 %v1091_v27  ;;  %2864 = vmatpush.msra.mxu0 %v196_v1  ;;  %v676_v28 = vld [vmem:[%s9147_s1 + $0x1448] sm:$0xff] }
 0x206   :  { %v1075_v39 = vld [vmem:[%s9147_s1 + $0x20c0] sm:$0xff]  ;;  %2828 = vmatpush.msra.mxu1 %v1411_v42  ;;  %2889 = vmatpush.msra.mxu2 %v372_v47  ;;  %v36_v29 = vld [vmem:[%s9147_s1 + $0x48] sm:$0xff] }
 0x207   :  { %v1395_v46 = vld [vmem:[%s9147_s1 + $0x2ac0] sm:$0xff]  ;;  %2813 = vmatpush.msrb.mxu3 %v1075_v39  ;;  %2865 = vmatpush.msra.mxu0 %v180_v44  ;;  %v996_v30 = vld [vmem:[%s9147_s1 + $0x1e48] sm:$0xff] }
 0x208   :  { %v1059_v48 = vld [vmem:[%s9147_s1 + $0x2040] sm:$0xff]  ;;  %2829 = vmatpush.msra.mxu1 %v1395_v46  ;;  %2890 = vmatpush.msra.mxu2 %v356_v0  ;;  %v1508_v23 = vld [vmem:[%s9147_s1 + $0x2e48] sm:$0xff] }
 0x209   :  { %v1379_v49 = vld [vmem:[%s9147_s1 + $0x2a40] sm:$0xff]  ;;  %2814 = vmatpush.msrb.mxu3 %v1059_v48  ;;  %2866 = vmatpush.msra.mxu0 %v164_v22  ;;  %v2476_v58 = vpop.f32.mrf.mxu3  ;;  %v2496_v37 = vpop.f32.mrf.mxu0  ;;  %v660_v33 = vld [vmem:[%s9147_s1 + $0x13c8] sm:$0xff] }
 0x20a   :  { %v1363_v14 = vld [vmem:[%s9147_s1 + $0x29c0] sm:$0xff]  ;;  %2815 = vmatmul.f32.vlgmr.msrb.gmra.mxu3 %v6340_v25  ;;  %2830 = vmatpush.msra.mxu1 %v1379_v49  ;;  %v324_v25 = vld [vmem:[%s9147_s1 + $0x948] sm:$0xff] }
 0x20b   :  { %2899 = vmatpush.msra.mxu3 %v788_v24  ;;  %v1347_v53 = vld [vmem:[%s9147_s1 + $0x2940] sm:$0xff]  ;;  %2867 = vmatpush.msra.mxu0 %v148_v8  ;;  %v2456_v63 = vpop.f32.mrf.mxu1  ;;  %v1300_v5 = vld [vmem:[%s9147_s1 + $0x27c8] sm:$0xff] }
 0x20c   :  { %2831 = vmatpush.msra.mxu1 %v1363_v14  ;;  %2891 = vmatpush.msra.mxu2 %v340_v51  ;;  %v1331_v56 = vld [vmem:[%s9147_s1 + $0x28c0] sm:$0xff]  ;;  %v2477_v21 = vadd.f32 %v2476_v58, %v2456_v63  ;;  %v980_v50 = vld [vmem:[%s9147_s1 + $0x1dc8] sm:$0xff] }
 0x20d   :  { %2900 = vmatpush.msra.mxu3 %v772_v52  ;;  %2868 = vmatpush.msra.mxu0 %v132_v54  ;;  %v1315_v31 = vld [vmem:[%s9147_s1 + $0x2840] sm:$0xff]  ;;  %v1492_v10 = vld [vmem:[%s9147_s1 + $0x2dc8] sm:$0xff] }
 0x20e   :  { %2832 = vmatpush.msra.mxu1 %v1347_v53  ;;  %2892 = vmatpush.msra.mxu2 %v324_v25  ;;  %v2497_v9 = vadd.f32 %v2496_v37, %v2477_v21  ;;  %v2516_v11 = vpop.f32.mrf.mxu2  ;;  %v644_v35 = vld [vmem:[%s9147_s1 + $0x1348] sm:$0xff]  ;;  %v517_v37 = vld [vmem:[%s9147_s1 + $0xf50] sm:$0xff] }
 0x20f   :  { %2901 = vmatpush.msra.mxu3 %v756_v34  ;;  %2869 = vmatpush.msra.mxu0 %v116_v18  ;;  %v1284_v45 = vld [vmem:[%s9147_s1 + $0x2748] sm:$0xff] }
 0x210   :  { %2833 = vmatpush.msra.mxu1 %v1331_v56  ;;  %2893 = vmatpush.msra.mxu2 %v308_v57  ;;  %v6979_v17 = vadd.f32 %v2516_v11, %v2497_v9  ;;  %v964_v32 = vld [vmem:[%s9147_s1 + $0x1d48] sm:$0xff]  ;;  %v501_v9 = vld [vmem:[%s9147_s1 + $0xed0] sm:$0xff] }
 0x211   :  { %2902 = vmatpush.msra.mxu3 %v740_v40  ;;  %2870 = vmatpush.msra.mxu0 %v100_v61  ;;  %v1476_v41 = vld [vmem:[%s9147_s1 + $0x2d48] sm:$0xff]  ;;  %v533_v40 = vld [vmem:[%s9147_s1 + $0xfd0] sm:$0xff] }
 0x212   :  { %2834 = vmatpush.msra.mxu1 %v1315_v31  ;;  %2894 = vmatpush.msra.mxu2 %v292_v62  ;;  %v628_v36 = vld [vmem:[%s9147_s1 + $0x12c8] sm:$0xff] }
 0x213   :  { %2903 = vmatpush.msra.mxu3 %v724_v3  ;;  %2835 = vmatmul.f32.vlgmr.msra.gmra.mxu1 %v6305_v2  ;;  %v52_v2 = vld [vmem:[%s9147_s1 + $0xc8] sm:$0xff] }
 0x214   :  { %2871 = vmatpush.msra.mxu0 %v84_v13  ;;  %2919 = vmatpush.msrb.mxu1 %v1044_v59  ;;  %v1268_v43 = vld [vmem:[%s9147_s1 + $0x26c8] sm:$0xff] }
 0x215   :  { %2959 = vmatpush.msrb.mxu2 %v1556_v4  ;;  %2904 = vmatpush.msra.mxu3 %v708_v7  ;;  %v948_v27 = vld [vmem:[%s9147_s1 + $0x1cc8] sm:$0xff] }
 0x216   :  { %2872 = vmatpush.msra.mxu0 %v68_v12  ;;  %2920 = vmatpush.msrb.mxu1 %v1028_v15  ;;  %v1460_v1 = vld [vmem:[%s9147_s1 + $0x2cc8] sm:$0xff] }
 0x217   :  { %2960 = vmatpush.msrb.mxu2 %v1540_v6  ;;  %2905 = vmatpush.msra.mxu3 %v692_v16  ;;  %v612_v42 = vld [vmem:[%s9147_s1 + $0x1248] sm:$0xff]  ;;  %v485_v16 = vld [vmem:[%s9147_s1 + $0xe50] sm:$0xff] }
 0x218   :  { %2873 = vmatpush.msra.mxu0 %v52_v2  ;;  %2921 = vmatpush.msrb.mxu1 %v1012_v20  ;;  %v1252_v19 = vld [vmem:[%s9147_s1 + $0x2648] sm:$0xff]  ;;  %v469_v2 = vld [vmem:[%s9147_s1 + $0xdd0] sm:$0xff] }
 0x219   :  { %2961 = vmatpush.msrb.mxu2 %v1524_v26  ;;  %2906 = vmatpush.msra.mxu3 %v676_v28  ;;  %v932_v39 = vld [vmem:[%s9147_s1 + $0x1c48] sm:$0xff]  ;;  %v277_v26 = vld [vmem:[%s9147_s1 + $0x7d0] sm:$0xff]  ;;  %v7176_v28 = vld [vmem:[%s9148_s0] sm:$0xff] }
 0x21a   :  { %2874 = vmatpush.msra.mxu0 %v36_v29  ;;  %2922 = vmatpush.msrb.mxu1 %v996_v30  ;;  %v1444_v44 = vld [vmem:[%s9147_s1 + $0x2c48] sm:$0xff]  ;;  %v453_v30 = vld [vmem:[%s9147_s1 + $0xd50] sm:$0xff] }
 0x21b   :  { %2962 = vmatpush.msrb.mxu2 %v1508_v23  ;;  %2907 = vmatpush.msra.mxu3 %v660_v33  ;;  %v596_v46 = vld [vmem:[%s9147_s1 + $0x11c8] sm:$0xff]  ;;  %v261_v33 = vld [vmem:[%s9147_s1 + $0x750] sm:$0xff] }
 0x21c   :  { %2939 = vmatpush.msrb.mxu0 %v1300_v5  ;;  %2923 = vmatpush.msrb.mxu1 %v980_v50  ;;  %v1236_v47 = vld [vmem:[%s9147_s1 + $0x25c8] sm:$0xff] }
 0x21d   :  { %2963 = vmatpush.msrb.mxu2 %v1492_v10  ;;  %2908 = vmatpush.msra.mxu3 %v644_v35  ;;  %v916_v48 = vld [vmem:[%s9147_s1 + $0x1bc8] sm:$0xff]  ;;  %v437_v10 = vld [vmem:[%s9147_s1 + $0xcd0] sm:$0xff] }
 0x21e   :  { %2940 = vmatpush.msrb.mxu0 %v1284_v45  ;;  %2924 = vmatpush.msrb.mxu1 %v964_v32  ;;  %v1428_v22 = vld [vmem:[%s9147_s1 + $0x2bc8] sm:$0xff]  ;;  %v1045_v35 = vld [vmem:[%s9147_s1 + $0x1fd0] sm:$0xff] }
 0x21f   :  { %2964 = vmatpush.msrb.mxu2 %v1476_v41  ;;  %2909 = vmatpush.msra.mxu3 %v628_v36  ;;  %v580_v49 = vld [vmem:[%s9147_s1 + $0x1148] sm:$0xff]  ;;  %v245_v32 = vld [vmem:[%s9147_s1 + $0x6d0] sm:$0xff] }
 0x220   :  { %2941 = vmatpush.msrb.mxu0 %v1268_v43  ;;  %2925 = vmatpush.msrb.mxu1 %v948_v27  ;;  %v1220_v0 = vld [vmem:[%s9147_s1 + $0x2548] sm:$0xff]  ;;  %v421_v41 = vld [vmem:[%s9147_s1 + $0xc50] sm:$0xff] }
 0x221   :  { %2965 = vmatpush.msrb.mxu2 %v1460_v1  ;;  %2910 = vmatpush.msra.mxu3 %v612_v42  ;;  %v900_v24 = vld [vmem:[%s9147_s1 + $0x1b48] sm:$0xff]  ;;  %v1029_v36 = vld [vmem:[%s9147_s1 + $0x1f50] sm:$0xff]  ;;  %v7230_v42 = vld [vmem:[%s9148_s0 + $0x18] sm:$0xff] }
 0x222   :  { %2942 = vmatpush.msrb.mxu0 %v1252_v19  ;;  %2926 = vmatpush.msrb.mxu1 %v932_v39  ;;  %v1412_v8 = vld [vmem:[%s9147_s1 + $0x2b48] sm:$0xff]  ;;  %v2536_v25 = vpop.f32.mrf.mxu1  ;;  %v229_v27 = vld [vmem:[%s9147_s1 + $0x650] sm:$0xff] }
 0x223   :  { %2966 = vmatpush.msrb.mxu2 %v1444_v44  ;;  %2911 = vmatpush.msra.mxu3 %v596_v46  ;;  %v564_v14 = vld [vmem:[%s9147_s1 + $0x10c8] sm:$0xff]  ;;  %v2537_v56 = vadd.f32 %v2536_v25, %v6979_v17  ;;  %v405_v1 = vld [vmem:[%s9147_s1 + $0xbd0] sm:$0xff]  ;;  %v7245_v46 = vld [vmem:[%s9148_s0 + $0x20] sm:$0xff] }
 0x224   :  { %2943 = vmatpush.msrb.mxu0 %v1236_v47  ;;  %2927 = vmatpush.msrb.mxu1 %v916_v48  ;;  %v1204_v51 = vld [vmem:[%s9147_s1 + $0x24c8] sm:$0xff]  ;;  %v2556_v57 = vpop.f32.mrf.mxu3  ;;  %v789_v19 = vld [vmem:[%s9147_s1 + $0x17d0] sm:$0xff] }
 0x225   :  { %2967 = vmatpush.msrb.mxu2 %v1428_v22  ;;  %2912 = vmatpush.msra.mxu3 %v580_v49  ;;  %v884_v52 = vld [vmem:[%s9147_s1 + $0x1ac8] sm:$0xff]  ;;  %v2557_v31 = vadd.f32 %v2556_v57, %v2537_v56  ;;  %v1013_v39 = vld [vmem:[%s9147_s1 + $0x1ed0] sm:$0xff] }
 0x226   :  { %2944 = vmatpush.msrb.mxu0 %v1220_v0  ;;  %2928 = vmatpush.msrb.mxu1 %v900_v24  ;;  %v1396_v54 = vld [vmem:[%s9147_s1 + $0x2ac8] sm:$0xff]  ;;  %v213_v44 = vld [vmem:[%s9147_s1 + $0x5d0] sm:$0xff] }
 0x227   :  { %v548_v53 = vld [vmem:[%s9147_s1 + $0x1048] sm:$0xff]  ;;  %2968 = vmatpush.msrb.mxu2 %v1412_v8  ;;  %2913 = vmatpush.msra.mxu3 %v564_v14  ;;  %v2576_v21 = vpop.f32.mrf.mxu0  ;;  %v389_v47 = vld [vmem:[%s9147_s1 + $0xb50] sm:$0xff] }
 0x228   :  { %v1188_v34 = vld [vmem:[%s9147_s1 + $0x2448] sm:$0xff]  ;;  %2945 = vmatpush.msrb.mxu0 %v1204_v51  ;;  %2929 = vmatpush.msrb.mxu1 %v884_v52  ;;  %v2577_v7 = vadd.f32 %v2576_v21, %v2557_v31  ;;  %v773_v48 = vld [vmem:[%s9147_s1 + $0x1750] sm:$0xff] }
 0x229   :  { %v868_v18 = vld [vmem:[%s9147_s1 + $0x1a48] sm:$0xff]  ;;  %2969 = vmatpush.msrb.mxu2 %v1396_v54  ;;  %2914 = vmatpush.msra.mxu3 %v548_v53  ;;  %v997_v22 = vld [vmem:[%s9147_s1 + $0x1e50] sm:$0xff] }
 0x22a   :  { %v1380_v58 = vld [vmem:[%s9147_s1 + $0x2a48] sm:$0xff]  ;;  %2946 = vmatpush.msrb.mxu0 %v1188_v34  ;;  %2930 = vmatpush.msrb.mxu1 %v868_v18  ;;  %v7141_v15 = vmax.f32 %v3843_v60, %v2577_v7  ;;  %v197_v49 = vld [vmem:[%s9147_s1 + $0x550] sm:$0xff] }
 0x22b   :  { %v1172_v61 = vld [vmem:[%s9147_s1 + $0x23c8] sm:$0xff]  ;;  %2970 = vmatpush.msrb.mxu2 %v1380_v58  ;;  %3019 = vmatpush.msrb.mxu3 %v533_v40  ;;  %v7263_v0 = vld [vmem:[%s9148_s0 + $0x30] sm:$0xff] }
 0x22c   :  { %v852_v62 = vld [vmem:[%s9147_s1 + $0x19c8] sm:$0xff]  ;;  %2947 = vmatpush.msrb.mxu0 %v1172_v61  ;;  %2915 = vmatmul.f32.vlgmr.msra.gmra.mxu3 %v7158_v55  ;;  %v373_v24 = vld [vmem:[%s9147_s1 + $0xad0] sm:$0xff] }
 0x22d   :  { %v1364_v63 = vld [vmem:[%s9147_s1 + $0x29c8] sm:$0xff]  ;;  %2931 = vmatpush.msrb.mxu1 %v852_v62  ;;  %3020 = vmatpush.msrb.mxu3 %v517_v37  ;;  %v757_v8 = vld [vmem:[%s9147_s1 + $0x16d0] sm:$0xff] }
 0x22e   :  { %v1156_v3 = vld [vmem:[%s9147_s1 + $0x2348] sm:$0xff]  ;;  %2971 = vmatpush.msrb.mxu2 %v1364_v63  ;;  %2875 = vmatmul.f32.vlgmr.msra.gmra.mxu0 %v7176_v28  ;;  %v981_v14 = vld [vmem:[%s9147_s1 + $0x1dd0] sm:$0xff] }
 0x22f   :  { %v7120_v13 = vld [vmem:[%s9148_s0 + $0x8] sm:$0xff]  ;;  %2948 = vmatpush.msrb.mxu0 %v1156_v3  ;;  %3021 = vmatpush.msrb.mxu3 %v501_v9  ;;  %v181_v51 = vld [vmem:[%s9147_s1 + $0x4d0] sm:$0xff] }
 0x230   :  { %2895 = vmatmul.f32.vlgmr.msra.gmra.mxu2 %v7120_v13  ;;  %v836_v59 = vld [vmem:[%s9147_s1 + $0x1948] sm:$0xff]  ;;  %v357_v52 = vld [vmem:[%s9147_s1 + $0xa50] sm:$0xff] }
 0x231   :  { %v1348_v4 = vld [vmem:[%s9147_s1 + $0x2948] sm:$0xff]  ;;  %2932 = vmatpush.msrb.mxu1 %v836_v59  ;;  %3022 = vmatpush.msrb.mxu3 %v485_v16  ;;  %v741_v54 = vld [vmem:[%s9147_s1 + $0x1650] sm:$0xff] }
 0x232   :  { %v1140_v11 = vld [vmem:[%s9147_s1 + $0x22c8] sm:$0xff]  ;;  %2972 = vmatpush.msrb.mxu2 %v1348_v4  ;;  %v965_v53 = vld [vmem:[%s9147_s1 + $0x1d50] sm:$0xff] }
 0x233   :  { %v820_v12 = vld [vmem:[%s9147_s1 + $0x18c8] sm:$0xff]  ;;  %2949 = vmatpush.msrb.mxu0 %v1140_v11  ;;  %3023 = vmatpush.msrb.mxu3 %v469_v2  ;;  %v165_v25 = vld [vmem:[%s9147_s1 + $0x450] sm:$0xff] }
 0x234   :  { %v1332_v6 = vld [vmem:[%s9147_s1 + $0x28c8] sm:$0xff]  ;;  %2933 = vmatpush.msrb.mxu1 %v820_v12  ;;  %v341_v34 = vld [vmem:[%s9147_s1 + $0x9d0] sm:$0xff] }
 0x235   :  { %v1124_v17 = vld [vmem:[%s9147_s1 + $0x2248] sm:$0xff]  ;;  %2973 = vmatpush.msrb.mxu2 %v1332_v6  ;;  %3024 = vmatpush.msrb.mxu3 %v453_v30  ;;  %v725_v18 = vld [vmem:[%s9147_s1 + $0x15d0] sm:$0xff] }
 0x236   :  { %v804_v38 = vld [vmem:[%s9147_s1 + $0x1848] sm:$0xff]  ;;  %2950 = vmatpush.msrb.mxu0 %v1124_v17  ;;  %v949_v56 = vld [vmem:[%s9147_s1 + $0x1cd0] sm:$0xff] }
 0x237   :  { %v1316_v60 = vld [vmem:[%s9147_s1 + $0x2848] sm:$0xff]  ;;  %2934 = vmatpush.msrb.mxu1 %v804_v38  ;;  %3025 = vmatpush.msrb.mxu3 %v437_v10  ;;  %v149_v57 = vld [vmem:[%s9147_s1 + $0x3d0] sm:$0xff] }
 0x238   :  { %v1108_v20 = vld [vmem:[%s9147_s1 + $0x21c8] sm:$0xff]  ;;  %2974 = vmatpush.msrb.mxu2 %v1316_v60  ;;  %2935 = vmatmul.f32.vlgmr.msrb.gmra.mxu1 %v7230_v42  ;;  %v325_v40 = vld [vmem:[%s9147_s1 + $0x950] sm:$0xff] }
 0x239   :  { %v1588_v29 = vld [vmem:[%s9147_s1 + $0x30c8] sm:$0xff]  ;;  %2951 = vmatpush.msrb.mxu0 %v1108_v20  ;;  %2999 = vmatpush.msra.mxu1 %v277_v26  ;;  %v709_v61 = vld [vmem:[%s9147_s1 + $0x1550] sm:$0xff] }
 0x23a   :  { %v1092_v23 = vld [vmem:[%s9147_s1 + $0x2148] sm:$0xff]  ;;  %2993 = vmatpush.msra.mxu2 %v1588_v29  ;;  %3026 = vmatpush.msrb.mxu3 %v421_v41  ;;  %v933_v31 = vld [vmem:[%s9147_s1 + $0x1c50] sm:$0xff] }
 0x23b   :  { %v7194_v5 = vld [vmem:[%s9148_s0 + $0x28] sm:$0xff]  ;;  %2952 = vmatpush.msrb.mxu0 %v1092_v23  ;;  %3000 = vmatpush.msra.mxu1 %v261_v33  ;;  %v133_v62 = vld [vmem:[%s9147_s1 + $0x350] sm:$0xff] }
 0x23c   :  { %2975 = vmatmul.f32.vlgmr.msrb.gmra.mxu2 %v7194_v5  ;;  %v1572_v50 = vld [vmem:[%s9147_s1 + $0x3048] sm:$0xff]  ;;  %3027 = vmatpush.msrb.mxu3 %v405_v1  ;;  %v309_v63 = vld [vmem:[%s9147_s1 + $0x8d0] sm:$0xff]  ;;  %v2616_v3 = vpop.f32.mrf.mxu0 }
 0x23d   :  { %v1076_v45 = vld [vmem:[%s9147_s1 + $0x20c8] sm:$0xff]  ;;  %2994 = vmatpush.msra.mxu2 %v1572_v50  ;;  %3001 = vmatpush.msra.mxu1 %v245_v32  ;;  %v693_v37 = vld [vmem:[%s9147_s1 + $0x14d0] sm:$0xff] }
 0x23e   :  { %2953 = vmatpush.msrb.mxu0 %v1076_v45  ;;  %v1060_v43 = vld [vmem:[%s9147_s1 + $0x2048] sm:$0xff]  ;;  %3028 = vmatpush.msrb.mxu3 %v389_v47  ;;  %v917_v21 = vld [vmem:[%s9147_s1 + $0x1bd0] sm:$0xff] }
 0x23f   :  { %3059 = vmatpush.msrb.mxu2 %v1045_v35  ;;  %3002 = vmatpush.msra.mxu1 %v229_v27  ;;  %v117_v59 = vld [vmem:[%s9147_s1 + $0x2d0] sm:$0xff] }
 0x240   :  { %2954 = vmatpush.msrb.mxu0 %v1060_v43  ;;  %3029 = vmatpush.msrb.mxu3 %v373_v24  ;;  %v293_v7 = vld [vmem:[%s9147_s1 + $0x850] sm:$0xff] }
 0x241   :  { %3060 = vmatpush.msrb.mxu2 %v1029_v36  ;;  %2955 = vmatmul.f32.vlgmr.msrb.gmra.mxu0 %v7245_v46  ;;  %v2596_v58 = vpop.f32.mrf.mxu2  ;;  %v677_v9 = vld [vmem:[%s9147_s1 + $0x1450] sm:$0xff] }
 0x242   :  { %3039 = vmatpush.msra.mxu0 %v789_v19  ;;  %3003 = vmatpush.msra.mxu1 %v213_v44  ;;  %v2617_v4 = vadd.f32 %v2616_v3, %v2596_v58  ;;  %v901_v11 = vld [vmem:[%s9147_s1 + $0x1b50] sm:$0xff] }
 0x243   :  { %3061 = vmatpush.msrb.mxu2 %v1013_v39  ;;  %3030 = vmatpush.msrb.mxu3 %v357_v52  ;;  %v101_v12 = vld [vmem:[%s9147_s1 + $0x250] sm:$0xff] }
 0x244   :  { %3914 = vmatmul.msk.f32.vlgmr.msra.gmra.mxu2 %vm1595_vm0, %v7263_v0  ;;  %3040 = vmatpush.msra.mxu0 %v773_v48  ;;  %v2656_v16 = vpop.f32.mrf.mxu3  ;;  %v1557_v17 = vld [vmem:[%s9147_s1 + $0x2fd0] sm:$0xff] }
 0x245   :  { %3062 = vmatpush.msrb.mxu2 %v997_v22  ;;  %3004 = vmatpush.msra.mxu1 %v197_v49  ;;  %v661_v38 = vld [vmem:[%s9147_s1 + $0x13d0] sm:$0xff] }
 0x246   :  { %3041 = vmatpush.msra.mxu0 %v757_v8  ;;  %3031 = vmatpush.msrb.mxu3 %v341_v34  ;;  %v885_v2 = vld [vmem:[%s9147_s1 + $0x1ad0] sm:$0xff] }
 0x247   :  { %3063 = vmatpush.msrb.mxu2 %v981_v14  ;;  %3005 = vmatpush.msra.mxu1 %v181_v51  ;;  %v2636_v6 = vpop.f32.mrf.mxu1  ;;  %v85_v20 = vld [vmem:[%s9147_s1 + $0x1d0] sm:$0xff] }
 0x248   :  { %3042 = vmatpush.msra.mxu0 %v741_v54  ;;  %3032 = vmatpush.msrb.mxu3 %v325_v40  ;;  %v2637_v60 = vadd.f32 %v2636_v6, %v2617_v4  ;;  %v1541_v26 = vld [vmem:[%s9147_s1 + $0x2f50] sm:$0xff]  ;;  %v534_v4 = vld [vmem:[%s9147_s1 + $0xfd8] sm:$0xff] }
 0x249   :  { %3064 = vmatpush.msrb.mxu2 %v965_v53  ;;  %3006 = vmatpush.msra.mxu1 %v165_v25  ;;  %v645_v29 = vld [vmem:[%s9147_s1 + $0x1350] sm:$0xff]  ;;  %v278_v53 = vld [vmem:[%s9147_s1 + $0x7d8] sm:$0xff] }
 0x24a   :  { %3043 = vmatpush.msra.mxu0 %v725_v18  ;;  %3033 = vmatpush.msrb.mxu3 %v309_v63  ;;  %v2657_v30 = vadd.f32 %v2656_v16, %v2637_v60  ;;  %v869_v33 = vld [vmem:[%s9147_s1 + $0x1a50] sm:$0xff]  ;;  %v198_v16 = vld [vmem:[%s9147_s1 + $0x558] sm:$0xff] }
 0x24b   :  { %3065 = vmatpush.msrb.mxu2 %v949_v56  ;;  %3007 = vmatpush.msra.mxu1 %v149_v57  ;;  %v69_v50 = vld [vmem:[%s9147_s1 + $0x150] sm:$0xff]  ;;  %v262_v56 = vld [vmem:[%s9147_s1 + $0x758] sm:$0xff] }
 0x24c   :  { %3044 = vmatpush.msra.mxu0 %v709_v61  ;;  %3034 = vmatpush.msrb.mxu3 %v293_v7  ;;  %v1525_v10 = vld [vmem:[%s9147_s1 + $0x2ed0] sm:$0xff] }
 0x24d   :  { %3066 = vmatpush.msrb.mxu2 %v933_v31  ;;  %3008 = vmatpush.msra.mxu1 %v133_v62  ;;  %v629_v35 = vld [vmem:[%s9147_s1 + $0x12d0] sm:$0xff]  ;;  %v246_v62 = vld [vmem:[%s9147_s1 + $0x6d8] sm:$0xff] }
 0x24e   :  { %3045 = vmatpush.msra.mxu0 %v693_v37  ;;  %v2676_v23 = vpop.f32.mrf.mxu2  ;;  %3099 = vmatpush.msra.mxu3 %v1557_v17  ;;  %v853_v32 = vld [vmem:[%s9147_s1 + $0x19d0] sm:$0xff] }
 0x24f   :  { %3067 = vmatpush.msrb.mxu2 %v917_v21  ;;  %3009 = vmatpush.msra.mxu1 %v117_v59  ;;  %v2677_v45 = vadd.f32 %v2676_v23, %v2657_v30  ;;  %v53_v41 = vld [vmem:[%s9147_s1 + $0xd0] sm:$0xff]  ;;  %v230_v21 = vld [vmem:[%s9147_s1 + $0x658] sm:$0xff] }
 0x250   :  { %3046 = vmatpush.msra.mxu0 %v677_v9  ;;  %3100 = vmatpush.msra.mxu3 %v1541_v26  ;;  %v1509_v36 = vld [vmem:[%s9147_s1 + $0x2e50] sm:$0xff]  ;;  %v214_v9 = vld [vmem:[%s9147_s1 + $0x5d8] sm:$0xff] }
 0x251   :  { %3068 = vmatpush.msrb.mxu2 %v901_v11  ;;  %3010 = vmatpush.msra.mxu1 %v101_v12  ;;  %v613_v43 = vld [vmem:[%s9147_s1 + $0x1250] sm:$0xff]  ;;  %v2696_v27 = vpop.f32.mrf.mxu0  ;;  %v518_v12 = vld [vmem:[%s9147_s1 + $0xf58] sm:$0xff] }
 0x252   :  { %3047 = vmatpush.msra.mxu0 %v661_v38  ;;  %3101 = vmatpush.msra.mxu3 %v1525_v10  ;;  %v837_v1 = vld [vmem:[%s9147_s1 + $0x1950] sm:$0xff]  ;;  %v2697_v39 = vadd.f32 %v2696_v27, %v2677_v45  ;;  %v2716_v48 = vpop.f32.mrf.mxu1  ;;  %v502_v38 = vld [vmem:[%s9147_s1 + $0xed8] sm:$0xff] }
 0x253   :  { %3069 = vmatpush.msrb.mxu2 %v885_v2  ;;  %3011 = vmatpush.msra.mxu1 %v85_v20  ;;  %v37_v19 = vld [vmem:[%s9147_s1 + $0x50] sm:$0xff]  ;;  %v182_v2 = vld [vmem:[%s9147_s1 + $0x4d8] sm:$0xff] }
 0x254   :  { %3048 = vmatpush.msra.mxu0 %v645_v29  ;;  %v1493_v44 = vld [vmem:[%s9147_s1 + $0x2dd0] sm:$0xff]  ;;  %3102 = vmatpush.msra.mxu3 %v1509_v36  ;;  %v7399_v24 = vadd.f32 %v2716_v48, %v2697_v39  ;;  %v486_v26 = vld [vmem:[%s9147_s1 + $0xe58] sm:$0xff] }
 0x255   :  { %3070 = vmatpush.msrb.mxu2 %v869_v33  ;;  %3012 = vmatpush.msra.mxu1 %v69_v50  ;;  %v597_v47 = vld [vmem:[%s9147_s1 + $0x11d0] sm:$0xff]  ;;  %v166_v30 = vld [vmem:[%s9147_s1 + $0x458] sm:$0xff] }
 0x256   :  { %3049 = vmatpush.msra.mxu0 %v629_v35  ;;  %v821_v22 = vld [vmem:[%s9147_s1 + $0x18d0] sm:$0xff]  ;;  %3103 = vmatpush.msra.mxu3 %v1493_v44  ;;  %v3845_v54 = vmax.f32 %v7141_v15, %v7399_v24  ;;  %v470_v33 = vld [vmem:[%s9147_s1 + $0xdd8] sm:$0xff]  ;;  %v215_v24 = vld [vmem:[%s9147_s1 + $0x5e0] sm:$0xff] }
 0x257   :  { %3071 = vmatpush.msrb.mxu2 %v853_v32  ;;  %3013 = vmatpush.msra.mxu1 %v53_v41  ;;  %v1301_v49 = vld [vmem:[%s9147_s1 + $0x27d0] sm:$0xff]  ;;  %v150_v10 = vld [vmem:[%s9147_s1 + $0x3d8] sm:$0xff] }
 0x258   :  { %3050 = vmatpush.msra.mxu0 %v613_v43  ;;  %v1477_v8 = vld [vmem:[%s9147_s1 + $0x2d50] sm:$0xff]  ;;  %3035 = vmatmul.f32.vlgmr.msrb.gmra.mxu3 %v7120_v13  ;;  %v454_v45 = vld [vmem:[%s9147_s1 + $0xd58] sm:$0xff] }
 0x259   :  { %3072 = vmatpush.msrb.mxu2 %v837_v1  ;;  %3014 = vmatpush.msra.mxu1 %v37_v19  ;;  %v581_v14 = vld [vmem:[%s9147_s1 + $0x1150] sm:$0xff]  ;;  %v134_v41 = vld [vmem:[%s9147_s1 + $0x358] sm:$0xff] }
 0x25a   :  { %3051 = vmatpush.msra.mxu0 %v597_v47  ;;  %v805_v51 = vld [vmem:[%s9147_s1 + $0x1850] sm:$0xff]  ;;  %3104 = vmatpush.msra.mxu3 %v1477_v8  ;;  %v438_v43 = vld [vmem:[%s9147_s1 + $0xcd8] sm:$0xff] }
 0x25b   :  { %v1285_v52 = vld [vmem:[%s9147_s1 + $0x2750] sm:$0xff]  ;;  %3073 = vmatpush.msrb.mxu2 %v821_v22  ;;  %3079 = vmatpush.msrb.mxu1 %v1301_v49  ;;  %v1046_v27 = vld [vmem:[%s9147_s1 + $0x1fd8] sm:$0xff] }
 0x25c   :  { %3052 = vmatpush.msra.mxu0 %v581_v14  ;;  %v1461_v25 = vld [vmem:[%s9147_s1 + $0x2cd0] sm:$0xff]  ;;  %3015 = vmatmul.f32.vlgmr.msra.gmra.mxu1 %v7176_v28  ;;  %v118_v1 = vld [vmem:[%s9147_s1 + $0x2d8] sm:$0xff] }
 0x25d   :  { %v565_v34 = vld [vmem:[%s9147_s1 + $0x10d0] sm:$0xff]  ;;  %3074 = vmatpush.msrb.mxu2 %v805_v51  ;;  %3080 = vmatpush.msrb.mxu1 %v1285_v52  ;;  %v422_v39 = vld [vmem:[%s9147_s1 + $0xc58] sm:$0xff] }
 0x25e   :  { %v1269_v18 = vld [vmem:[%s9147_s1 + $0x26d0] sm:$0xff]  ;;  %3105 = vmatpush.msra.mxu3 %v1461_v25  ;;  %3053 = vmatpush.msra.mxu0 %v565_v34  ;;  %v1030_v44 = vld [vmem:[%s9147_s1 + $0x1f58] sm:$0xff] }
 0x25f   :  { %3139 = vmatpush.msra.mxu2 %v278_v53  ;;  %v1445_v57 = vld [vmem:[%s9147_s1 + $0x2c50] sm:$0xff]  ;;  %3081 = vmatpush.msrb.mxu1 %v1269_v18  ;;  %v102_v47 = vld [vmem:[%s9147_s1 + $0x258] sm:$0xff] }
 0x260   :  { %v549_v58 = vld [vmem:[%s9147_s1 + $0x1050] sm:$0xff]  ;;  %3106 = vmatpush.msra.mxu3 %v1445_v57  ;;  %3075 = vmatmul.f32.vlgmr.msrb.gmra.mxu2 %v7230_v42  ;;  %v406_v49 = vld [vmem:[%s9147_s1 + $0xbd8] sm:$0xff] }
 0x261   :  { %v1253_v40 = vld [vmem:[%s9147_s1 + $0x2650] sm:$0xff]  ;;  %3140 = vmatpush.msra.mxu2 %v262_v56  ;;  %3054 = vmatpush.msra.mxu0 %v549_v58  ;;  %v1014_v8 = vld [vmem:[%s9147_s1 + $0x1ed8] sm:$0xff] }
 0x262   :  { %v1429_v61 = vld [vmem:[%s9147_s1 + $0x2bd0] sm:$0xff]  ;;  %3082 = vmatpush.msrb.mxu1 %v1253_v40  ;;  %3055 = vmatmul.f32.vlgmr.msra.gmra.mxu0 %v7158_v55  ;;  %v86_v51 = vld [vmem:[%s9147_s1 + $0x1d8] sm:$0xff] }
 0x263   :  { %v1589_v31 = vld [vmem:[%s9147_s1 + $0x30d0] sm:$0xff]  ;;  %3107 = vmatpush.msra.mxu3 %v1429_v61  ;;  %3141 = vmatpush.msra.mxu2 %v246_v62  ;;  %v390_v25 = vld [vmem:[%s9147_s1 + $0xb58] sm:$0xff] }
 0x264   :  { %v1237_v63 = vld [vmem:[%s9147_s1 + $0x25d0] sm:$0xff]  ;;  %3133 = vmatpush.msrb.mxu0 %v1589_v31  ;;  %v998_v18 = vld [vmem:[%s9147_s1 + $0x1e58] sm:$0xff] }
 0x265   :  { %v1413_v37 = vld [vmem:[%s9147_s1 + $0x2b50] sm:$0xff]  ;;  %3083 = vmatpush.msrb.mxu1 %v1237_v63  ;;  %3142 = vmatpush.msra.mxu2 %v230_v21  ;;  %v70_v56 = vld [vmem:[%s9147_s1 + $0x158] sm:$0xff] }
 0x266   :  { %v1573_v3 = vld [vmem:[%s9147_s1 + $0x3050] sm:$0xff]  ;;  %3108 = vmatpush.msra.mxu3 %v1413_v37  ;;  %v374_v40 = vld [vmem:[%s9147_s1 + $0xad8] sm:$0xff] }
 0x267   :  { %v1221_v59 = vld [vmem:[%s9147_s1 + $0x2550] sm:$0xff]  ;;  %3134 = vmatpush.msrb.mxu0 %v1573_v3  ;;  %3143 = vmatpush.msra.mxu2 %v214_v9  ;;  %v982_v61 = vld [vmem:[%s9147_s1 + $0x1dd8] sm:$0xff] }
 0x268   :  { %v1397_v7 = vld [vmem:[%s9147_s1 + $0x2ad0] sm:$0xff]  ;;  %3084 = vmatpush.msrb.mxu1 %v1221_v59  ;;  %v54_v31 = vld [vmem:[%s9147_s1 + $0xd8] sm:$0xff] }
 0x269   :  { %v1205_v11 = vld [vmem:[%s9147_s1 + $0x24d0] sm:$0xff]  ;;  %3159 = vmatpush.msra.mxu0 %v534_v4  ;;  %3109 = vmatpush.msra.mxu3 %v1397_v7  ;;  %v790_v62 = vld [vmem:[%s9147_s1 + $0x17d8] sm:$0xff] }
 0x26a   :  { %v1381_v6 = vld [vmem:[%s9147_s1 + $0x2a50] sm:$0xff]  ;;  %3085 = vmatpush.msrb.mxu1 %v1205_v11  ;;  %3144 = vmatpush.msra.mxu2 %v198_v16  ;;  %v358_v37 = vld [vmem:[%s9147_s1 + $0xa58] sm:$0xff] }
 0x26b   :  { %v1189_v17 = vld [vmem:[%s9147_s1 + $0x2450] sm:$0xff]  ;;  %3160 = vmatpush.msra.mxu0 %v518_v12  ;;  %3110 = vmatpush.msra.mxu3 %v1381_v6  ;;  %v966_v3 = vld [vmem:[%s9147_s1 + $0x1d58] sm:$0xff] }
 0x26c   :  { %v1365_v60 = vld [vmem:[%s9147_s1 + $0x29d0] sm:$0xff]  ;;  %3086 = vmatpush.msrb.mxu1 %v1189_v17  ;;  %3145 = vmatpush.msra.mxu2 %v182_v2  ;;  %v38_v59 = vld [vmem:[%s9147_s1 + $0x58] sm:$0xff] }
 0x26d   :  { %v1173_v20 = vld [vmem:[%s9147_s1 + $0x23d0] sm:$0xff]  ;;  %3161 = vmatpush.msra.mxu0 %v502_v38  ;;  %3111 = vmatpush.msra.mxu3 %v1365_v60  ;;  %v774_v4 = vld [vmem:[%s9147_s1 + $0x1758] sm:$0xff] }
 0x26e   :  { %v1349_v29 = vld [vmem:[%s9147_s1 + $0x2950] sm:$0xff]  ;;  %3087 = vmatpush.msrb.mxu1 %v1173_v20  ;;  %3146 = vmatpush.msra.mxu2 %v166_v30  ;;  %v342_v7 = vld [vmem:[%s9147_s1 + $0x9d8] sm:$0xff] }
 0x26f   :  { %v1157_v23 = vld [vmem:[%s9147_s1 + $0x2350] sm:$0xff]  ;;  %3162 = vmatpush.msra.mxu0 %v486_v26  ;;  %3112 = vmatpush.msra.mxu3 %v1349_v29  ;;  %v2756_v14 = vpop.f32.mrf.mxu1  ;;  %v950_v9 = vld [vmem:[%s9147_s1 + $0x1cd8] sm:$0xff] }
 0x270   :  { %v1333_v50 = vld [vmem:[%s9147_s1 + $0x28d0] sm:$0xff]  ;;  %3088 = vmatpush.msrb.mxu1 %v1157_v23  ;;  %3147 = vmatpush.msra.mxu2 %v150_v10  ;;  %v2736_v22 = vpop.f32.mrf.mxu3  ;;  %v1302_v11 = vld [vmem:[%s9147_s1 + $0x27d8] sm:$0xff] }
 0x271   :  { %v1141_v35 = vld [vmem:[%s9147_s1 + $0x22d0] sm:$0xff]  ;;  %3163 = vmatpush.msra.mxu0 %v470_v33  ;;  %3113 = vmatpush.msra.mxu3 %v1333_v50  ;;  %v2757_v52 = vadd.f32 %v2756_v14, %v2736_v22  ;;  %v758_v12 = vld [vmem:[%s9147_s1 + $0x16d8] sm:$0xff] }
 0x272   :  { %v1317_v32 = vld [vmem:[%s9147_s1 + $0x2850] sm:$0xff]  ;;  %3089 = vmatpush.msrb.mxu1 %v1141_v35  ;;  %3148 = vmatpush.msra.mxu2 %v134_v41  ;;  %v326_v6 = vld [vmem:[%s9147_s1 + $0x958] sm:$0xff] }
 0x273   :  { %v1125_v36 = vld [vmem:[%s9147_s1 + $0x2250] sm:$0xff]  ;;  %3164 = vmatpush.msra.mxu0 %v454_v45  ;;  %3114 = vmatpush.msra.mxu3 %v1317_v32  ;;  %v2776_v34 = vpop.f32.mrf.mxu2  ;;  %v934_v16 = vld [vmem:[%s9147_s1 + $0x1c58] sm:$0xff] }
 0x274   :  { %v1109_v19 = vld [vmem:[%s9147_s1 + $0x21d0] sm:$0xff]  ;;  %3090 = vmatpush.msrb.mxu1 %v1125_v36  ;;  %3149 = vmatpush.msra.mxu2 %v118_v1  ;;  %v2777_v57 = vadd.f32 %v2776_v34, %v2757_v52  ;;  %v1286_v17 = vld [vmem:[%s9147_s1 + $0x2758] sm:$0xff] }
 0x275   :  { %3165 = vmatpush.msra.mxu0 %v438_v43  ;;  %3199 = vmatpush.msrb.mxu3 %v1046_v27  ;;  %v1093_v48 = vld [vmem:[%s9147_s1 + $0x2150] sm:$0xff]  ;;  %v742_v38 = vld [vmem:[%s9147_s1 + $0x1658] sm:$0xff] }
 0x276   :  { %3091 = vmatpush.msrb.mxu1 %v1109_v19  ;;  %3150 = vmatpush.msra.mxu2 %v102_v47  ;;  %v1077_v53 = vld [vmem:[%s9147_s1 + $0x20d0] sm:$0xff]  ;;  %v310_v60 = vld [vmem:[%s9147_s1 + $0x8d8] sm:$0xff] }
 0x277   :  { %3166 = vmatpush.msra.mxu0 %v422_v39  ;;  %3200 = vmatpush.msrb.mxu3 %v1030_v44  ;;  %v1061_v58 = vld [vmem:[%s9147_s1 + $0x2050] sm:$0xff]  ;;  %v2796_v63 = vpop.f32.mrf.mxu0  ;;  %v918_v2 = vld [vmem:[%s9147_s1 + $0x1bd8] sm:$0xff] }
 0x278   :  { %3092 = vmatpush.msrb.mxu1 %v1093_v48  ;;  %3115 = vmatmul.f32.vlgmr.msra.gmra.mxu3 %v7194_v5  ;;  %v7606_v21 = vadd.f32 %v2796_v63, %v2777_v57  ;;  %v1270_v20 = vld [vmem:[%s9147_s1 + $0x26d8] sm:$0xff] }
 0x279   :  { %3167 = vmatpush.msra.mxu0 %v406_v49  ;;  %3201 = vmatpush.msrb.mxu3 %v1014_v8  ;;  %v726_v26 = vld [vmem:[%s9147_s1 + $0x15d8] sm:$0xff] }
 0x27a   :  { %3151 = vmatpush.msra.mxu2 %v86_v51  ;;  %3093 = vmatpush.msrb.mxu1 %v1077_v53  ;;  %v294_v29 = vld [vmem:[%s9147_s1 + $0x858] sm:$0xff] }
 0x27b   :  { %3168 = vmatpush.msra.mxu0 %v390_v25  ;;  %3202 = vmatpush.msrb.mxu3 %v998_v18  ;;  %v902_v30 = vld [vmem:[%s9147_s1 + $0x1b58] sm:$0xff] }
 0x27c   :  { %3152 = vmatpush.msra.mxu2 %v70_v56  ;;  %3094 = vmatpush.msrb.mxu1 %v1061_v58  ;;  %v1254_v23 = vld [vmem:[%s9147_s1 + $0x2658] sm:$0xff]  ;;  %v279_v58 = vld [vmem:[%s9147_s1 + $0x7e0] sm:$0xff] }
 0x27d   :  { %3169 = vmatpush.msra.mxu0 %v374_v40  ;;  %3203 = vmatpush.msrb.mxu3 %v982_v61  ;;  %v710_v33 = vld [vmem:[%s9147_s1 + $0x1558] sm:$0xff] }
 0x27e   :  { %3095 = vmatmul.f32.vlgmr.msrb.gmra.mxu1 %v7245_v46  ;;  %3153 = vmatpush.msra.mxu2 %v54_v31  ;;  %v1558_v50 = vld [vmem:[%s9147_s1 + $0x2fd8] sm:$0xff] }
 0x27f   :  { %3179 = vmatpush.msra.mxu1 %v790_v62  ;;  %3170 = vmatpush.msra.mxu0 %v358_v37  ;;  %v886_v10 = vld [vmem:[%s9147_s1 + $0x1ad8] sm:$0xff]  ;;  %v263_v37 = vld [vmem:[%s9147_s1 + $0x760] sm:$0xff] }
 0x280   :  { %3204 = vmatpush.msrb.mxu3 %v966_v3  ;;  %3154 = vmatpush.msra.mxu2 %v38_v59  ;;  %v1238_v35 = vld [vmem:[%s9147_s1 + $0x25d8] sm:$0xff] }
 0x281   :  { %3180 = vmatpush.msra.mxu1 %v774_v4  ;;  %3171 = vmatpush.msra.mxu0 %v342_v7  ;;  %v694_v45 = vld [vmem:[%s9147_s1 + $0x14d8] sm:$0xff] }
 0x282   :  { %3205 = vmatpush.msrb.mxu3 %v950_v9  ;;  %3219 = vmatpush.msrb.mxu2 %v1302_v11  ;;  %v1542_v32 = vld [vmem:[%s9147_s1 + $0x2f58] sm:$0xff]  ;;  %v247_v9 = vld [vmem:[%s9147_s1 + $0x6e0] sm:$0xff] }
 0x283   :  { %3915 = vmatmul.msk.f32.vlgmr.msrb.gmra.mxu0 %vm1595_vm0, %v7263_v0  ;;  %3181 = vmatpush.msra.mxu1 %v758_v12  ;;  %v870_v41 = vld [vmem:[%s9147_s1 + $0x1a58] sm:$0xff] }
 0x284   :  { %3172 = vmatpush.msra.mxu0 %v326_v6  ;;  %3206 = vmatpush.msrb.mxu3 %v934_v16  ;;  %v1222_v36 = vld [vmem:[%s9147_s1 + $0x2558] sm:$0xff] }
 0x285   :  { %3220 = vmatpush.msrb.mxu2 %v1286_v17  ;;  %3182 = vmatpush.msra.mxu1 %v742_v38  ;;  %v678_v43 = vld [vmem:[%s9147_s1 + $0x1458] sm:$0xff]  ;;  %v231_v17 = vld [vmem:[%s9147_s1 + $0x660] sm:$0xff] }
 0x286   :  { %3173 = vmatpush.msra.mxu0 %v310_v60  ;;  %3207 = vmatpush.msrb.mxu3 %v918_v2  ;;  %v1526_v27 = vld [vmem:[%s9147_s1 + $0x2ed8] sm:$0xff] }
 0x287   :  { %3221 = vmatpush.msrb.mxu2 %v1270_v20  ;;  %3183 = vmatpush.msra.mxu1 %v726_v26  ;;  %v854_v1 = vld [vmem:[%s9147_s1 + $0x19d8] sm:$0xff]  ;;  %v199_v20 = vld [vmem:[%s9147_s1 + $0x560] sm:$0xff] }
 0x288   :  { %3174 = vmatpush.msra.mxu0 %v294_v29  ;;  %3208 = vmatpush.msrb.mxu3 %v902_v30  ;;  %v1206_v19 = vld [vmem:[%s9147_s1 + $0x24d8] sm:$0xff] }
 0x289   :  { %3222 = vmatpush.msrb.mxu2 %v1254_v23  ;;  %3184 = vmatpush.msra.mxu1 %v710_v33  ;;  %v662_v39 = vld [vmem:[%s9147_s1 + $0x13d8] sm:$0xff]  ;;  %v183_v23 = vld [vmem:[%s9147_s1 + $0x4e0] sm:$0xff] }
 0x28a   :  { %3239 = vmatpush.msrb.mxu0 %v1558_v50  ;;  %3209 = vmatpush.msrb.mxu3 %v886_v10  ;;  %v1510_v44 = vld [vmem:[%s9147_s1 + $0x2e58] sm:$0xff]  ;;  %v535_v33 = vld [vmem:[%s9147_s1 + $0xfe0] sm:$0xff] }
 0x28b   :  { %3223 = vmatpush.msrb.mxu2 %v1238_v35  ;;  %3185 = vmatpush.msra.mxu1 %v694_v45  ;;  %v838_v47 = vld [vmem:[%s9147_s1 + $0x1958] sm:$0xff]  ;;  %v519_v10 = vld [vmem:[%s9147_s1 + $0xf60] sm:$0xff] }
 0x28c   :  { %3240 = vmatpush.msrb.mxu0 %v1542_v32  ;;  %3210 = vmatpush.msrb.mxu3 %v870_v41  ;;  %v1190_v48 = vld [vmem:[%s9147_s1 + $0x2458] sm:$0xff]  ;;  %v151_v35 = vld [vmem:[%s9147_s1 + $0x3e0] sm:$0xff] }
 0x28d   :  { %3224 = vmatpush.msrb.mxu2 %v1222_v36  ;;  %3186 = vmatpush.msra.mxu1 %v678_v43  ;;  %v646_v22 = vld [vmem:[%s9147_s1 + $0x1358] sm:$0xff]  ;;  %v2816_v51 = vpop.f32.mrf.mxu3  ;;  %v503_v45 = vld [vmem:[%s9147_s1 + $0xee0] sm:$0xff] }
 0x28e   :  { %3241 = vmatpush.msrb.mxu0 %v1526_v27  ;;  %3211 = vmatpush.msrb.mxu3 %v854_v1  ;;  %v1494_v49 = vld [vmem:[%s9147_s1 + $0x2dd8] sm:$0xff]  ;;  %v2817_v25 = vadd.f32 %v2816_v51, %v7606_v21  ;;  %v2856_v21 = vpop.f32.mrf.mxu2  ;;  %v759_v32 = vld [vmem:[%s9147_s1 + $0x16e0] sm:$0xff] }
 0x28f   :  { %3225 = vmatpush.msrb.mxu2 %v1206_v19  ;;  %3187 = vmatpush.msra.mxu1 %v662_v39  ;;  %v822_v8 = vld [vmem:[%s9147_s1 + $0x18d8] sm:$0xff]  ;;  %v135_v36 = vld [vmem:[%s9147_s1 + $0x360] sm:$0xff] }
 0x290   :  { %3242 = vmatpush.msrb.mxu0 %v1510_v44  ;;  %v1174_v14 = vld [vmem:[%s9147_s1 + $0x23d8] sm:$0xff]  ;;  %3212 = vmatpush.msrb.mxu3 %v838_v47  ;;  %v2836_v61 = vpop.f32.mrf.mxu1  ;;  %v487_v43 = vld [vmem:[%s9147_s1 + $0xe60] sm:$0xff] }
 0x291   :  { %3226 = vmatpush.msrb.mxu2 %v1190_v48  ;;  %v630_v52 = vld [vmem:[%s9147_s1 + $0x12d8] sm:$0xff]  ;;  %3188 = vmatpush.msra.mxu1 %v646_v22  ;;  %v2837_v63 = vadd.f32 %v2836_v61, %v2817_v25  ;;  %v743_v27 = vld [vmem:[%s9147_s1 + $0x1660] sm:$0xff] }
 0x292   :  { %v1478_v53 = vld [vmem:[%s9147_s1 + $0x2d58] sm:$0xff]  ;;  %3243 = vmatpush.msrb.mxu0 %v1494_v49  ;;  %3213 = vmatpush.msrb.mxu3 %v822_v8  ;;  %v1047_v1 = vld [vmem:[%s9147_s1 + $0x1fe0] sm:$0xff] }
 0x293   :  { %v806_v34 = vld [vmem:[%s9147_s1 + $0x1858] sm:$0xff]  ;;  %3227 = vmatpush.msrb.mxu2 %v1174_v14  ;;  %3189 = vmatpush.msra.mxu1 %v630_v52  ;;  %v2857_v4 = vadd.f32 %v2856_v21, %v2837_v63  ;;  %v119_v19 = vld [vmem:[%s9147_s1 + $0x2e0] sm:$0xff] }
 0x294   :  { %v1158_v18 = vld [vmem:[%s9147_s1 + $0x2358] sm:$0xff]  ;;  %3244 = vmatpush.msrb.mxu0 %v1478_v53  ;;  %3214 = vmatpush.msrb.mxu3 %v806_v34  ;;  %v471_v39 = vld [vmem:[%s9147_s1 + $0xde0] sm:$0xff] }
 0x295   :  { %v614_v56 = vld [vmem:[%s9147_s1 + $0x1258] sm:$0xff]  ;;  %3228 = vmatpush.msrb.mxu2 %v1158_v18  ;;  %v7777_v6 = vmax.f32 %v3845_v54, %v2857_v4  ;;  %3215 = vmatmul.f32.vlgmr.msrb.gmra.mxu3 %v7230_v42  ;;  %v791_v42 = vld [vmem:[%s9147_s1 + $0x17e0] sm:$0xff] }
 0x296   :  { %v1462_v57 = vld [vmem:[%s9147_s1 + $0x2cd8] sm:$0xff]  ;;  %3190 = vmatpush.msra.mxu1 %v614_v56  ;;  %3279 = vmatpush.msra.mxu3 %v279_v58  ;;  %v727_v44 = vld [vmem:[%s9147_s1 + $0x15e0] sm:$0xff] }
 0x297   :  { %v1142_v40 = vld [vmem:[%s9147_s1 + $0x22d8] sm:$0xff]  ;;  %3245 = vmatpush.msrb.mxu0 %v1462_v57  ;;  %3155 = vmatmul.f32.vlgmr.msra.gmra.mxu2 %v7176_v28  ;;  %v1031_v47 = vld [vmem:[%s9147_s1 + $0x1f60] sm:$0xff] }
 0x298   :  { %v598_v31 = vld [vmem:[%s9147_s1 + $0x11d8] sm:$0xff]  ;;  %3229 = vmatpush.msrb.mxu2 %v1142_v40  ;;  %3280 = vmatpush.msra.mxu3 %v263_v37  ;;  %v103_v48 = vld [vmem:[%s9147_s1 + $0x260] sm:$0xff] }
 0x299   :  { %v1446_v62 = vld [vmem:[%s9147_s1 + $0x2c58] sm:$0xff]  ;;  %3191 = vmatpush.msra.mxu1 %v598_v31  ;;  %3175 = vmatmul.f32.vlgmr.msra.gmra.mxu0 %v7120_v13  ;;  %v167_v13 = vld [vmem:[%s9147_s1 + $0x460] sm:$0xff] }
 0x29a   :  { %v1126_v3 = vld [vmem:[%s9147_s1 + $0x2258] sm:$0xff]  ;;  %3246 = vmatpush.msrb.mxu0 %v1446_v62  ;;  %3281 = vmatpush.msra.mxu3 %v247_v9  ;;  %v455_v22 = vld [vmem:[%s9147_s1 + $0xd60] sm:$0xff] }
 0x29b   :  { %v582_v59 = vld [vmem:[%s9147_s1 + $0x1158] sm:$0xff]  ;;  %3230 = vmatpush.msrb.mxu2 %v1126_v3  ;;  %v711_v49 = vld [vmem:[%s9147_s1 + $0x1560] sm:$0xff] }
 0x29c   :  { %v1430_v7 = vld [vmem:[%s9147_s1 + $0x2bd8] sm:$0xff]  ;;  %3192 = vmatpush.msra.mxu1 %v582_v59  ;;  %3282 = vmatpush.msra.mxu3 %v231_v17  ;;  %v1015_v8 = vld [vmem:[%s9147_s1 + $0x1ee0] sm:$0xff] }
 0x29d   :  { %v1110_v11 = vld [vmem:[%s9147_s1 + $0x21d8] sm:$0xff]  ;;  %3247 = vmatpush.msrb.mxu0 %v1430_v7  ;;  %v87_v14 = vld [vmem:[%s9147_s1 + $0x1e0] sm:$0xff] }
 0x29e   :  { %v566_v12 = vld [vmem:[%s9147_s1 + $0x10d8] sm:$0xff]  ;;  %3231 = vmatpush.msrb.mxu2 %v1110_v11  ;;  %3283 = vmatpush.msra.mxu3 %v215_v24  ;;  %v695_v51 = vld [vmem:[%s9147_s1 + $0x14e0] sm:$0xff] }
 0x29f   :  { %v1414_v16 = vld [vmem:[%s9147_s1 + $0x2b58] sm:$0xff]  ;;  %3193 = vmatpush.msra.mxu1 %v566_v12  ;;  %v999_v52 = vld [vmem:[%s9147_s1 + $0x1e60] sm:$0xff] }
 0x2a0   :  { %v1094_v38 = vld [vmem:[%s9147_s1 + $0x2158] sm:$0xff]  ;;  %3248 = vmatpush.msrb.mxu0 %v1414_v16  ;;  %3284 = vmatpush.msra.mxu3 %v199_v20  ;;  %v71_v53 = vld [vmem:[%s9147_s1 + $0x160] sm:$0xff] }
 0x2a1   :  { %v550_v15 = vld [vmem:[%s9147_s1 + $0x1058] sm:$0xff]  ;;  %3232 = vmatpush.msrb.mxu2 %v1094_v38  ;;  %v679_v25 = vld [vmem:[%s9147_s1 + $0x1460] sm:$0xff] }
 0x2a2   :  { %v1398_v28 = vld [vmem:[%s9147_s1 + $0x2ad8] sm:$0xff]  ;;  %3194 = vmatpush.msra.mxu1 %v550_v15  ;;  %3285 = vmatpush.msra.mxu3 %v183_v23  ;;  %v983_v34 = vld [vmem:[%s9147_s1 + $0x1de0] sm:$0xff] }
 0x2a3   :  { %v1078_v54 = vld [vmem:[%s9147_s1 + $0x20d8] sm:$0xff]  ;;  %3249 = vmatpush.msrb.mxu0 %v1398_v28  ;;  %3195 = vmatmul.f32.vlgmr.msra.gmra.mxu1 %v7158_v55  ;;  %v775_v55 = vld [vmem:[%s9147_s1 + $0x1760] sm:$0xff] }
 0x2a4   :  { %v1590_v60 = vld [vmem:[%s9147_s1 + $0x30d8] sm:$0xff]  ;;  %3233 = vmatpush.msrb.mxu2 %v1078_v54  ;;  %3286 = vmatpush.msra.mxu3 %v167_v13  ;;  %v55_v18 = vld [vmem:[%s9147_s1 + $0xe0] sm:$0xff] }
 0x2a5   :  { %v1382_v2 = vld [vmem:[%s9147_s1 + $0x2a58] sm:$0xff]  ;;  %3273 = vmatpush.msrb.mxu1 %v1590_v60  ;;  %v407_v57 = vld [vmem:[%s9147_s1 + $0xbe0] sm:$0xff] }
 0x2a6   :  { %v1062_v26 = vld [vmem:[%s9147_s1 + $0x2058] sm:$0xff]  ;;  %3250 = vmatpush.msrb.mxu0 %v1382_v2  ;;  %3287 = vmatpush.msra.mxu3 %v151_v35  ;;  %v663_v58 = vld [vmem:[%s9147_s1 + $0x13e0] sm:$0xff] }
 0x2a7   :  { %v1574_v29 = vld [vmem:[%s9147_s1 + $0x3058] sm:$0xff]  ;;  %3234 = vmatpush.msrb.mxu2 %v1062_v26  ;;  %v967_v40 = vld [vmem:[%s9147_s1 + $0x1d60] sm:$0xff] }
 0x2a8   :  { %v1366_v30 = vld [vmem:[%s9147_s1 + $0x29d8] sm:$0xff]  ;;  %3274 = vmatpush.msrb.mxu1 %v1574_v29  ;;  %3235 = vmatmul.f32.vlgmr.msrb.gmra.mxu2 %v7245_v46  ;;  %v39_v61 = vld [vmem:[%s9147_s1 + $0x60] sm:$0xff] }
 0x2a9   :  { %v1350_v50 = vld [vmem:[%s9147_s1 + $0x2958] sm:$0xff]  ;;  %3251 = vmatpush.msrb.mxu0 %v1366_v30  ;;  %3319 = vmatpush.msra.mxu2 %v791_v42  ;;  %v391_v62 = vld [vmem:[%s9147_s1 + $0xb60] sm:$0xff] }
 0x2aa   :  { %3299 = vmatpush.msra.mxu1 %v535_v33  ;;  %v1334_v46 = vld [vmem:[%s9147_s1 + $0x28d8] sm:$0xff]  ;;  %3288 = vmatpush.msra.mxu3 %v135_v36  ;;  %v647_v63 = vld [vmem:[%s9147_s1 + $0x1360] sm:$0xff] }
 0x2ab   :  { %3252 = vmatpush.msrb.mxu0 %v1350_v50  ;;  %3320 = vmatpush.msra.mxu2 %v775_v55  ;;  %v1318_v41 = vld [vmem:[%s9147_s1 + $0x2858] sm:$0xff]  ;;  %v2876_v31 = vpop.f32.mrf.mxu0  ;;  %v951_v3 = vld [vmem:[%s9147_s1 + $0x1ce0] sm:$0xff] }
 0x2ac   :  { %3300 = vmatpush.msra.mxu1 %v519_v10  ;;  %3289 = vmatpush.msra.mxu3 %v119_v19  ;;  %v1303_v21 = vld [vmem:[%s9147_s1 + $0x27e0] sm:$0xff] }
 0x2ad   :  { %3253 = vmatpush.msrb.mxu0 %v1334_v46  ;;  %3321 = vmatpush.msra.mxu2 %v759_v32  ;;  %v375_v59 = vld [vmem:[%s9147_s1 + $0xae0] sm:$0xff] }
 0x2ae   :  { %3301 = vmatpush.msra.mxu1 %v503_v45  ;;  %3290 = vmatpush.msra.mxu3 %v103_v48  ;;  %v631_v4 = vld [vmem:[%s9147_s1 + $0x12e0] sm:$0xff] }
 0x2af   :  { %3254 = vmatpush.msrb.mxu0 %v1318_v41  ;;  %3322 = vmatpush.msra.mxu2 %v743_v27  ;;  %v2916_v7 = vpop.f32.mrf.mxu3  ;;  %v935_v9 = vld [vmem:[%s9147_s1 + $0x1c60] sm:$0xff] }
 0x2b0   :  { %3302 = vmatpush.msra.mxu1 %v487_v43  ;;  %3255 = vmatmul.f32.vlgmr.msrb.gmra.mxu0 %v7194_v5  ;;  %v439_v5 = vld [vmem:[%s9147_s1 + $0xce0] sm:$0xff] }
 0x2b1   :  { %3339 = vmatpush.msra.mxu0 %v1047_v1  ;;  %3323 = vmatpush.msra.mxu2 %v727_v44  ;;  %v1287_v11 = vld [vmem:[%s9147_s1 + $0x2760] sm:$0xff] }
 0x2b2   :  { %3303 = vmatpush.msra.mxu1 %v471_v39  ;;  %3291 = vmatpush.msra.mxu3 %v87_v14  ;;  %v359_v16 = vld [vmem:[%s9147_s1 + $0xa60] sm:$0xff]  ;;  %v536_v14 = vld [vmem:[%s9147_s1 + $0xfe8] sm:$0xff] }
 0x2b3   :  { %3340 = vmatpush.msra.mxu0 %v1031_v47  ;;  %3916 = vmatmul.msk.f32.vlgmr.msrb.gmra.mxu1 %vm1595_vm0, %v7263_v0  ;;  %v423_v0 = vld [vmem:[%s9147_s1 + $0xc60] sm:$0xff]  ;;  %v2896_v56 = vpop.f32.mrf.mxu2 }
 0x2b4   :  { %3304 = vmatpush.msra.mxu1 %v455_v22  ;;  %3324 = vmatpush.msra.mxu2 %v711_v49  ;;  %v2897_v37 = vadd.f32 %v2896_v56, %v2876_v31  ;;  %v615_v17 = vld [vmem:[%s9147_s1 + $0x1260] sm:$0xff]  ;;  %v504_v56 = vld [vmem:[%s9147_s1 + $0xee8] sm:$0xff] }
 0x2b5   :  { %3341 = vmatpush.msra.mxu0 %v1015_v8  ;;  %3292 = vmatpush.msra.mxu3 %v71_v53  ;;  %v919_v38 = vld [vmem:[%s9147_s1 + $0x1be0] sm:$0xff]  ;;  %v2936_v2 = vpop.f32.mrf.mxu1  ;;  %v488_v31 = vld [vmem:[%s9147_s1 + $0xe68] sm:$0xff] }
 0x2b6   :  { %3305 = vmatpush.msra.mxu1 %v439_v5  ;;  %3325 = vmatpush.msra.mxu2 %v695_v51  ;;  %v2917_v12 = vadd.f32 %v2916_v7, %v2897_v37  ;;  %v1271_v15 = vld [vmem:[%s9147_s1 + $0x26e0] sm:$0xff]  ;;  %v248_v37 = vld [vmem:[%s9147_s1 + $0x6e8] sm:$0xff] }
 0x2b7   :  { %3342 = vmatpush.msra.mxu0 %v999_v52  ;;  %3293 = vmatpush.msra.mxu3 %v55_v18  ;;  %v343_v28 = vld [vmem:[%s9147_s1 + $0x9e0] sm:$0xff]  ;;  %v280_v18 = vld [vmem:[%s9147_s1 + $0x7e8] sm:$0xff] }
 0x2b8   :  { %3306 = vmatpush.msra.mxu1 %v423_v0  ;;  %3326 = vmatpush.msra.mxu2 %v679_v25  ;;  %v599_v24 = vld [vmem:[%s9147_s1 + $0x11e0] sm:$0xff]  ;;  %v2937_v30 = vadd.f32 %v2936_v2, %v2917_v12  ;;  %v8070_v0 = vld [vmem:[%s9148_s0 + $0x10] sm:$0xff]  ;;  %v520_v25 = vld [vmem:[%s9147_s1 + $0xf68] sm:$0xff] }
 0x2b9   :  { %3343 = vmatpush.msra.mxu0 %v983_v34  ;;  %3294 = vmatpush.msra.mxu3 %v39_v61  ;;  %v903_v54 = vld [vmem:[%s9147_s1 + $0x1b60] sm:$0xff]  ;;  %v8097_v61 = vld [vmem:[%s9148_s0 + $0x8] sm:$0xff] }
 0x2ba   :  { %3307 = vmatpush.msra.mxu1 %v407_v57  ;;  %3327 = vmatpush.msra.mxu2 %v663_v58  ;;  %v1255_v60 = vld [vmem:[%s9147_s1 + $0x2660] sm:$0xff]  ;;  %v232_v7 = vld [vmem:[%s9147_s1 + $0x668] sm:$0xff] }
 0x2bb   :  { %3344 = vmatpush.msra.mxu0 %v967_v40  ;;  %3359 = vmatpush.msrb.mxu3 %v1303_v21  ;;  %v327_v26 = vld [vmem:[%s9147_s1 + $0x960] sm:$0xff]  ;;  %v264_v40 = vld [vmem:[%s9147_s1 + $0x768] sm:$0xff] }
 0x2bc   :  { %3308 = vmatpush.msra.mxu1 %v391_v62  ;;  %3328 = vmatpush.msra.mxu2 %v647_v63  ;;  %v583_v29 = vld [vmem:[%s9147_s1 + $0x1160] sm:$0xff]  ;;  %v184_v2 = vld [vmem:[%s9147_s1 + $0x4e8] sm:$0xff] }
 0x2bd   :  { %3345 = vmatpush.msra.mxu0 %v951_v3  ;;  %3360 = vmatpush.msrb.mxu3 %v1287_v11  ;;  %v887_v23 = vld [vmem:[%s9147_s1 + $0x1ae0] sm:$0xff]  ;;  %v472_v3 = vld [vmem:[%s9147_s1 + $0xde8] sm:$0xff] }
 0x2be   :  { %3309 = vmatpush.msra.mxu1 %v375_v59  ;;  %3329 = vmatpush.msra.mxu2 %v631_v4  ;;  %v1239_v33 = vld [vmem:[%s9147_s1 + $0x25e0] sm:$0xff]  ;;  %v2956_v42 = vpop.f32.mrf.mxu0  ;;  %v8124_v4 = vld [vmem:[%s9148_s0 + $0x18] sm:$0xff] }
 0x2bf   :  { %3346 = vmatpush.msra.mxu0 %v935_v9  ;;  %v2976_v20 = vpop.f32.mrf.mxu2  ;;  %3361 = vmatpush.msrb.mxu3 %v1271_v15  ;;  %v311_v50 = vld [vmem:[%s9147_s1 + $0x8e0] sm:$0xff]  ;;  %v2957_v10 = vadd.f32 %v2956_v42, %v2937_v30  ;;  %v456_v9 = vld [vmem:[%s9147_s1 + $0xd68] sm:$0xff] }
 0x2c0   :  { %3310 = vmatpush.msra.mxu1 %v359_v16  ;;  %3330 = vmatpush.msra.mxu2 %v615_v17  ;;  %v567_v13 = vld [vmem:[%s9147_s1 + $0x10e0] sm:$0xff]  ;;  %v216_v16 = vld [vmem:[%s9147_s1 + $0x5e8] sm:$0xff] }
 0x2c1   :  { %3347 = vmatpush.msra.mxu0 %v919_v38  ;;  %3362 = vmatpush.msrb.mxu3 %v1255_v60  ;;  %v871_v55 = vld [vmem:[%s9147_s1 + $0x1a60] sm:$0xff]  ;;  %v2977_v32 = vadd.f32 %v2976_v20, %v2957_v10  ;;  %v440_v17 = vld [vmem:[%s9147_s1 + $0xce8] sm:$0xff] }
 0x2c2   :  { %3311 = vmatpush.msra.mxu1 %v343_v28  ;;  %3331 = vmatpush.msra.mxu2 %v599_v24  ;;  %v1223_v46 = vld [vmem:[%s9147_s1 + $0x2560] sm:$0xff]  ;;  %v200_v28 = vld [vmem:[%s9147_s1 + $0x568] sm:$0xff] }
 0x2c3   :  { %3348 = vmatpush.msra.mxu0 %v903_v54  ;;  %3363 = vmatpush.msrb.mxu3 %v1239_v33  ;;  %v295_v35 = vld [vmem:[%s9147_s1 + $0x860] sm:$0xff]  ;;  %v424_v24 = vld [vmem:[%s9147_s1 + $0xc68] sm:$0xff] }
 0x2c4   :  { %3312 = vmatpush.msra.mxu1 %v327_v26  ;;  %3332 = vmatpush.msra.mxu2 %v583_v29  ;;  %v551_v45 = vld [vmem:[%s9147_s1 + $0x1060] sm:$0xff]  ;;  %v408_v20 = vld [vmem:[%s9147_s1 + $0xbe8] sm:$0xff] }
 0x2c5   :  { %3349 = vmatpush.msra.mxu0 %v887_v23  ;;  %v855_v41 = vld [vmem:[%s9147_s1 + $0x19e0] sm:$0xff]  ;;  %3364 = vmatpush.msrb.mxu3 %v1223_v46  ;;  %v168_v29 = vld [vmem:[%s9147_s1 + $0x468] sm:$0xff] }
 0x2c6   :  { %3313 = vmatpush.msra.mxu1 %v311_v50  ;;  %3333 = vmatpush.msra.mxu2 %v567_v13  ;;  %v1207_v36 = vld [vmem:[%s9147_s1 + $0x24e0] sm:$0xff]  ;;  %v792_v30 = vld [vmem:[%s9147_s1 + $0x17e8] sm:$0xff] }
 0x2c7   :  { %3350 = vmatpush.msra.mxu0 %v871_v55  ;;  %v1559_v43 = vld [vmem:[%s9147_s1 + $0x2fe0] sm:$0xff]  ;;  %3365 = vmatpush.msrb.mxu3 %v1207_v36  ;;  %v2996_v48 = vpop.f32.mrf.mxu2  ;;  %v392_v33 = vld [vmem:[%s9147_s1 + $0xb68] sm:$0xff]  ;;  %v8220_v36 = vld [vmem:[%s9148_s0 + $0x30] sm:$0xff] }
 0x2c8   :  { %v1591_v27 = vld [vmem:[%s9147_s1 + $0x30e0] sm:$0xff]  ;;  %3314 = vmatpush.msra.mxu1 %v295_v35  ;;  %3334 = vmatpush.msra.mxu2 %v551_v45  ;;  %v8051_v8 = vadd.f32 %v2996_v48, %v2977_v32  ;;  %v152_v50 = vld [vmem:[%s9147_s1 + $0x3e8] sm:$0xff] }
 0x2c9   :  { %v839_v1 = vld [vmem:[%s9147_s1 + $0x1960] sm:$0xff]  ;;  %3351 = vmatpush.msra.mxu0 %v855_v41  ;;  %3335 = vmatmul.f32.vlgmr.msra.gmra.mxu2 %v8070_v0  ;;  %v776_v13 = vld [vmem:[%s9147_s1 + $0x1768] sm:$0xff] }
 0x2ca   :  { %v1191_v19 = vld [vmem:[%s9147_s1 + $0x2460] sm:$0xff]  ;;  %3379 = vmatpush.msrb.mxu1 %v1559_v43  ;;  %3413 = vmatpush.msrb.mxu2 %v1591_v27  ;;  %v3847_v53 = vmax.f32 %v7777_v6, %v8051_v8  ;;  %v376_v10 = vld [vmem:[%s9147_s1 + $0xae8] sm:$0xff]  ;;  %v521_v8 = vld [vmem:[%s9147_s1 + $0xf70] sm:$0xff] }
 0x2cb   :  { %v1543_v39 = vld [vmem:[%s9147_s1 + $0x2f60] sm:$0xff]  ;;  %3352 = vmatpush.msra.mxu0 %v839_v1  ;;  %3366 = vmatpush.msrb.mxu3 %v1191_v19  ;;  %v136_v46 = vld [vmem:[%s9147_s1 + $0x368] sm:$0xff] }
 0x2cc   :  { %v1575_v44 = vld [vmem:[%s9147_s1 + $0x3060] sm:$0xff]  ;;  %3380 = vmatpush.msrb.mxu1 %v1543_v39  ;;  %v360_v35 = vld [vmem:[%s9147_s1 + $0xa68] sm:$0xff] }
 0x2cd   :  { %v823_v47 = vld [vmem:[%s9147_s1 + $0x18e0] sm:$0xff]  ;;  %3414 = vmatpush.msrb.mxu2 %v1575_v44  ;;  %3315 = vmatmul.f32.vlgmr.msra.gmra.mxu1 %v8097_v61  ;;  %v120_v32 = vld [vmem:[%s9147_s1 + $0x2e8] sm:$0xff] }
 0x2ce   :  { %v8045_v22 = vld [vmem:[%s9148_s0] sm:$0xff]  ;;  %3353 = vmatpush.msra.mxu0 %v823_v47  ;;  %v760_v41 = vld [vmem:[%s9147_s1 + $0x16e8] sm:$0xff] }
 0x2cf   :  { %3295 = vmatmul.f32.vlgmr.msra.gmra.mxu3 %v8045_v22  ;;  %v1175_v49 = vld [vmem:[%s9147_s1 + $0x23e0] sm:$0xff]  ;;  %3439 = vmatpush.msra.mxu2 %v536_v14  ;;  %v344_v43 = vld [vmem:[%s9147_s1 + $0x9e8] sm:$0xff] }
 0x2d0   :  { %v1527_v5 = vld [vmem:[%s9147_s1 + $0x2ee0] sm:$0xff]  ;;  %3367 = vmatpush.msrb.mxu3 %v1175_v49  ;;  %v104_v1 = vld [vmem:[%s9147_s1 + $0x268] sm:$0xff] }
 0x2d1   :  { %v807_v51 = vld [vmem:[%s9147_s1 + $0x1860] sm:$0xff]  ;;  %3381 = vmatpush.msrb.mxu1 %v1527_v5  ;;  %3440 = vmatpush.msra.mxu2 %v520_v25  ;;  %v744_v19 = vld [vmem:[%s9147_s1 + $0x1668] sm:$0xff] }
 0x2d2   :  { %v1159_v52 = vld [vmem:[%s9147_s1 + $0x2360] sm:$0xff]  ;;  %3354 = vmatpush.msra.mxu0 %v807_v51  ;;  %3917 = vmatmul.msk.f32.vlgmr.msrb.gmra.mxu2 %vm1595_vm0, %v8220_v36  ;;  %v328_v39 = vld [vmem:[%s9147_s1 + $0x968] sm:$0xff] }
 0x2d3   :  { %v1511_v34 = vld [vmem:[%s9147_s1 + $0x2e60] sm:$0xff]  ;;  %3368 = vmatpush.msrb.mxu3 %v1159_v52  ;;  %3441 = vmatpush.msra.mxu2 %v504_v56  ;;  %v88_v47 = vld [vmem:[%s9147_s1 + $0x1e8] sm:$0xff] }
 0x2d4   :  { %v1143_v57 = vld [vmem:[%s9147_s1 + $0x22e0] sm:$0xff]  ;;  %3382 = vmatpush.msrb.mxu1 %v1511_v34  ;;  %3419 = vmatpush.msrb.mxu0 %v280_v18  ;;  %v312_v48 = vld [vmem:[%s9147_s1 + $0x8e8] sm:$0xff] }
 0x2d5   :  { %v1495_v58 = vld [vmem:[%s9147_s1 + $0x2de0] sm:$0xff]  ;;  %3369 = vmatpush.msrb.mxu3 %v1143_v57  ;;  %3442 = vmatpush.msra.mxu2 %v488_v31  ;;  %v1048_v49 = vld [vmem:[%s9147_s1 + $0x1fe8] sm:$0xff] }
 0x2d6   :  { %v1127_v62 = vld [vmem:[%s9147_s1 + $0x2260] sm:$0xff]  ;;  %3383 = vmatpush.msrb.mxu1 %v1495_v58  ;;  %3420 = vmatpush.msrb.mxu0 %v264_v40  ;;  %v728_v14 = vld [vmem:[%s9147_s1 + $0x15e8] sm:$0xff] }
 0x2d7   :  { %v1479_v63 = vld [vmem:[%s9147_s1 + $0x2d60] sm:$0xff]  ;;  %3370 = vmatpush.msrb.mxu3 %v1127_v62  ;;  %3355 = vmatmul.f32.vlgmr.msra.gmra.mxu0 %v8124_v4  ;;  %v72_v5 = vld [vmem:[%s9147_s1 + $0x168] sm:$0xff] }
 0x2d8   :  { %v1111_v21 = vld [vmem:[%s9147_s1 + $0x21e0] sm:$0xff]  ;;  %3384 = vmatpush.msrb.mxu1 %v1479_v63  ;;  %3421 = vmatpush.msrb.mxu0 %v248_v37  ;;  %v8260_v51 = vld [vmem:[%s9148_s0 + $0x28] sm:$0xff] }
 0x2d9   :  { %v1463_v59 = vld [vmem:[%s9147_s1 + $0x2ce0] sm:$0xff]  ;;  %3443 = vmatpush.msra.mxu2 %v472_v3  ;;  %3371 = vmatpush.msrb.mxu3 %v1111_v21  ;;  %v296_v52 = vld [vmem:[%s9147_s1 + $0x868] sm:$0xff] }
 0x2da   :  { %v1095_v11 = vld [vmem:[%s9147_s1 + $0x2160] sm:$0xff]  ;;  %3385 = vmatpush.msrb.mxu1 %v1463_v59  ;;  %3422 = vmatpush.msrb.mxu0 %v232_v7  ;;  %v1032_v25 = vld [vmem:[%s9147_s1 + $0x1f68] sm:$0xff]  ;;  %v3016_v59 = vpop.f32.mrf.mxu1 }
 0x2db   :  { %v1447_v12 = vld [vmem:[%s9147_s1 + $0x2c60] sm:$0xff]  ;;  %3444 = vmatpush.msra.mxu2 %v456_v9  ;;  %3372 = vmatpush.msrb.mxu3 %v1095_v11  ;;  %v712_v34 = vld [vmem:[%s9147_s1 + $0x1568] sm:$0xff]  ;;  %v3036_v7 = vpop.f32.mrf.mxu3 }
 0x2dc   :  { %v1079_v38 = vld [vmem:[%s9147_s1 + $0x20e0] sm:$0xff]  ;;  %3386 = vmatpush.msrb.mxu1 %v1447_v12  ;;  %3423 = vmatpush.msrb.mxu0 %v216_v16  ;;  %v1560_v18 = vld [vmem:[%s9147_s1 + $0x2fe8] sm:$0xff] }
 0x2dd   :  { %v1431_v15 = vld [vmem:[%s9147_s1 + $0x2be0] sm:$0xff]  ;;  %3445 = vmatpush.msra.mxu2 %v440_v17  ;;  %3373 = vmatpush.msrb.mxu3 %v1079_v38  ;;  %v56_v56 = vld [vmem:[%s9147_s1 + $0xe8] sm:$0xff] }
 0x2de   :  { %v1063_v54 = vld [vmem:[%s9147_s1 + $0x2060] sm:$0xff]  ;;  %3387 = vmatpush.msrb.mxu1 %v1431_v15  ;;  %3424 = vmatpush.msrb.mxu0 %v200_v28  ;;  %v1016_v57 = vld [vmem:[%s9147_s1 + $0x1ee8] sm:$0xff]  ;;  %v3037_v15 = vadd.f32 %v3036_v7, %v3016_v59 }
 0x2df   :  { %v1415_v60 = vld [vmem:[%s9147_s1 + $0x2b60] sm:$0xff]  ;;  %3446 = vmatpush.msra.mxu2 %v424_v24  ;;  %3374 = vmatpush.msrb.mxu3 %v1063_v54  ;;  %v696_v58 = vld [vmem:[%s9147_s1 + $0x14e8] sm:$0xff]  ;;  %v3056_v54 = vpop.f32.mrf.mxu0 }
 0x2e0   :  { %v1399_v26 = vld [vmem:[%s9147_s1 + $0x2ae0] sm:$0xff]  ;;  %3388 = vmatpush.msrb.mxu1 %v1415_v60  ;;  %3425 = vmatpush.msrb.mxu0 %v184_v2  ;;  %v1544_v40 = vld [vmem:[%s9147_s1 + $0x2f68] sm:$0xff] }
 0x2e1   :  { %v8181_v23 = vld [vmem:[%s9148_s0 + $0x20] sm:$0xff]  ;;  %3447 = vmatpush.msra.mxu2 %v408_v20  ;;  %3459 = vmatpush.msra.mxu3 %v792_v30  ;;  %v40_v31 = vld [vmem:[%s9147_s1 + $0x68] sm:$0xff] }
 0x2e2   :  { %3375 = vmatmul.f32.vlgmr.msrb.gmra.mxu3 %v8181_v23  ;;  %v1383_v42 = vld [vmem:[%s9147_s1 + $0x2a60] sm:$0xff]  ;;  %3389 = vmatpush.msrb.mxu1 %v1399_v26  ;;  %v1000_v62 = vld [vmem:[%s9147_s1 + $0x1e68] sm:$0xff] }
 0x2e3   :  { %3426 = vmatpush.msrb.mxu0 %v168_v29  ;;  %v1367_v55 = vld [vmem:[%s9147_s1 + $0x29e0] sm:$0xff]  ;;  %3448 = vmatpush.msra.mxu2 %v392_v33  ;;  %v680_v63 = vld [vmem:[%s9147_s1 + $0x1468] sm:$0xff]  ;;  %v3057_v33 = vadd.f32 %v3056_v54, %v3037_v15  ;;  %v265_v15 = vld [vmem:[%s9147_s1 + $0x770] sm:$0xff] }
 0x2e4   :  { %3390 = vmatpush.msrb.mxu1 %v1383_v42  ;;  %v1351_v45 = vld [vmem:[%s9147_s1 + $0x2960] sm:$0xff]  ;;  %3460 = vmatpush.msra.mxu3 %v776_v13  ;;  %v1304_v37 = vld [vmem:[%s9147_s1 + $0x27e8] sm:$0xff]  ;;  %v3076_v13 = vpop.f32.mrf.mxu2  ;;  %v1049_v54 = vld [vmem:[%s9147_s1 + $0x1ff0] sm:$0xff] }
 0x2e5   :  { %3427 = vmatpush.msrb.mxu0 %v152_v50  ;;  %3449 = vmatpush.msra.mxu2 %v376_v10  ;;  %v1335_v27 = vld [vmem:[%s9147_s1 + $0x28e0] sm:$0xff]  ;;  %v1528_v3 = vld [vmem:[%s9147_s1 + $0x2ee8] sm:$0xff] }
 0x2e6   :  { %3391 = vmatpush.msrb.mxu1 %v1367_v55  ;;  %3461 = vmatpush.msra.mxu3 %v760_v41  ;;  %v1319_v44 = vld [vmem:[%s9147_s1 + $0x2860] sm:$0xff]  ;;  %v984_v21 = vld [vmem:[%s9147_s1 + $0x1de8] sm:$0xff]  ;;  %v3077_v41 = vadd.f32 %v3076_v13, %v3057_v33  ;;  %v1017_v33 = vld [vmem:[%s9147_s1 + $0x1ef0] sm:$0xff] }
 0x2e7   :  { %3428 = vmatpush.msrb.mxu0 %v136_v46  ;;  %3450 = vmatpush.msra.mxu2 %v360_v35  ;;  %v664_v9 = vld [vmem:[%s9147_s1 + $0x13e8] sm:$0xff]  ;;  %v793_v13 = vld [vmem:[%s9147_s1 + $0x17f0] sm:$0xff] }
 0x2e8   :  { %3392 = vmatpush.msrb.mxu1 %v1351_v45  ;;  %3462 = vmatpush.msra.mxu3 %v744_v19  ;;  %v1288_v11 = vld [vmem:[%s9147_s1 + $0x2768] sm:$0xff] }
 0x2e9   :  { %3429 = vmatpush.msrb.mxu0 %v120_v32  ;;  %3451 = vmatpush.msra.mxu2 %v344_v43  ;;  %v1512_v12 = vld [vmem:[%s9147_s1 + $0x2e68] sm:$0xff] }
 0x2ea   :  { %3393 = vmatpush.msrb.mxu1 %v1335_v27  ;;  %3463 = vmatpush.msra.mxu3 %v728_v14  ;;  %v968_v16 = vld [vmem:[%s9147_s1 + $0x1d68] sm:$0xff] }
 0x2eb   :  { %3430 = vmatpush.msrb.mxu0 %v104_v1  ;;  %3452 = vmatpush.msra.mxu2 %v328_v39  ;;  %v648_v17 = vld [vmem:[%s9147_s1 + $0x1368] sm:$0xff] }
 0x2ec   :  { %3394 = vmatpush.msrb.mxu1 %v1319_v44  ;;  %3464 = vmatpush.msra.mxu3 %v712_v34  ;;  %v1272_v38 = vld [vmem:[%s9147_s1 + $0x26e8] sm:$0xff] }
 0x2ed   :  { %3395 = vmatmul.f32.vlgmr.msrb.gmra.mxu1 %v8260_v51  ;;  %3431 = vmatpush.msrb.mxu0 %v88_v47  ;;  %v1496_v28 = vld [vmem:[%s9147_s1 + $0x2de8] sm:$0xff] }
 0x2ee   :  { %3453 = vmatpush.msra.mxu2 %v312_v48  ;;  %3479 = vmatpush.msra.mxu1 %v1048_v49  ;;  %v952_v24 = vld [vmem:[%s9147_s1 + $0x1ce8] sm:$0xff] }
 0x2ef   :  { %3432 = vmatpush.msrb.mxu0 %v72_v5  ;;  %3465 = vmatpush.msra.mxu3 %v696_v58  ;;  %v632_v60 = vld [vmem:[%s9147_s1 + $0x12e8] sm:$0xff] }
 0x2f0   :  { %3454 = vmatpush.msra.mxu2 %v296_v52  ;;  %3480 = vmatpush.msra.mxu1 %v1032_v25  ;;  %v1256_v2 = vld [vmem:[%s9147_s1 + $0x2668] sm:$0xff] }
 0x2f1   :  { %3433 = vmatpush.msrb.mxu0 %v56_v56  ;;  %3466 = vmatpush.msra.mxu3 %v680_v63  ;;  %v1480_v20 = vld [vmem:[%s9147_s1 + $0x2d68] sm:$0xff] }
 0x2f2   :  { %3519 = vmatpush.msrb.mxu2 %v1560_v18  ;;  %3481 = vmatpush.msra.mxu1 %v1016_v57  ;;  %v936_v26 = vld [vmem:[%s9147_s1 + $0x1c68] sm:$0xff] }
 0x2f3   :  { %3434 = vmatpush.msrb.mxu0 %v40_v31  ;;  %3467 = vmatpush.msra.mxu3 %v664_v9  ;;  %v616_v29 = vld [vmem:[%s9147_s1 + $0x1268] sm:$0xff] }
 0x2f4   :  { %3520 = vmatpush.msrb.mxu2 %v1544_v40  ;;  %3482 = vmatpush.msra.mxu1 %v1000_v62  ;;  %v1240_v30 = vld [vmem:[%s9147_s1 + $0x25e8] sm:$0xff] }
 0x2f5   :  { %3499 = vmatpush.msra.mxu0 %v1304_v37  ;;  %3468 = vmatpush.msra.mxu3 %v648_v17  ;;  %v1464_v42 = vld [vmem:[%s9147_s1 + $0x2ce8] sm:$0xff] }
 0x2f6   :  { %3521 = vmatpush.msrb.mxu2 %v1528_v3  ;;  %3483 = vmatpush.msra.mxu1 %v984_v21  ;;  %v920_v50 = vld [vmem:[%s9147_s1 + $0x1be8] sm:$0xff]  ;;  %v537_v3 = vld [vmem:[%s9147_s1 + $0xff0] sm:$0xff] }
 0x2f7   :  { %3500 = vmatpush.msra.mxu0 %v1288_v11  ;;  %3469 = vmatpush.msra.mxu3 %v632_v60  ;;  %v600_v10 = vld [vmem:[%s9147_s1 + $0x11e8] sm:$0xff]  ;;  %v249_v60 = vld [vmem:[%s9147_s1 + $0x6f0] sm:$0xff] }
 0x2f8   :  { %3522 = vmatpush.msrb.mxu2 %v1512_v12  ;;  %3484 = vmatpush.msra.mxu1 %v968_v16  ;;  %v1224_v55 = vld [vmem:[%s9147_s1 + $0x2568] sm:$0xff]  ;;  %v281_v12 = vld [vmem:[%s9147_s1 + $0x7f0] sm:$0xff] }
 0x2f9   :  { %3501 = vmatpush.msra.mxu0 %v1272_v38  ;;  %3470 = vmatpush.msra.mxu3 %v616_v29  ;;  %v1448_v46 = vld [vmem:[%s9147_s1 + $0x2c68] sm:$0xff]  ;;  %v505_v16 = vld [vmem:[%s9147_s1 + $0xef0] sm:$0xff] }
 0x2fa   :  { %3523 = vmatpush.msrb.mxu2 %v1496_v28  ;;  %3485 = vmatpush.msra.mxu1 %v952_v24  ;;  %v904_v35 = vld [vmem:[%s9147_s1 + $0x1b68] sm:$0xff]  ;;  %v489_v28 = vld [vmem:[%s9147_s1 + $0xe70] sm:$0xff] }
 0x2fb   :  { %3502 = vmatpush.msra.mxu0 %v1256_v2  ;;  %v584_v45 = vld [vmem:[%s9147_s1 + $0x1168] sm:$0xff]  ;;  %3471 = vmatpush.msra.mxu3 %v600_v10  ;;  %v3096_v39 = vpop.f32.mrf.mxu1  ;;  %v3116_v5 = vpop.f32.mrf.mxu3  ;;  %v473_v2 = vld [vmem:[%s9147_s1 + $0xdf0] sm:$0xff] }
 0x2fc   :  { %3524 = vmatpush.msrb.mxu2 %v1480_v20  ;;  %3486 = vmatpush.msra.mxu1 %v936_v26  ;;  %v1208_v32 = vld [vmem:[%s9147_s1 + $0x24e8] sm:$0xff]  ;;  %v3097_v48 = vadd.f32 %v3096_v39, %v3077_v41  ;;  %v1033_v20 = vld [vmem:[%s9147_s1 + $0x1f70] sm:$0xff] }
 0x2fd   :  { %3503 = vmatpush.msra.mxu0 %v1240_v30  ;;  %v1432_v43 = vld [vmem:[%s9147_s1 + $0x2be8] sm:$0xff]  ;;  %3472 = vmatpush.msra.mxu3 %v584_v45  ;;  %v233_v29 = vld [vmem:[%s9147_s1 + $0x670] sm:$0xff] }
 0x2fe   :  { %3525 = vmatpush.msrb.mxu2 %v1464_v42  ;;  %3487 = vmatpush.msra.mxu1 %v920_v50  ;;  %v888_v27 = vld [vmem:[%s9147_s1 + $0x1ae8] sm:$0xff]  ;;  %v3117_v34 = vadd.f32 %v3116_v5, %v3097_v48  ;;  %v457_v30 = vld [vmem:[%s9147_s1 + $0xd70] sm:$0xff] }
 0x2ff   :  { %3504 = vmatpush.msra.mxu0 %v1224_v55  ;;  %v568_v1 = vld [vmem:[%s9147_s1 + $0x10e8] sm:$0xff]  ;;  %3455 = vmatmul.f32.vlgmr.msra.gmra.mxu2 %v8097_v61  ;;  %v217_v42 = vld [vmem:[%s9147_s1 + $0x5f0] sm:$0xff] }
 0x300   :  { %3526 = vmatpush.msrb.mxu2 %v1448_v46  ;;  %3488 = vmatpush.msra.mxu1 %v904_v35  ;;  %v1192_v19 = vld [vmem:[%s9147_s1 + $0x2468] sm:$0xff]  ;;  %v3136_v40 = vpop.f32.mrf.mxu0  ;;  %v441_v50 = vld [vmem:[%s9147_s1 + $0xcf0] sm:$0xff] }
 0x301   :  { %3505 = vmatpush.msra.mxu0 %v1208_v32  ;;  %v1416_v44 = vld [vmem:[%s9147_s1 + $0x2b68] sm:$0xff]  ;;  %3473 = vmatpush.msra.mxu3 %v568_v1  ;;  %v3137_v62 = vadd.f32 %v3136_v40, %v3117_v34  ;;  %v1001_v10 = vld [vmem:[%s9147_s1 + $0x1e70] sm:$0xff] }
 0x302   :  { %v872_v47 = vld [vmem:[%s9147_s1 + $0x1a68] sm:$0xff]  ;;  %3527 = vmatpush.msrb.mxu2 %v1432_v43  ;;  %3489 = vmatpush.msra.mxu1 %v888_v27  ;;  %v201_v55 = vld [vmem:[%s9147_s1 + $0x570] sm:$0xff] }
 0x303   :  { %v552_v49 = vld [vmem:[%s9147_s1 + $0x1068] sm:$0xff]  ;;  %3506 = vmatpush.msra.mxu0 %v1192_v19  ;;  %v8428_v21 = vmax.f32 %v3847_v53, %v3137_v62  ;;  %v425_v46 = vld [vmem:[%s9147_s1 + $0xc70] sm:$0xff] }
 0x304   :  { %v1176_v14 = vld [vmem:[%s9147_s1 + $0x23e8] sm:$0xff]  ;;  %3528 = vmatpush.msrb.mxu2 %v1416_v44  ;;  %3490 = vmatpush.msra.mxu1 %v872_v47  ;;  %v777_v35 = vld [vmem:[%s9147_s1 + $0x1770] sm:$0xff] }
 0x305   :  { %v1400_v52 = vld [vmem:[%s9147_s1 + $0x2ae8] sm:$0xff]  ;;  %3474 = vmatpush.msra.mxu3 %v552_v49  ;;  %3507 = vmatpush.msra.mxu0 %v1176_v14  ;;  %v985_v45 = vld [vmem:[%s9147_s1 + $0x1df0] sm:$0xff] }
 0x306   :  { %v856_v25 = vld [vmem:[%s9147_s1 + $0x19e8] sm:$0xff]  ;;  %3529 = vmatpush.msrb.mxu2 %v1400_v52  ;;  %3475 = vmatmul.f32.vlgmr.msra.gmra.mxu3 %v8070_v0  ;;  %v185_v32 = vld [vmem:[%s9147_s1 + $0x4f0] sm:$0xff] }
 0x307   :  { %v1592_v18 = vld [vmem:[%s9147_s1 + $0x30e8] sm:$0xff]  ;;  %3491 = vmatpush.msra.mxu1 %v856_v25  ;;  %3435 = vmatmul.f32.vlgmr.msrb.gmra.mxu0 %v8045_v22  ;;  %v409_v41 = vld [vmem:[%s9147_s1 + $0xbf0] sm:$0xff] }
 0x308   :  { %v1160_v56 = vld [vmem:[%s9147_s1 + $0x2368] sm:$0xff]  ;;  %3553 = vmatpush.msrb.mxu3 %v1592_v18  ;;  %v761_v43 = vld [vmem:[%s9147_s1 + $0x16f0] sm:$0xff] }
 0x309   :  { %v1384_v57 = vld [vmem:[%s9147_s1 + $0x2a68] sm:$0xff]  ;;  %3508 = vmatpush.msra.mxu0 %v1160_v56  ;;  %v969_v27 = vld [vmem:[%s9147_s1 + $0x1d70] sm:$0xff] }
 0x30a   :  { %v840_v58 = vld [vmem:[%s9147_s1 + $0x1968] sm:$0xff]  ;;  %3530 = vmatpush.msrb.mxu2 %v1384_v57  ;;  %v169_v1 = vld [vmem:[%s9147_s1 + $0x470] sm:$0xff] }
 0x30b   :  { %v1576_v31 = vld [vmem:[%s9147_s1 + $0x3068] sm:$0xff]  ;;  %3492 = vmatpush.msra.mxu1 %v840_v58  ;;  %v393_v19 = vld [vmem:[%s9147_s1 + $0xb70] sm:$0xff] }
 0x30c   :  { %v1144_v63 = vld [vmem:[%s9147_s1 + $0x22e8] sm:$0xff]  ;;  %3554 = vmatpush.msrb.mxu3 %v1576_v31  ;;  %v745_v39 = vld [vmem:[%s9147_s1 + $0x1670] sm:$0xff] }
 0x30d   :  { %v1368_v37 = vld [vmem:[%s9147_s1 + $0x29e8] sm:$0xff]  ;;  %3509 = vmatpush.msra.mxu0 %v1144_v63  ;;  %v953_v44 = vld [vmem:[%s9147_s1 + $0x1cf0] sm:$0xff] }
 0x30e   :  { %v824_v59 = vld [vmem:[%s9147_s1 + $0x18e8] sm:$0xff]  ;;  %3531 = vmatpush.msrb.mxu2 %v1368_v37  ;;  %3579 = vmatpush.msra.mxu3 %v537_v3  ;;  %v153_v47 = vld [vmem:[%s9147_s1 + $0x3f0] sm:$0xff] }
 0x30f   :  { %v1128_v7 = vld [vmem:[%s9147_s1 + $0x2268] sm:$0xff]  ;;  %3493 = vmatpush.msra.mxu1 %v824_v59  ;;  %3918 = vmatmul.msk.f32.vlgmr.msrb.gmra.mxu3 %vm1595_vm0, %v8220_v36  ;;  %v377_v48 = vld [vmem:[%s9147_s1 + $0xaf0] sm:$0xff] }
 0x310   :  { %v1352_v6 = vld [vmem:[%s9147_s1 + $0x2968] sm:$0xff]  ;;  %3510 = vmatpush.msra.mxu0 %v1128_v7  ;;  %3580 = vmatpush.msra.mxu3 %v521_v8  ;;  %v729_v49 = vld [vmem:[%s9147_s1 + $0x15f0] sm:$0xff] }
 0x311   :  { %v808_v53 = vld [vmem:[%s9147_s1 + $0x1868] sm:$0xff]  ;;  %3532 = vmatpush.msrb.mxu2 %v1352_v6  ;;  %v937_v14 = vld [vmem:[%s9147_s1 + $0x1c70] sm:$0xff] }
 0x312   :  { %v1112_v9 = vld [vmem:[%s9147_s1 + $0x21e8] sm:$0xff]  ;;  %3494 = vmatpush.msra.mxu1 %v808_v53  ;;  %3581 = vmatpush.msra.mxu3 %v505_v16  ;;  %v137_v5 = vld [vmem:[%s9147_s1 + $0x370] sm:$0xff] }
 0x313   :  { %v1336_v11 = vld [vmem:[%s9147_s1 + $0x28e8] sm:$0xff]  ;;  %3511 = vmatpush.msra.mxu0 %v1112_v9  ;;  %3495 = vmatmul.f32.vlgmr.msra.gmra.mxu1 %v8124_v4  ;;  %v361_v52 = vld [vmem:[%s9147_s1 + $0xa70] sm:$0xff] }
 0x314   :  { %v1096_v17 = vld [vmem:[%s9147_s1 + $0x2168] sm:$0xff]  ;;  %3533 = vmatpush.msrb.mxu2 %v1336_v11  ;;  %3559 = vmatpush.msrb.mxu1 %v281_v12  ;;  %v713_v25 = vld [vmem:[%s9147_s1 + $0x1570] sm:$0xff] }
 0x315   :  { %v1320_v38 = vld [vmem:[%s9147_s1 + $0x2868] sm:$0xff]  ;;  %3512 = vmatpush.msra.mxu0 %v1096_v17  ;;  %3582 = vmatpush.msra.mxu3 %v489_v28  ;;  %v921_v34 = vld [vmem:[%s9147_s1 + $0x1bf0] sm:$0xff] }
 0x316   :  { %v1080_v24 = vld [vmem:[%s9147_s1 + $0x20e8] sm:$0xff]  ;;  %3534 = vmatpush.msrb.mxu2 %v1320_v38  ;;  %3560 = vmatpush.msrb.mxu1 %v265_v15  ;;  %v121_v18 = vld [vmem:[%s9147_s1 + $0x2f0] sm:$0xff] }
 0x317   :  { %3535 = vmatmul.f32.vlgmr.msrb.gmra.mxu2 %v8260_v51  ;;  %3513 = vmatpush.msra.mxu0 %v1080_v24  ;;  %v1064_v26 = vld [vmem:[%s9147_s1 + $0x2068] sm:$0xff]  ;;  %v345_v56 = vld [vmem:[%s9147_s1 + $0x9f0] sm:$0xff] }
 0x318   :  { %3619 = vmatpush.msra.mxu2 %v1049_v54  ;;  %3561 = vmatpush.msrb.mxu1 %v249_v60  ;;  %v697_v57 = vld [vmem:[%s9147_s1 + $0x14f0] sm:$0xff] }
 0x319   :  { %3583 = vmatpush.msra.mxu3 %v473_v2  ;;  %3514 = vmatpush.msra.mxu0 %v1064_v26  ;;  %v905_v58 = vld [vmem:[%s9147_s1 + $0x1b70] sm:$0xff] }
 0x31a   :  { %3620 = vmatpush.msra.mxu2 %v1033_v20  ;;  %3562 = vmatpush.msrb.mxu1 %v233_v29  ;;  %v105_v40 = vld [vmem:[%s9147_s1 + $0x270] sm:$0xff] }
 0x31b   :  { %3584 = vmatpush.msra.mxu3 %v457_v30  ;;  %3515 = vmatmul.f32.vlgmr.msra.gmra.mxu0 %v8181_v23  ;;  %v329_v31 = vld [vmem:[%s9147_s1 + $0x970] sm:$0xff] }
 0x31c   :  { %3621 = vmatpush.msra.mxu2 %v1017_v33  ;;  %3563 = vmatpush.msrb.mxu1 %v217_v42  ;;  %v681_v62 = vld [vmem:[%s9147_s1 + $0x1470] sm:$0xff]  ;;  %v282_v33 = vld [vmem:[%s9147_s1 + $0x7f8] sm:$0xff] }
 0x31d   :  { %3585 = vmatpush.msra.mxu3 %v441_v50  ;;  %3599 = vmatpush.msrb.mxu0 %v793_v13  ;;  %v889_v63 = vld [vmem:[%s9147_s1 + $0x1af0] sm:$0xff] }
 0x31e   :  { %3622 = vmatpush.msra.mxu2 %v1001_v10  ;;  %3564 = vmatpush.msrb.mxu1 %v201_v55  ;;  %v89_v37 = vld [vmem:[%s9147_s1 + $0x1f0] sm:$0xff]  ;;  %v266_v10 = vld [vmem:[%s9147_s1 + $0x778] sm:$0xff] }
 0x31f   :  { %3586 = vmatpush.msra.mxu3 %v425_v46  ;;  %3600 = vmatpush.msrb.mxu0 %v777_v35  ;;  %v313_v3 = vld [vmem:[%s9147_s1 + $0x8f0] sm:$0xff] }
 0x320   :  { %3623 = vmatpush.msra.mxu2 %v985_v45  ;;  %3565 = vmatpush.msrb.mxu1 %v185_v32  ;;  %v665_v59 = vld [vmem:[%s9147_s1 + $0x13f0] sm:$0xff] }
 0x321   :  { %3587 = vmatpush.msra.mxu3 %v409_v41  ;;  %3601 = vmatpush.msrb.mxu0 %v761_v43  ;;  %v873_v7 = vld [vmem:[%s9147_s1 + $0x1a70] sm:$0xff]  ;;  %v234_v43 = vld [vmem:[%s9147_s1 + $0x678] sm:$0xff] }
 0x322   :  { %3624 = vmatpush.msra.mxu2 %v969_v27  ;;  %3566 = vmatpush.msrb.mxu1 %v169_v1  ;;  %v73_v6 = vld [vmem:[%s9147_s1 + $0x170] sm:$0xff] }
 0x323   :  { %3588 = vmatpush.msra.mxu3 %v393_v19  ;;  %3602 = vmatpush.msrb.mxu0 %v745_v39  ;;  %v297_v8 = vld [vmem:[%s9147_s1 + $0x870] sm:$0xff]  ;;  %v218_v19 = vld [vmem:[%s9147_s1 + $0x5f8] sm:$0xff] }
 0x324   :  { %3625 = vmatpush.msra.mxu2 %v953_v44  ;;  %3567 = vmatpush.msrb.mxu1 %v153_v47  ;;  %v649_v53 = vld [vmem:[%s9147_s1 + $0x1370] sm:$0xff]  ;;  %v538_v44 = vld [vmem:[%s9147_s1 + $0xff8] sm:$0xff] }
 0x325   :  { %3589 = vmatpush.msra.mxu3 %v377_v48  ;;  %3603 = vmatpush.msrb.mxu0 %v729_v49  ;;  %v857_v9 = vld [vmem:[%s9147_s1 + $0x19f0] sm:$0xff]  ;;  %v522_v49 = vld [vmem:[%s9147_s1 + $0xf78] sm:$0xff] }
 0x326   :  { %3626 = vmatpush.msra.mxu2 %v937_v14  ;;  %3568 = vmatpush.msrb.mxu1 %v137_v5  ;;  %v1561_v11 = vld [vmem:[%s9147_s1 + $0x2ff0] sm:$0xff]  ;;  %v186_v5 = vld [vmem:[%s9147_s1 + $0x4f8] sm:$0xff] }
 0x327   :  { %3590 = vmatpush.msra.mxu3 %v361_v52  ;;  %3604 = vmatpush.msrb.mxu0 %v713_v25  ;;  %v57_v12 = vld [vmem:[%s9147_s1 + $0xf0] sm:$0xff] }
 0x328   :  { %3627 = vmatpush.msra.mxu2 %v921_v34  ;;  %3569 = vmatpush.msrb.mxu1 %v121_v18  ;;  %v633_v16 = vld [vmem:[%s9147_s1 + $0x12f0] sm:$0xff]  ;;  %v170_v34 = vld [vmem:[%s9147_s1 + $0x478] sm:$0xff] }
 0x329   :  { %3591 = vmatpush.msra.mxu3 %v345_v56  ;;  %3605 = vmatpush.msrb.mxu0 %v697_v57  ;;  %v841_v17 = vld [vmem:[%s9147_s1 + $0x1970] sm:$0xff]  ;;  %v490_v56 = vld [vmem:[%s9147_s1 + $0xe78] sm:$0xff] }
 0x32a   :  { %3628 = vmatpush.msra.mxu2 %v905_v58  ;;  %3570 = vmatpush.msrb.mxu1 %v105_v40  ;;  %v1545_v38 = vld [vmem:[%s9147_s1 + $0x2f70] sm:$0xff]  ;;  %v154_v58 = vld [vmem:[%s9147_s1 + $0x3f8] sm:$0xff] }
 0x32b   :  { %3592 = vmatpush.msra.mxu3 %v329_v31  ;;  %3606 = vmatpush.msrb.mxu0 %v681_v62  ;;  %v41_v15 = vld [vmem:[%s9147_s1 + $0x70] sm:$0xff]  ;;  %v474_v31 = vld [vmem:[%s9147_s1 + $0xdf8] sm:$0xff] }
 0x32c   :  { %3629 = vmatpush.msra.mxu2 %v889_v63  ;;  %3571 = vmatpush.msrb.mxu1 %v89_v37  ;;  %v617_v28 = vld [vmem:[%s9147_s1 + $0x1270] sm:$0xff]  ;;  %v138_v63 = vld [vmem:[%s9147_s1 + $0x378] sm:$0xff] }
 0x32d   :  { %3593 = vmatpush.msra.mxu3 %v313_v3  ;;  %3607 = vmatpush.msrb.mxu0 %v665_v59  ;;  %v825_v24 = vld [vmem:[%s9147_s1 + $0x18f0] sm:$0xff]  ;;  %v458_v3 = vld [vmem:[%s9147_s1 + $0xd78] sm:$0xff] }
 0x32e   :  { %3630 = vmatpush.msra.mxu2 %v873_v7  ;;  %3572 = vmatpush.msrb.mxu1 %v73_v6  ;;  %v1305_v54 = vld [vmem:[%s9147_s1 + $0x27f0] sm:$0xff]  ;;  %v122_v7 = vld [vmem:[%s9147_s1 + $0x2f8] sm:$0xff] }
 0x32f   :  { %3594 = vmatpush.msra.mxu3 %v297_v8  ;;  %3608 = vmatpush.msrb.mxu0 %v649_v53  ;;  %v1529_v60 = vld [vmem:[%s9147_s1 + $0x2ef0] sm:$0xff]  ;;  %v442_v8 = vld [vmem:[%s9147_s1 + $0xcf8] sm:$0xff] }
 0x330   :  { %3631 = vmatpush.msra.mxu2 %v857_v9  ;;  %3573 = vmatpush.msrb.mxu1 %v57_v12  ;;  %v601_v2 = vld [vmem:[%s9147_s1 + $0x11f0] sm:$0xff]  ;;  %v106_v9 = vld [vmem:[%s9147_s1 + $0x278] sm:$0xff] }
 0x331   :  { %3659 = vmatpush.msrb.mxu3 %v1561_v11  ;;  %3609 = vmatpush.msrb.mxu0 %v633_v16  ;;  %v809_v20 = vld [vmem:[%s9147_s1 + $0x1870] sm:$0xff]  ;;  %v426_v12 = vld [vmem:[%s9147_s1 + $0xc78] sm:$0xff] }
 0x332   :  { %3632 = vmatpush.msra.mxu2 %v841_v17  ;;  %3574 = vmatpush.msrb.mxu1 %v41_v15  ;;  %v1289_v26 = vld [vmem:[%s9147_s1 + $0x2770] sm:$0xff]  ;;  %v90_v17 = vld [vmem:[%s9147_s1 + $0x1f8] sm:$0xff] }
 0x333   :  { %3660 = vmatpush.msrb.mxu3 %v1545_v38  ;;  %3610 = vmatpush.msrb.mxu0 %v617_v28  ;;  %v1513_v29 = vld [vmem:[%s9147_s1 + $0x2e70] sm:$0xff]  ;;  %v410_v38 = vld [vmem:[%s9147_s1 + $0xbf8] sm:$0xff] }
 0x334   :  { %3633 = vmatpush.msra.mxu2 %v825_v24  ;;  %3639 = vmatpush.msra.mxu1 %v1305_v54  ;;  %v585_v30 = vld [vmem:[%s9147_s1 + $0x1170] sm:$0xff]  ;;  %v74_v28 = vld [vmem:[%s9147_s1 + $0x178] sm:$0xff] }
 0x335   :  { %3661 = vmatpush.msrb.mxu3 %v1529_v60  ;;  %3611 = vmatpush.msrb.mxu0 %v601_v2  ;;  %v1273_v42 = vld [vmem:[%s9147_s1 + $0x26f0] sm:$0xff]  ;;  %v1050_v24 = vld [vmem:[%s9147_s1 + $0x1ff8] sm:$0xff] }
 0x336   :  { %3634 = vmatpush.msra.mxu2 %v809_v20  ;;  %3640 = vmatpush.msra.mxu1 %v1289_v26  ;;  %v1497_v50 = vld [vmem:[%s9147_s1 + $0x2df0] sm:$0xff]  ;;  %v394_v54 = vld [vmem:[%s9147_s1 + $0xb78] sm:$0xff] }
 0x337   :  { %3662 = vmatpush.msrb.mxu3 %v1513_v29  ;;  %3612 = vmatpush.msrb.mxu0 %v585_v30  ;;  %v569_v13 = vld [vmem:[%s9147_s1 + $0x10f0] sm:$0xff]  ;;  %v58_v2 = vld [vmem:[%s9147_s1 + $0xf8] sm:$0xff] }
 0x338   :  { %3595 = vmatmul.f32.vlgmr.msra.gmra.mxu3 %v8097_v61  ;;  %3699 = vmatpush.msrb.mxu2 %v282_v33  ;;  %v1257_v55 = vld [vmem:[%s9147_s1 + $0x2670] sm:$0xff]  ;;  %v250_v61 = vld [vmem:[%s9147_s1 + $0x6f8] sm:$0xff] }
 0x339   :  { %v1481_v46 = vld [vmem:[%s9147_s1 + $0x2d70] sm:$0xff]  ;;  %3641 = vmatpush.msra.mxu1 %v1273_v42  ;;  %3663 = vmatpush.msrb.mxu3 %v1497_v50  ;;  %v1034_v20 = vld [vmem:[%s9147_s1 + $0x1f78] sm:$0xff] }
 0x33a   :  { %v553_v35 = vld [vmem:[%s9147_s1 + $0x1070] sm:$0xff]  ;;  %3613 = vmatpush.msrb.mxu0 %v569_v13  ;;  %3700 = vmatpush.msrb.mxu2 %v266_v10  ;;  %v42_v26 = vld [vmem:[%s9147_s1 + $0x78] sm:$0xff] }
 0x33b   :  { %v1241_v45 = vld [vmem:[%s9147_s1 + $0x25f0] sm:$0xff]  ;;  %3642 = vmatpush.msra.mxu1 %v1257_v55  ;;  %3664 = vmatpush.msrb.mxu3 %v1481_v46  ;;  %v794_v29 = vld [vmem:[%s9147_s1 + $0x17f8] sm:$0xff] }
 0x33c   :  { %v1465_v32 = vld [vmem:[%s9147_s1 + $0x2cf0] sm:$0xff]  ;;  %3614 = vmatpush.msrb.mxu0 %v553_v35  ;;  %3635 = vmatmul.f32.vlgmr.msra.gmra.mxu2 %v8124_v4  ;;  %v362_v30 = vld [vmem:[%s9147_s1 + $0xa78] sm:$0xff] }
 0x33d   :  { %v1593_v41 = vld [vmem:[%s9147_s1 + $0x30f0] sm:$0xff]  ;;  %3701 = vmatpush.msrb.mxu2 %v250_v61  ;;  %3643 = vmatpush.msra.mxu1 %v1241_v45  ;;  %v1018_v33 = vld [vmem:[%s9147_s1 + $0x1ef8] sm:$0xff] }
 0x33e   :  { %v1225_v27 = vld [vmem:[%s9147_s1 + $0x2570] sm:$0xff]  ;;  %3665 = vmatpush.msrb.mxu3 %v1465_v32  ;;  %3693 = vmatpush.msra.mxu0 %v1593_v41  ;;  %v1306_v42 = vld [vmem:[%s9147_s1 + $0x27f8] sm:$0xff] }
 0x33f   :  { %v1449_v1 = vld [vmem:[%s9147_s1 + $0x2c70] sm:$0xff]  ;;  %3575 = vmatmul.f32.vlgmr.msrb.gmra.mxu1 %v8045_v22  ;;  %3702 = vmatpush.msrb.mxu2 %v234_v43  ;;  %v202_v22 = vld [vmem:[%s9147_s1 + $0x578] sm:$0xff] }
 0x340   :  { %v1577_v4 = vld [vmem:[%s9147_s1 + $0x3070] sm:$0xff]  ;;  %3644 = vmatpush.msra.mxu1 %v1225_v27  ;;  %3666 = vmatpush.msrb.mxu3 %v1449_v1  ;;  %v778_v50 = vld [vmem:[%s9147_s1 + $0x1778] sm:$0xff] }
 0x341   :  { %v1209_v39 = vld [vmem:[%s9147_s1 + $0x24f0] sm:$0xff]  ;;  %3694 = vmatpush.msra.mxu0 %v1577_v4  ;;  %3703 = vmatpush.msrb.mxu2 %v218_v19  ;;  %v1002_v13 = vld [vmem:[%s9147_s1 + $0x1e78] sm:$0xff] }
 0x342   :  { %v1433_v47 = vld [vmem:[%s9147_s1 + $0x2bf0] sm:$0xff]  ;;  %3615 = vmatmul.f32.vlgmr.msrb.gmra.mxu0 %v8070_v0  ;;  %3645 = vmatpush.msra.mxu1 %v1209_v39  ;;  %v506_v0 = vld [vmem:[%s9147_s1 + $0xef8] sm:$0xff] }
 0x343   :  { %v1193_v48 = vld [vmem:[%s9147_s1 + $0x2470] sm:$0xff]  ;;  %3719 = vmatpush.msrb.mxu0 %v538_v44  ;;  %3667 = vmatpush.msrb.mxu3 %v1433_v47  ;;  %v1290_v10 = vld [vmem:[%s9147_s1 + $0x2778] sm:$0xff] }
 0x344   :  { %v1417_v14 = vld [vmem:[%s9147_s1 + $0x2b70] sm:$0xff]  ;;  %3704 = vmatpush.msrb.mxu2 %v202_v22  ;;  %3646 = vmatpush.msra.mxu1 %v1193_v48  ;;  %v330_v55 = vld [vmem:[%s9147_s1 + $0x978] sm:$0xff] }
 0x345   :  { %v1177_v52 = vld [vmem:[%s9147_s1 + $0x23f0] sm:$0xff]  ;;  %3720 = vmatpush.msrb.mxu0 %v522_v49  ;;  %3668 = vmatpush.msrb.mxu3 %v1417_v14  ;;  %v762_v46 = vld [vmem:[%s9147_s1 + $0x16f8] sm:$0xff] }
 0x346   :  { %v1401_v25 = vld [vmem:[%s9147_s1 + $0x2af0] sm:$0xff]  ;;  %3705 = vmatpush.msrb.mxu2 %v186_v5  ;;  %3647 = vmatpush.msra.mxu1 %v1177_v52  ;;  %v986_v35 = vld [vmem:[%s9147_s1 + $0x1df8] sm:$0xff] }
 0x347   :  { %v1161_v18 = vld [vmem:[%s9147_s1 + $0x2370] sm:$0xff]  ;;  %3721 = vmatpush.msrb.mxu0 %v506_v0  ;;  %3669 = vmatpush.msrb.mxu3 %v1401_v25  ;;  %v1274_v61 = vld [vmem:[%s9147_s1 + $0x26f8] sm:$0xff] }
 0x348   :  { %v1385_v57 = vld [vmem:[%s9147_s1 + $0x2a70] sm:$0xff]  ;;  %3706 = vmatpush.msrb.mxu2 %v170_v34  ;;  %3648 = vmatpush.msra.mxu1 %v1161_v18  ;;  %v746_v45 = vld [vmem:[%s9147_s1 + $0x1678] sm:$0xff] }
 0x349   :  { %v1145_v40 = vld [vmem:[%s9147_s1 + $0x22f0] sm:$0xff]  ;;  %3722 = vmatpush.msrb.mxu0 %v490_v56  ;;  %3670 = vmatpush.msrb.mxu3 %v1385_v57  ;;  %v970_v32 = vld [vmem:[%s9147_s1 + $0x1d78] sm:$0xff] }
 0x34a   :  { %v1369_v62 = vld [vmem:[%s9147_s1 + $0x29f0] sm:$0xff]  ;;  %3707 = vmatpush.msrb.mxu2 %v154_v58  ;;  %3649 = vmatpush.msra.mxu1 %v1145_v40  ;;  %v1258_v41 = vld [vmem:[%s9147_s1 + $0x2678] sm:$0xff] }
 0x34b   :  { %v1129_v37 = vld [vmem:[%s9147_s1 + $0x2270] sm:$0xff]  ;;  %3723 = vmatpush.msrb.mxu0 %v474_v31  ;;  %3671 = vmatpush.msrb.mxu3 %v1369_v62  ;;  %v298_v43 = vld [vmem:[%s9147_s1 + $0x878] sm:$0xff] }
 0x34c   :  { %v1353_v59 = vld [vmem:[%s9147_s1 + $0x2970] sm:$0xff]  ;;  %3708 = vmatpush.msrb.mxu2 %v138_v63  ;;  %3650 = vmatpush.msra.mxu1 %v1129_v37  ;;  %v730_v27 = vld [vmem:[%s9147_s1 + $0x15f8] sm:$0xff] }
 0x34d   :  { %v1113_v6 = vld [vmem:[%s9147_s1 + $0x21f0] sm:$0xff]  ;;  %3724 = vmatpush.msrb.mxu0 %v458_v3  ;;  %3672 = vmatpush.msrb.mxu3 %v1353_v59  ;;  %v954_v1 = vld [vmem:[%s9147_s1 + $0x1cf8] sm:$0xff] }
 0x34e   :  { %v1337_v53 = vld [vmem:[%s9147_s1 + $0x28f0] sm:$0xff]  ;;  %3709 = vmatpush.msrb.mxu2 %v122_v7  ;;  %3651 = vmatpush.msra.mxu1 %v1113_v6  ;;  %v1242_v4 = vld [vmem:[%s9147_s1 + $0x25f8] sm:$0xff] }
 0x34f   :  { %v1097_v11 = vld [vmem:[%s9147_s1 + $0x2170] sm:$0xff]  ;;  %3725 = vmatpush.msrb.mxu0 %v442_v8  ;;  %3673 = vmatpush.msrb.mxu3 %v1337_v53  ;;  %v1562_v19 = vld [vmem:[%s9147_s1 + $0x2ff8] sm:$0xff] }
 0x350   :  { %v1321_v16 = vld [vmem:[%s9147_s1 + $0x2870] sm:$0xff]  ;;  %3710 = vmatpush.msrb.mxu2 %v106_v9  ;;  %3652 = vmatpush.msra.mxu1 %v1097_v11  ;;  %v714_v39 = vld [vmem:[%s9147_s1 + $0x1578] sm:$0xff] }
 0x351   :  { %v1081_v15 = vld [vmem:[%s9147_s1 + $0x20f0] sm:$0xff]  ;;  %3726 = vmatpush.msrb.mxu0 %v426_v12  ;;  %3674 = vmatpush.msrb.mxu3 %v1321_v16  ;;  %v938_v44 = vld [vmem:[%s9147_s1 + $0x1c78] sm:$0xff] }
 0x352   :  { %3675 = vmatmul.f32.vlgmr.msrb.gmra.mxu3 %v8260_v51  ;;  %3711 = vmatpush.msrb.mxu2 %v90_v17  ;;  %v1065_v60 = vld [vmem:[%s9147_s1 + $0x2070] sm:$0xff]  ;;  %v378_v51 = vld [vmem:[%s9147_s1 + $0xaf8] sm:$0xff] }
 0x353   :  { %3727 = vmatpush.msrb.mxu0 %v410_v38  ;;  %3653 = vmatpush.msra.mxu1 %v1081_v15  ;;  %v1226_v47 = vld [vmem:[%s9147_s1 + $0x2578] sm:$0xff]  ;;  %v3951_v38 = vld [vmem:[%s9148_s0] sm:$0xff] }
 0x354   :  { %3712 = vmatpush.msrb.mxu2 %v74_v28  ;;  %3759 = vmatpush.msra.mxu3 %v1050_v24  ;;  %v1546_v22 = vld [vmem:[%s9147_s1 + $0x2f78] sm:$0xff] }
 0x355   :  { %3728 = vmatpush.msrb.mxu0 %v394_v54  ;;  %3654 = vmatpush.msra.mxu1 %v1065_v60  ;;  %v698_v48 = vld [vmem:[%s9147_s1 + $0x14f8] sm:$0xff] }
 0x356   :  { %3655 = vmatmul.f32.vlgmr.msra.gmra.mxu1 %v8181_v23  ;;  %3713 = vmatpush.msrb.mxu2 %v58_v2  ;;  %v346_v23 = vld [vmem:[%s9147_s1 + $0x9f8] sm:$0xff] }
 0x357   :  { %3729 = vmatpush.msrb.mxu0 %v378_v51  ;;  %3760 = vmatpush.msra.mxu3 %v1034_v20  ;;  %v922_v49 = vld [vmem:[%s9147_s1 + $0x1bf8] sm:$0xff] }
 0x358   :  { %3714 = vmatpush.msrb.mxu2 %v42_v26  ;;  %3739 = vmatpush.msrb.mxu1 %v794_v29  ;;  %v1210_v14 = vld [vmem:[%s9147_s1 + $0x24f8] sm:$0xff] }
 0x359   :  { %3730 = vmatpush.msrb.mxu0 %v362_v30  ;;  %3761 = vmatpush.msra.mxu3 %v1018_v33  ;;  %v1530_v5 = vld [vmem:[%s9147_s1 + $0x2ef8] sm:$0xff]  ;;  %v3953_v33 = vld [vmem:[%s9148_s0 + $0x8] sm:$0xff] }
 0x35a   :  { %3779 = vmatpush.msra.mxu2 %v1306_v42  ;;  %3919 = vmatmul.msk.f32.vlgmr.msra.gmra.mxu0 %vm1595_vm0, %v8220_v36  ;;  %v314_v36 = vld [vmem:[%s9147_s1 + $0x8f8] sm:$0xff] }
 0x35b   :  { %3731 = vmatpush.msrb.mxu0 %v346_v23  ;;  %3740 = vmatpush.msrb.mxu1 %v778_v50  ;;  %v682_v52 = vld [vmem:[%s9147_s1 + $0x1478] sm:$0xff]  ;;  %v3954_v50 = vld [vmem:[%s9148_s0 + $0x10] sm:$0xff] }
 0x35c   :  { %3762 = vmatpush.msra.mxu3 %v1002_v13  ;;  %3780 = vmatpush.msra.mxu2 %v1290_v10  ;;  %v906_v0 = vld [vmem:[%s9147_s1 + $0x1b78] sm:$0xff]  ;;  %v3955_v13 = vld [vmem:[%s9148_s0 + $0x20] sm:$0xff] }
 0x35d   :  { %3732 = vmatpush.msrb.mxu0 %v330_v55  ;;  %3741 = vmatpush.msrb.mxu1 %v762_v46  ;;  %v1194_v25 = vld [vmem:[%s9147_s1 + $0x2478] sm:$0xff] }
 0x35e   :  { %3763 = vmatpush.msra.mxu3 %v986_v35  ;;  %3781 = vmatpush.msra.mxu2 %v1274_v61  ;;  %v1514_v34 = vld [vmem:[%s9147_s1 + $0x2e78] sm:$0xff]  ;;  %v3956_v61 = vld [vmem:[%s9148_s0 + $0x28] sm:$0xff] }
 0x35f   :  { %3733 = vmatpush.msrb.mxu0 %v314_v36  ;;  %3742 = vmatpush.msrb.mxu1 %v746_v45  ;;  %v666_v18 = vld [vmem:[%s9147_s1 + $0x13f8] sm:$0xff]  ;;  %v3957_v36 = vld [vmem:[%s9148_s0 + $0x30] sm:$0xff]  ;;  %v3156_v45 = vpop.f32.mrf.mxu2 }
 0x360   :  { %3764 = vmatpush.msra.mxu3 %v970_v32  ;;  %3782 = vmatpush.msra.mxu2 %v1258_v41  ;;  %v890_v56 = vld [vmem:[%s9147_s1 + $0x1af8] sm:$0xff]  ;;  %v3176_v32 = vpop.f32.mrf.mxu0 }
 0x361   :  { %3734 = vmatpush.msrb.mxu0 %v298_v43  ;;  %3743 = vmatpush.msrb.mxu1 %v730_v27  ;;  %v1178_v57 = vld [vmem:[%s9147_s1 + $0x23f8] sm:$0xff]  ;;  %v3874_v43 = vld [vmem:[%s9151_s3 + $0x70] sm:$0xff]  ;;  %v3873_v27 = vld [vmem:[%s9151_s3 + $0x68] sm:$0xff] }
 0x362   :  { %3765 = vmatpush.msra.mxu3 %v954_v1  ;;  %3783 = vmatpush.msra.mxu2 %v1242_v4  ;;  %v1498_v58 = vld [vmem:[%s9147_s1 + $0x2df8] sm:$0xff]  ;;  %v3196_v1 = vpop.f32.mrf.mxu1  ;;  %v3872_v4 = vld [vmem:[%s9151_s3 + $0x60] sm:$0xff] }
 0x363   :  { %3799 = vmatpush.msra.mxu0 %v1562_v19  ;;  %3744 = vmatpush.msrb.mxu1 %v714_v39  ;;  %v650_v40 = vld [vmem:[%s9147_s1 + $0x1378] sm:$0xff]  ;;  %v3216_v19 = vpop.f32.mrf.mxu3 }
 0x364   :  { %3766 = vmatpush.msra.mxu3 %v938_v44  ;;  %3784 = vmatpush.msra.mxu2 %v1226_v47  ;;  %v874_v31 = vld [vmem:[%s9147_s1 + $0x1a78] sm:$0xff] }
 0x365   :  { %3800 = vmatpush.msra.mxu0 %v1546_v22  ;;  %3745 = vmatpush.msrb.mxu1 %v698_v48  ;;  %v1162_v62 = vld [vmem:[%s9147_s1 + $0x2378] sm:$0xff] }
 0x366   :  { %3767 = vmatpush.msra.mxu3 %v922_v49  ;;  %3785 = vmatpush.msra.mxu2 %v1210_v14  ;;  %v1482_v63 = vld [vmem:[%s9147_s1 + $0x2d78] sm:$0xff] }
 0x367   :  { %3801 = vmatpush.msra.mxu0 %v1530_v5  ;;  %3746 = vmatpush.msrb.mxu1 %v682_v52  ;;  %v634_v37 = vld [vmem:[%s9147_s1 + $0x12f8] sm:$0xff]  ;;  %v3236_v44 = vpop.f32.mrf.mxu2 }
 0x368   :  { %3768 = vmatpush.msra.mxu3 %v906_v0  ;;  %3786 = vmatpush.msra.mxu2 %v1194_v25  ;;  %v858_v3 = vld [vmem:[%s9147_s1 + $0x19f8] sm:$0xff]  ;;  %v3256_v47 = vpop.f32.mrf.mxu0 }
 0x369   :  { %3802 = vmatpush.msra.mxu0 %v1514_v34  ;;  %3747 = vmatpush.msrb.mxu1 %v666_v18  ;;  %v1146_v59 = vld [vmem:[%s9147_s1 + $0x22f8] sm:$0xff]  ;;  %v3870_v34 = vld [vmem:[%s9151_s3 + $0x50] sm:$0xff]  ;;  %v3869_v18 = vld [vmem:[%s9151_s3 + $0x48] sm:$0xff] }
 0x36a   :  { %3769 = vmatpush.msra.mxu3 %v890_v56  ;;  %3787 = vmatpush.msra.mxu2 %v1178_v57  ;;  %v1466_v7 = vld [vmem:[%s9147_s1 + $0x2cf8] sm:$0xff]  ;;  %v9098_v22 = vpop.f32.mrf.mxu1 }
 0x36b   :  { %3803 = vmatpush.msra.mxu0 %v1498_v58  ;;  %3748 = vmatpush.msrb.mxu1 %v650_v40  ;;  %v618_v6 = vld [vmem:[%s9147_s1 + $0x1278] sm:$0xff]  ;;  %v3296_v48 = vpop.f32.mrf.mxu3  ;;  %v3868_v58 = vld [vmem:[%s9151_s3 + $0x40] sm:$0xff] }
 0x36c   :  { %3770 = vmatpush.msra.mxu3 %v874_v31  ;;  %3788 = vmatpush.msra.mxu2 %v1162_v62  ;;  %v842_v8 = vld [vmem:[%s9147_s1 + $0x1978] sm:$0xff]  ;;  %v3866_v62 = vld [vmem:[%s9151_s3 + $0x30] sm:$0xff] }
 0x36d   :  { %3804 = vmatpush.msra.mxu0 %v1482_v63  ;;  %3749 = vmatpush.msrb.mxu1 %v634_v37  ;;  %v1130_v53 = vld [vmem:[%s9147_s1 + $0x2278] sm:$0xff]  ;;  %v3865_v37 = vld [vmem:[%s9151_s3 + $0x28] sm:$0xff] }
 0x36e   :  { %3771 = vmatpush.msra.mxu3 %v858_v3  ;;  %3789 = vmatpush.msra.mxu2 %v1146_v59  ;;  %v1450_v9 = vld [vmem:[%s9147_s1 + $0x2c78] sm:$0xff]  ;;  %v3864_v59 = vld [vmem:[%s9151_s3 + $0x20] sm:$0xff] }
 0x36f   :  { %3805 = vmatpush.msra.mxu0 %v1466_v7  ;;  %3750 = vmatpush.msrb.mxu1 %v618_v6  ;;  %v602_v11 = vld [vmem:[%s9147_s1 + $0x11f8] sm:$0xff]  ;;  %v3336_v49 = vpop.f32.mrf.mxu2 }
 0x370   :  { %v826_v12 = vld [vmem:[%s9147_s1 + $0x18f8] sm:$0xff]  ;;  %3772 = vmatpush.msra.mxu3 %v842_v8  ;;  %3790 = vmatpush.msra.mxu2 %v1130_v53  ;;  %v3356_v14 = vpop.f32.mrf.mxu0  ;;  %v3177_v8 = vadd.f32 %v3176_v32, %v3156_v45 }
 0x371   :  { %v1114_v16 = vld [vmem:[%s9147_s1 + $0x21f8] sm:$0xff]  ;;  %3806 = vmatpush.msra.mxu0 %v1450_v9  ;;  %3715 = vmatmul.f32.vlgmr.msrb.gmra.mxu2 %v3951_v38  ;;  %v3862_v9 = vld [vmem:[%s9151_s3 + $0x10] sm:$0xff] }
 0x372   :  { %v1434_v17 = vld [vmem:[%s9147_s1 + $0x2bf8] sm:$0xff]  ;;  %3751 = vmatpush.msrb.mxu1 %v602_v11  ;;  %3773 = vmatpush.msra.mxu3 %v826_v12  ;;  %v3316_v5 = vpop.f32.mrf.mxu1  ;;  %v3861_v12 = vld [vmem:[%s9151_s3 + $0x8] sm:$0xff] }
 0x373   :  { %v586_v15 = vld [vmem:[%s9147_s1 + $0x1178] sm:$0xff]  ;;  %3791 = vmatpush.msra.mxu2 %v1114_v16  ;;  %3807 = vmatpush.msra.mxu0 %v1434_v17  ;;  %v3376_v52 = vpop.f32.mrf.mxu3  ;;  %v3197_v17 = vadd.f32 %v3196_v1, %v3177_v8 }
 0x374   :  { %v810_v28 = vld [vmem:[%s9147_s1 + $0x1878] sm:$0xff]  ;;  %3752 = vmatpush.msrb.mxu1 %v586_v15  ;;  %3735 = vmatmul.f32.vlgmr.msrb.gmra.mxu0 %v3953_v33  ;;  %v3860_v15 = vld [vmem:[%s9151_s3] sm:$0xff] }
 0x375   :  { %v1098_v24 = vld [vmem:[%s9147_s1 + $0x2178] sm:$0xff]  ;;  %3774 = vmatpush.msra.mxu3 %v810_v28 }
 0x376   :  { %v1418_v54 = vld [vmem:[%s9147_s1 + $0x2b78] sm:$0xff]  ;;  %3792 = vmatpush.msra.mxu2 %v1098_v24  ;;  %v3317_v24 = vadd.f32 %v3316_v5, %v3296_v48 }
 0x377   :  { %v570_v60 = vld [vmem:[%s9147_s1 + $0x10f8] sm:$0xff]  ;;  %3808 = vmatpush.msra.mxu0 %v1418_v54  ;;  %v9100_v0 = vpop.f32.mrf.mxu2  ;;  %v3217_v54 = vadd.f32 %v3216_v19, %v3197_v17 }
 0x378   :  { %v1082_v2 = vld [vmem:[%s9147_s1 + $0x20f8] sm:$0xff]  ;;  %3753 = vmatpush.msrb.mxu1 %v570_v60 }
 0x379   :  { %v1402_v51 = vld [vmem:[%s9147_s1 + $0x2af8] sm:$0xff]  ;;  %3793 = vmatpush.msra.mxu2 %v1082_v2 }
 0x37a   :  { %v554_v20 = vld [vmem:[%s9147_s1 + $0x1078] sm:$0xff]  ;;  %3809 = vmatpush.msra.mxu0 %v1402_v51  ;;  %v3396_v56 = vpop.f32.mrf.mxu1 }
 0x37b   :  { %v3952_v26 = vld [vmem:[%s9148_s0 + $0x18] sm:$0xff]  ;;  %3754 = vmatpush.msrb.mxu1 %v554_v20 }
 0x37c   :  { %3775 = vmatmul.f32.vlgmr.msra.gmra.mxu3 %v3952_v26  ;;  %v1066_v29 = vld [vmem:[%s9147_s1 + $0x2078] sm:$0xff]  ;;  %3755 = vmatmul.f32.vlgmr.msrb.gmra.mxu1 %v3954_v50  ;;  %v3337_v26 = vadd.f32 %v3336_v49, %v3317_v24 }
 0x37d   :  { %v1386_v30 = vld [vmem:[%s9147_s1 + $0x2a78] sm:$0xff]  ;;  %3794 = vmatpush.msra.mxu2 %v1066_v29 }
 0x37e   :  { %v1370_v42 = vld [vmem:[%s9147_s1 + $0x29f8] sm:$0xff]  ;;  %3810 = vmatpush.msra.mxu0 %v1386_v30  ;;  %3795 = vmatmul.f32.vlgmr.msra.gmra.mxu2 %v3955_v13  ;;  %v3237_v30 = vadd.f32 %v3236_v44, %v3217_v54  ;;  %v3357_v50 = vadd.f32 %v3356_v14, %v3337_v26 }
 0x37f   :  { %v1594_v23 = vld [vmem:[%s9147_s1 + $0x30f8] sm:$0xff] }
 0x380   :  { %v1354_v10 = vld [vmem:[%s9147_s1 + $0x2978] sm:$0xff]  ;;  %3811 = vmatpush.msra.mxu0 %v1370_v42  ;;  %3833 = vmatpush.msra.mxu1 %v1594_v23  ;;  %v3257_v13 = vadd.f32 %v3256_v47, %v3237_v30 }
 0x381   :  { %v1578_v55 = vld [vmem:[%s9147_s1 + $0x3078] sm:$0xff] }
 0x382   :  { %v1338_v46 = vld [vmem:[%s9147_s1 + $0x28f8] sm:$0xff]  ;;  %3812 = vmatpush.msra.mxu0 %v1354_v10  ;;  %3834 = vmatpush.msra.mxu1 %v1578_v55  ;;  %v3456_v40 = vpop.f32.mrf.mxu2  ;;  %v3377_v10 = vadd.f32 %v3376_v52, %v3357_v50 }
 0x383   :  { %v1322_v35 = vld [vmem:[%s9147_s1 + $0x2878] sm:$0xff] }
 0x384   :  { %3813 = vmatpush.msra.mxu0 %v1338_v46  ;;  %3920 = vmatmul.msk.f32.vlgmr.msra.gmra.mxu1 %vm1595_vm0, %v3957_v36  ;;  %v3875_v41 = vld [vmem:[%s9151_s3 + $0x78] sm:$0xff]  ;;  %v3436_v25 = vpop.f32.mrf.mxu0  ;;  %v3397_v36 = vadd.f32 %v3396_v56, %v3377_v10 }
 0x385   :  { %3880 = vmatpush.msrb.mxu3 %v3875_v41  ;;  %v3871_v39 = vld [vmem:[%s9151_s3 + $0x58] sm:$0xff]  ;;  %v3457_v38 = vadd.f32 %v3456_v40, %v3436_v25 }
 0x386   :  { %3814 = vmatpush.msra.mxu0 %v1322_v35  ;;  %v3867_v31 = vld [vmem:[%s9151_s3 + $0x38] sm:$0xff]  ;;  %v3417_v19 = vadd.f32 %v9100_v0, %v3397_v36 }
 0x387   :  { %3815 = vmatmul.f32.vlgmr.msra.gmra.mxu0 %v3956_v61  ;;  %3881 = vmatpush.msrb.mxu3 %v3874_v43  ;;  %v3863_v6 = vld [vmem:[%s9151_s3 + $0x18] sm:$0xff]  ;;  %v3277_v43 = vadd.f32 %v9098_v22, %v3257_v13 }
 0x389   :  { %3882 = vmatpush.msrb.mxu3 %v3873_v27  ;;  %v3476_v57 = vpop.f32.mrf.mxu3  ;;  %v3849_v44 = vmax.f32 %v8428_v21, %v3277_v43  ;;  %v3922_v21 = vld [vmem:[%s9150_s4] ss:$0 sm:$0xff] }
 0x38a   :  { %v3477_v60 = vadd.f32 %v3476_v57, %v3457_v38 }
 0x38b   :  { %3883 = vmatpush.msrb.mxu3 %v3872_v4  ;;  %v3850_v14 = vmax.f32 %v3849_v44, %v3417_v19 }
 0x38d   :  { %3884 = vmatpush.msrb.mxu3 %v3871_v39 }
 0x38f   :  { %3885 = vmatpush.msrb.mxu3 %v3870_v34 }
 0x390   :  { %v3496_v3 = vpop.f32.mrf.mxu1 }
 0x391   :  { %3886 = vmatpush.msrb.mxu3 %v3869_v18  ;;  %v3497_v33 = vadd.f32 %v3496_v3, %v3477_v60 }
 0x392   :  { %v3556_v7 = vpop.f32.mrf.mxu3 }
 0x393   :  { %3887 = vmatpush.msrb.mxu3 %v3868_v58  ;;  %v3921_v58 = vld [vmem:[%s9149_s2] ss:$0 sm:$0xff] }
 0x395   :  { %3888 = vmatpush.msrb.mxu3 %v3867_v31 }
 0x397   :  { %3889 = vmatpush.msrb.mxu3 %v3866_v62 }
 0x398   :  { %v3516_v63 = vpop.f32.mrf.mxu0 }
 0x399   :  { %3890 = vmatpush.msrb.mxu3 %v3865_v37  ;;  %v3517_v55 = vadd.f32 %v3516_v63, %v3497_v33 }
 0x39a   :  { %v3536_v53 = vpop.f32.mrf.mxu2 }
 0x39b   :  { %3891 = vmatpush.msrb.mxu3 %v3864_v59  ;;  %v3537_v27 = vadd.f32 %v3536_v53, %v3517_v55 }
 0x39d   :  { %3892 = vmatpush.msrb.mxu3 %v3863_v6  ;;  %v3557_v47 = vadd.f32 %v3556_v7, %v3537_v27 }
 0x39f   :  { %3893 = vmatpush.msrb.mxu3 %v3862_v9  ;;  %v3851_v18 = vmax.f32 %v3850_v14, %v3557_v47 }
 0x3a1   :  { %3894 = vmatpush.msrb.mxu3 %v3861_v12 }
 0x3a3   :  { %3895 = vmatpush.msrb.mxu3 %v3860_v15 }
 0x3bb   :  { %v3596_v28 = vpop.f32.mrf.mxu3 }
 0x3bc   :  { %v3576_v16 = vpop.f32.mrf.mxu1 }
 0x3bd   :  { %v3597_v2 = vadd.f32 %v3596_v28, %v3576_v16 }
 0x3bf   :  { %v3616_v11 = vpop.f32.mrf.mxu0  ;;  %v3636_v51 = vpop.f32.mrf.mxu2 }
 0x3c0   :  { %v3617_v42 = vadd.f32 %v3616_v11, %v3597_v2 }
 0x3c2   :  { %v3637_v46 = vadd.f32 %v3636_v51, %v3617_v42 }
 0x3d3   :  { %v3656_v29 = vpop.f32.mrf.mxu1 }
 0x3d4   :  { %v3657_v45 = vadd.f32 %v3656_v29, %v3637_v46 }
 0x3d5   :  { %v3676_v23 = vpop.f32.mrf.mxu3 }
 0x3d6   :  { %v3677_v39 = vadd.f32 %v3676_v23, %v3657_v45 }
 0x3d7   :  { %v3696_v20 = vpop.f32.mrf.mxu0 }
 0x3d8   :  { %v3697_v5 = vadd.f32 %v3696_v20, %v3677_v39 }
 0x3da   :  { %v3852_v57 = vmax.f32 %v3851_v18, %v3697_v5 }
 0x3f1   :  { %v3736_v61 = vpop.f32.mrf.mxu0 }
 0x3f4   :  { %v3716_v35 = vpop.f32.mrf.mxu2 }
 0x3f5   :  { %v3737_v32 = vadd.f32 %v3736_v61, %v3716_v35 }
 0x3f9   :  { %v3756_v41 = vpop.f32.mrf.mxu1 }
 0x3fa   :  { %v3757_v1 = vadd.f32 %v3756_v41, %v3737_v32 }
 0x3ff   :  { %v3776_v4 = vpop.f32.mrf.mxu3 }
 0x400   :  { %v3777_v48 = vadd.f32 %v3776_v4, %v3757_v1 }
 0x401   :  { %v3796_v49 = vpop.f32.mrf.mxu2  ;;  %v3836_v34 = vpop.f32.mrf.mxu1 }
 0x402   :  { %v3797_v52 = vadd.f32 %v3796_v49, %v3777_v48 }
 0x404   :  { %v3816_v25 = vpop.f32.mrf.mxu0 }
 0x405   :  { %v3817_v56 = vadd.f32 %v3816_v25, %v3797_v52 }
 0x407   :  { %v3837_v22 = vadd.f32 %v3836_v34, %v3817_v56 }
 0x409   :  { %v3853_v0 = vmax.f32 %v3852_v57, %v3837_v22 }
 0x40b   :  { %v3858_v40 = vadd.f32 %v3921_v58, %v3853_v0 }
 0x40d   :  { %v3859_v31 = vmax.f32 %v3858_v40, 0.0 }
 0x40f   :  { %3896 = vmatmul.f32.vlgmr.msrb.gmra.mxu3 %v3859_v31 }
 0x492   :  { %v3897_v62 = vpop.f32.mrf.mxu3 }
 0x493   :  { %v3898_v63 = vadd.f32 %v3922_v21, %v3897_v62 }
 0x495   :  { %3900 = vst [vmem:[%s9152_s5] sm:$0xff] %v3898_v63 }

</bundles_post_ra>
